<compile_context>
chip_gen: v6e
topology: v6e:2x2x1
jax: 0.10.0
libtpu: 0.0.40
codegen_flags: <defaults>
</compile_context>

<pallas_src>
import jax
import jax.numpy as jnp
from jax import lax
from jax.experimental import pallas as pl
from jax.experimental.pallas import tpu as pltpu

KH = KW = 3          # kernel_size=3, stride=1, dilation=1, padding='same'
BN_EPS = 1e-5        # PyTorch BatchNorm2d default eps
_VMEM_LIMIT_BYTES = 32 * 1024 * 1024   # explicit: v5e scoped default is 16 MiB


def _pick_block_h(Hu, Wu):
    """Upsampled output rows per grid step.

    Prefer ~512 im2col rows per tile (>=512 sublanes amortizes the ~0.35us
    per-step overhead) while keeping the per-tile footprint far below v7x's
    64 MiB VMEM.  Must be even and divide Hu.
    """
    best = None
    for th in (8, 16, 32, 64):
        if Hu % th != 0:
            continue
        if best is None or th * Wu <= 512:
            best = th
    return best if best is not None else Hu


def gated_up_conv2d_block(x_nchw, params, scale_factor=(2, 2)):
    """Forward pass of GatedUpConv2dBlock (training-mode BatchNorm). NCHW in/out."""
    assert tuple(scale_factor) == (2, 2), "kernel specializes the 2x nearest upsample"
    w_img, b_img, w_gate, b_gate, gamma, beta = params
    N, Cin, H, W = x_nchw.shape
    Cout = w_img.shape[-1]
    C2 = 2 * Cout
    Hu, Wu = 2 * H, 2 * W
    TH = _pick_block_h(Hu, Wu)          # upsampled rows per tile
    HB = Hu // TH
    HALF = TH // 2                      # staged (original-res) rows per tile
    K = KH * KW * Cin                   # fused contraction size

    # ---- small-array glue (original-resolution only; the 4x upsampled tensor
    # never touches HBM) -------------------------------------------------------
    x_nhwc = jnp.transpose(x_nchw, (0, 2, 3, 1)).astype(jnp.float32)
    # W-direction of the nearest upsample is staged here (2x the small input);
    # the H-direction is generated in-kernel.  Pad: W in upsampled space, H in
    # original space (the in-kernel row map turns that into the correct 1-px
    # upsampled-space halo).
    x_w2 = jnp.repeat(x_nhwc, 2, axis=2)                              # (N, H, Wu, Cin)
    x_pad = jnp.pad(x_w2, ((0, 0), (1, 1), (1, 1), (0, 0)))           # (N, H+2, Wu+2, Cin)

    # Fused weights, channel-major: wt[c2, (kh*KW+kw)*Cin + ci]; image conv is
    # rows [0, Cout), gate conv rows [Cout, 2*Cout).
    w4 = jnp.concatenate([w_img, w_gate], axis=-1)                    # (KH, KW, Cin, 2Cout)
    wt = jnp.transpose(w4, (3, 0, 1, 2)).reshape(C2, K).astype(jnp.float32)
    bt = jnp.concatenate([b_img, b_gate]).reshape(C2, 1).astype(jnp.float32)

    def gated_conv_tile(x_ref, w_ref, b_ref):
        """One (n, row-block) tile: in-kernel H-upsample + halo, im2col, one
        fused MXU contraction for both convs, sigmoid gate.
        Returns y^T of shape (Cout, TH*Wu) (channel-major)."""
        hb = pl.program_id(1)
        # Staged rows feeding this block of TH upsampled rows: virtual
        # padded-upsampled row u reads staged row (u+1)//2, i.e. rows
        # [hb*HALF, hb*HALF + HALF + 2).
        r0 = pl.multiple_of(hb * HALF, HALF)
        xr = x_ref[0, pl.ds(r0, HALF + 2), :, :]                      # (HALF+2, Wu+2, Cin)
        # H-direction nearest 2x upsample with the 1-px halo baked in:
        # duplicate each staged row, then drop the first/last duplicate.
        v = jnp.broadcast_to(xr[:, None], (HALF + 2, 2, Wu + 2, Cin))
        v = v.reshape(TH + 4, Wu + 2, Cin)[1:TH + 3]                  # (TH+2, Wu+2, Cin)
        # im2col once; tap order (kh, kw) matches the fused weight layout.
        taps = [v[kh:kh + TH, kw:kw + Wu, :].reshape(TH * Wu, Cin)
                for kh in range(KH) for kw in range(KW)]
        patches = jnp.concatenate(taps, axis=1)                       # (TH*Wu, K)
        # ONE fused MXU op for all 9 taps of both convs (A @ B.T pattern);
        # result lands channel-major: (2*Cout, TH*Wu).
        yy = lax.dot_general(w_ref[...], patches,
                             dimension_numbers=(((1,), (1,)), ((), ())),
                             preferred_element_type=jnp.float32)
        yy = yy + b_ref[...]
        img, gate = yy[:Cout, :], yy[Cout:, :]
        return img * jax.nn.sigmoid(gate)                             # (Cout, TH*Wu) f32

    def stats_kernel(x_ref, w_ref, b_ref, stats_ref):
        # pass 1: per-tile partial (sum, sum_sq) for training-mode batch stats
        y = gated_conv_tile(x_ref, w_ref, b_ref)
        s = jnp.sum(y, axis=1, keepdims=True)                         # (Cout, 1)
        sq = jnp.sum(y * y, axis=1, keepdims=True)                    # (Cout, 1)
        stats_ref[...] = jnp.concatenate([s, sq], axis=1).reshape(1, 1, Cout, 2)

    def bn_relu_kernel(x_ref, w_ref, b_ref, scale_ref, shift_ref, o_ref):
        # pass 2: recompute the cheap conv, apply fused BN affine + ReLU,
        # store lane-dense (TH*Wu lanes) directly in NCHW orientation.
        y = gated_conv_tile(x_ref, w_ref, b_ref)
        out = jnp.maximum(y * scale_ref[...] + shift_ref[...], 0.0)
        o_ref[...] = out.reshape(1, Cout, TH * Wu)

    # Per-sample staged image: block index constant across row-blocks -> one
    # input DMA per sample, overlapped with compute by the pipeline.
    x_spec = pl.BlockSpec((1, H + 2, Wu + 2, Cin), lambda n, hb: (n, 0, 0, 0))
    w_spec = pl.BlockSpec((C2, K), lambda n, hb: (0, 0))
    b_spec = pl.BlockSpec((C2, 1), lambda n, hb: (0, 0))
    cparams = pltpu.CompilerParams(
        dimension_semantics=("parallel", "parallel"),   # v7x: shard over 2 TCs
        vmem_limit_bytes=_VMEM_LIMIT_BYTES)

    # ---- pass 1: gated conv + per-tile (sum, sum_sq) partials ----------------
    partial = pl.pallas_call(
        stats_kernel,
        out_shape=jax.ShapeDtypeStruct((N, HB, Cout, 2), jnp.float32),
        grid=(N, HB),
        in_specs=[x_spec, w_spec, b_spec],
        out_specs=pl.BlockSpec((1, 1, Cout, 2), lambda n, hb: (n, hb, 0, 0)),
        compiler_params=cparams,
    )(x_pad, wt, bt)

    # Tiny per-channel reduction + BN scale/shift folding (XLA glue).
    m_total = float(N * Hu * Wu)
    sums = jnp.sum(partial, axis=(0, 1))                              # (Cout, 2)
    mean = sums[:, 0] / m_total
    var = jnp.maximum(sums[:, 1] / m_total - mean * mean, 0.0)
    rstd = lax.rsqrt(var + BN_EPS)
    scale = (gamma * rstd).reshape(Cout, 1).astype(jnp.float32)
    shift = (beta - gamma * mean * rstd).reshape(Cout, 1).astype(jnp.float32)

    # ---- pass 2: conv recompute + BN + ReLU, lane-dense NCHW stores ----------
    out_flat = pl.pallas_call(
        bn_relu_kernel,
        out_shape=jax.ShapeDtypeStruct((N, Cout, Hu * Wu), jnp.float32),
        grid=(N, HB),
        in_specs=[x_spec, w_spec, b_spec,
                  pl.BlockSpec((Cout, 1), lambda n, hb: (0, 0)),
                  pl.BlockSpec((Cout, 1), lambda n, hb: (0, 0))],
        out_specs=pl.BlockSpec((1, Cout, TH * Wu), lambda n, hb: (n, 0, hb)),
        compiler_params=cparams,
    )(x_pad, wt, bt, scale, shift)

    # Already NCHW -- just a free metadata reshape, no extra transpose pass.
    return out_flat.reshape(N, Cout, Hu, Wu)


def init_params(key, in_ch, out_ch):
    # Deterministic, PyTorch-default-like init (kaiming-uniform bounds).
    fan_in = in_ch * KH * KW
    bound = 1.0 / (fan_in ** 0.5)
    k1, k2, k3, k4 = jax.random.split(key, 4)
    w_img = jax.random.uniform(k1, (KH, KW, in_ch, out_ch), jnp.float32, -bound, bound)
    b_img = jax.random.uniform(k2, (out_ch,), jnp.float32, -bound, bound)
    w_gate = jax.random.uniform(k3, (KH, KW, in_ch, out_ch), jnp.float32, -bound, bound)
    b_gate = jax.random.uniform(k4, (out_ch,), jnp.float32, -bound, bound)
    gamma = jnp.ones((out_ch,), jnp.float32)   # BatchNorm2d default weight
    beta = jnp.zeros((out_ch,), jnp.float32)   # BatchNorm2d default bias
    return (w_img, b_img, w_gate, b_gate, gamma, beta)


def reference(x_nchw, params, scale_factor=(2, 2)):
    # Pure-JAX reference of the PyTorch forward (training-mode BN).
    w_img, b_img, w_gate, b_gate, gamma, beta = params
    sh, sw = scale_factor
    x_up = jnp.repeat(jnp.repeat(x_nchw, sh, axis=2), sw, axis=3)
    x = jnp.transpose(x_up, (0, 2, 3, 1)).astype(jnp.float32)
    dn = lax.conv_dimension_numbers(x.shape, w_img.shape, ('NHWC', 'HWIO', 'NHWC'))

    def conv(w, b):
        return lax.conv_general_dilated(
            x, w, window_strides=(1, 1), padding='SAME',
            dimension_numbers=dn, precision=lax.Precision.HIGHEST
        ) + b.reshape(1, 1, 1, -1)

    y = conv(w_img, b_img) * jax.nn.sigmoid(conv(w_gate, b_gate))
    mean = jnp.mean(y, axis=(0, 1, 2), keepdims=True)
    var = jnp.mean((y - mean) ** 2, axis=(0, 1, 2), keepdims=True)
    y = (y - mean) * lax.rsqrt(var + BN_EPS)
    y = y * gamma.reshape(1, 1, 1, -1) + beta.reshape(1, 1, 1, -1)
    y = jnp.maximum(y, 0.0)
    return jnp.transpose(y, (0, 3, 1, 2))


if __name__ == "__main__":
    key = jax.random.PRNGKey(0)
    kx, kp = jax.random.split(key)

    N, Cin, H, W = 2, 4, 16, 16     # input (NCHW); upsampled to 32x32 inside
    Cout = 8

    x = jax.random.normal(kx, (N, Cin, H, W), jnp.float32)
    params = init_params(kp, Cin, Cout)

    fwd = jax.jit(gated_up_conv2d_block)
    out = jax.block_until_ready(fwd(x, params))

    assert out.shape == (N, Cout, 2 * H, 2 * W), out.shape

    ref = reference(x, params)
    max_err = float(jnp.max(jnp.abs(out - ref)))
    assert max_err < 1e-2, f"mismatch vs reference: max_err={max_err}"

    print("KERNEL_OK")
</pallas_src>

<mosaic_0001>
module attributes {stable_mosaic.version = 11 : i64} {
  func.func @stats_kernel(%arg0: i32, %arg1: i32, %arg2: memref<1x18x34x4xf32, #tpu.memory_space<vmem>>, %arg3: memref<16x36xf32, #tpu.memory_space<vmem>>, %arg4: memref<16x1xf32, #tpu.memory_space<vmem>>, %arg5: memref<1x1x8x2xf32, #tpu.memory_space<vmem>>) attributes {dimension_semantics = [#tpu.dimension_semantics<parallel>, #tpu.dimension_semantics<parallel>], iteration_bounds = array<i64: 2, 2>, scalar_prefetch = 0 : i64, scratch_operands = 0 : i64, tpu.core_type = #tpu.core_type<tc>, window_params = [{transform_indices = @transform_0, window_bounds = array<i64: 1, 18, 34, 4>}, {pipeline_mode = #tpu.pipeline_mode<synchronous>, transform_indices = @transform_1, window_bounds = array<i64: 16, 36>}, {pipeline_mode = #tpu.pipeline_mode<synchronous>, transform_indices = @transform_2, window_bounds = array<i64: 16, 1>}, {transform_indices = @transform_3, window_bounds = array<i64: 1, 1, 8, 2>}]} {
    %c8_i32 = arith.constant 8 : i32
    %0 = arith.muli %arg1, %c8_i32 : i32
    %1 = tpu.assume_multiple %0, 8 : i32
    %c0 = arith.constant 0 : index
    %2 = arith.index_cast %1 : i32 to index
    %c0_0 = arith.constant 0 : index
    %c0_1 = arith.constant 0 : index
    %3 = vector.load %arg2[%c0, %2, %c0_0, %c0_1] : memref<1x18x34x4xf32, #tpu.memory_space<vmem>>, vector<1x10x34x4xf32>
    %4 = vector.shape_cast %3 : vector<1x10x34x4xf32> to vector<10x34x4xf32>
    %5 = vector.shape_cast %4 : vector<10x34x4xf32> to vector<10x1x34x4xf32>
    %6 = vector.shape_cast %5 : vector<10x1x34x4xf32> to vector<10x1x34x4xf32>
    %7 = vector.broadcast %6 : vector<10x1x34x4xf32> to vector<10x2x34x4xf32>
    %8 = vector.shape_cast %7 : vector<10x2x34x4xf32> to vector<20x34x4xf32>
    %9 = vector.extract_strided_slice %8 {offsets = [1, 0, 0], sizes = [18, 34, 4], strides = [1, 1, 1]} : vector<20x34x4xf32> to vector<18x34x4xf32>
    %10 = vector.extract_strided_slice %9 {offsets = [0, 0, 0], sizes = [16, 32, 4], strides = [1, 1, 1]} : vector<18x34x4xf32> to vector<16x32x4xf32>
    %11 = vector.shape_cast %10 : vector<16x32x4xf32> to vector<512x4xf32>
    %12 = vector.extract_strided_slice %9 {offsets = [0, 1, 0], sizes = [16, 32, 4], strides = [1, 1, 1]} : vector<18x34x4xf32> to vector<16x32x4xf32>
    %13 = vector.shape_cast %12 : vector<16x32x4xf32> to vector<512x4xf32>
    %14 = vector.extract_strided_slice %9 {offsets = [0, 2, 0], sizes = [16, 32, 4], strides = [1, 1, 1]} : vector<18x34x4xf32> to vector<16x32x4xf32>
    %15 = vector.shape_cast %14 : vector<16x32x4xf32> to vector<512x4xf32>
    %16 = vector.extract_strided_slice %9 {offsets = [1, 0, 0], sizes = [16, 32, 4], strides = [1, 1, 1]} : vector<18x34x4xf32> to vector<16x32x4xf32>
    %17 = vector.shape_cast %16 : vector<16x32x4xf32> to vector<512x4xf32>
    %18 = vector.extract_strided_slice %9 {offsets = [1, 1, 0], sizes = [16, 32, 4], strides = [1, 1, 1]} : vector<18x34x4xf32> to vector<16x32x4xf32>
    %19 = vector.shape_cast %18 : vector<16x32x4xf32> to vector<512x4xf32>
    %20 = vector.extract_strided_slice %9 {offsets = [1, 2, 0], sizes = [16, 32, 4], strides = [1, 1, 1]} : vector<18x34x4xf32> to vector<16x32x4xf32>
    %21 = vector.shape_cast %20 : vector<16x32x4xf32> to vector<512x4xf32>
    %22 = vector.extract_strided_slice %9 {offsets = [2, 0, 0], sizes = [16, 32, 4], strides = [1, 1, 1]} : vector<18x34x4xf32> to vector<16x32x4xf32>
    %23 = vector.shape_cast %22 : vector<16x32x4xf32> to vector<512x4xf32>
    %24 = vector.extract_strided_slice %9 {offsets = [2, 1, 0], sizes = [16, 32, 4], strides = [1, 1, 1]} : vector<18x34x4xf32> to vector<16x32x4xf32>
    %25 = vector.shape_cast %24 : vector<16x32x4xf32> to vector<512x4xf32>
    %26 = vector.extract_strided_slice %9 {offsets = [2, 2, 0], sizes = [16, 32, 4], strides = [1, 1, 1]} : vector<18x34x4xf32> to vector<16x32x4xf32>
    %27 = vector.shape_cast %26 : vector<16x32x4xf32> to vector<512x4xf32>
    %28 = tpu.concatenate %11, %13, %15, %17, %19, %21, %23, %25, %27 in 1 : vector<512x4xf32>, vector<512x4xf32>, vector<512x4xf32>, vector<512x4xf32>, vector<512x4xf32>, vector<512x4xf32>, vector<512x4xf32>, vector<512x4xf32>, vector<512x4xf32> -> vector<512x36xf32>
    %c0_2 = arith.constant 0 : index
    %c0_3 = arith.constant 0 : index
    %29 = vector.load %arg3[%c0_2, %c0_3] : memref<16x36xf32, #tpu.memory_space<vmem>>, vector<16x36xf32>
    %cst = arith.constant dense<0.000000e+00> : vector<16x512xf32>
    %30 = tpu.matmul %29, %28, %cst {dimension_numbers = #tpu.dot_dimension_numbers<[1], [1], [0], [0], [0, 0, 1, 0], [], []>} : vector<16x36xf32>, vector<512x36xf32>, vector<16x512xf32> -> vector<16x512xf32>
    %c0_4 = arith.constant 0 : index
    %c0_5 = arith.constant 0 : index
    %31 = vector.load %arg4[%c0_4, %c0_5] : memref<16x1xf32, #tpu.memory_space<vmem>>, vector<16x1xf32>
    %32 = vector.broadcast %31 : vector<16x1xf32> to vector<16x512xf32>
    %33 = arith.addf %30, %32 : vector<16x512xf32>
    %34 = vector.extract_strided_slice %33 {offsets = [0, 0], sizes = [8, 512], strides = [1, 1]} : vector<16x512xf32> to vector<8x512xf32>
    %35 = vector.extract_strided_slice %33 {offsets = [8, 0], sizes = [8, 512], strides = [1, 1]} : vector<16x512xf32> to vector<8x512xf32>
    %36 = arith.negf %35 : vector<8x512xf32>
    %37 = math.exp %36 : vector<8x512xf32>
    %cst_6 = arith.constant 1.000000e+00 : f32
    %38 = vector.broadcast %cst_6 : f32 to vector<8x512xf32>
    %39 = arith.addf %38, %37 : vector<8x512xf32>
    %40 = arith.divf %38, %39 : vector<8x512xf32>
    %41 = arith.mulf %34, %40 : vector<8x512xf32>
    %cst_7 = arith.constant dense<0.000000e+00> : vector<8xf32>
    %42 = vector.multi_reduction <add>, %41, %cst_7 [1] : vector<8x512xf32> to vector<8xf32>
    %43 = vector.shape_cast %42 : vector<8xf32> to vector<8x1xf32>
    %44 = arith.mulf %41, %41 : vector<8x512xf32>
    %cst_8 = arith.constant dense<0.000000e+00> : vector<8xf32>
    %45 = vector.multi_reduction <add>, %44, %cst_8 [1] : vector<8x512xf32> to vector<8xf32>
    %46 = vector.shape_cast %45 : vector<8xf32> to vector<8x1xf32>
    %47 = tpu.concatenate %43, %46 in 1 : vector<8x1xf32>, vector<8x1xf32> -> vector<8x2xf32>
    %48 = vector.shape_cast %47 : vector<8x2xf32> to vector<1x1x8x2xf32>
    %c0_9 = arith.constant 0 : index
    %c0_10 = arith.constant 0 : index
    %c0_11 = arith.constant 0 : index
    %c0_12 = arith.constant 0 : index
    %49 = vector.load %arg5[%c0_9, %c0_10, %c0_11, %c0_12] : memref<1x1x8x2xf32, #tpu.memory_space<vmem>>, vector<1x1x8x2xf32>
    tpu.vector_store %arg5[%c0_9, %c0_10, %c0_11, %c0_12], %48 {strides = array<i32>} : memref<1x1x8x2xf32, #tpu.memory_space<vmem>>, vector<1x1x8x2xf32>,
    return
  }
  func.func @transform_0(%arg0: i32, %arg1: i32) -> (i32, i32, i32, i32) {
    %c0_i32 = arith.constant 0 : i32
    %c0_i32_0 = arith.constant 0 : i32
    %c0_i32_1 = arith.constant 0 : i32
    %c0_i32_2 = arith.constant 0 : i32
    return %arg0, %c0_i32, %c0_i32_0, %c0_i32_1 : i32, i32, i32, i32
  }
  func.func @transform_1(%arg0: i32, %arg1: i32) -> (i32, i32) {
    %c0_i32 = arith.constant 0 : i32
    %c0_i32_0 = arith.constant 0 : i32
    %c0_i32_1 = arith.constant 0 : i32
    return %c0_i32, %c0_i32_0 : i32, i32
  }
  func.func @transform_2(%arg0: i32, %arg1: i32) -> (i32, i32) {
    %c0_i32 = arith.constant 0 : i32
    %c0_i32_0 = arith.constant 0 : i32
    %c0_i32_1 = arith.constant 0 : i32
    return %c0_i32, %c0_i32_0 : i32, i32
  }
  func.func @transform_3(%arg0: i32, %arg1: i32) -> (i32, i32, i32, i32) {
    %c0_i32 = arith.constant 0 : i32
    %c0_i32_0 = arith.constant 0 : i32
    %c0_i32_1 = arith.constant 0 : i32
    return %arg0, %arg1, %c0_i32, %c0_i32_0 : i32, i32, i32, i32
  }
}

module attributes {stable_mosaic.version = 11 : i64} {
  func.func @bn_relu_kernel(%arg0: i32, %arg1: i32, %arg2: memref<1x18x34x4xf32, #tpu.memory_space<vmem>>, %arg3: memref<16x36xf32, #tpu.memory_space<vmem>>, %arg4: memref<16x1xf32, #tpu.memory_space<vmem>>, %arg5: memref<8x1xf32, #tpu.memory_space<vmem>>, %arg6: memref<8x1xf32, #tpu.memory_space<vmem>>, %arg7: memref<1x8x512xf32, #tpu.memory_space<vmem>>) attributes {dimension_semantics = [#tpu.dimension_semantics<parallel>, #tpu.dimension_semantics<parallel>], iteration_bounds = array<i64: 2, 2>, scalar_prefetch = 0 : i64, scratch_operands = 0 : i64, tpu.core_type = #tpu.core_type<tc>, window_params = [{transform_indices = @transform_0, window_bounds = array<i64: 1, 18, 34, 4>}, {pipeline_mode = #tpu.pipeline_mode<synchronous>, transform_indices = @transform_1, window_bounds = array<i64: 16, 36>}, {pipeline_mode = #tpu.pipeline_mode<synchronous>, transform_indices = @transform_2, window_bounds = array<i64: 16, 1>}, {pipeline_mode = #tpu.pipeline_mode<synchronous>, transform_indices = @transform_3, window_bounds = array<i64: 8, 1>}, {pipeline_mode = #tpu.pipeline_mode<synchronous>, transform_indices = @transform_4, window_bounds = array<i64: 8, 1>}, {transform_indices = @transform_5, window_bounds = array<i64: 1, 8, 512>}]} {
    %c8_i32 = arith.constant 8 : i32
    %0 = arith.muli %arg1, %c8_i32 : i32
    %1 = tpu.assume_multiple %0, 8 : i32
    %c0 = arith.constant 0 : index
    %2 = arith.index_cast %1 : i32 to index
    %c0_0 = arith.constant 0 : index
    %c0_1 = arith.constant 0 : index
    %3 = vector.load %arg2[%c0, %2, %c0_0, %c0_1] : memref<1x18x34x4xf32, #tpu.memory_space<vmem>>, vector<1x10x34x4xf32>
    %4 = vector.shape_cast %3 : vector<1x10x34x4xf32> to vector<10x34x4xf32>
    %5 = vector.shape_cast %4 : vector<10x34x4xf32> to vector<10x1x34x4xf32>
    %6 = vector.shape_cast %5 : vector<10x1x34x4xf32> to vector<10x1x34x4xf32>
    %7 = vector.broadcast %6 : vector<10x1x34x4xf32> to vector<10x2x34x4xf32>
    %8 = vector.shape_cast %7 : vector<10x2x34x4xf32> to vector<20x34x4xf32>
    %9 = vector.extract_strided_slice %8 {offsets = [1, 0, 0], sizes = [18, 34, 4], strides = [1, 1, 1]} : vector<20x34x4xf32> to vector<18x34x4xf32>
    %10 = vector.extract_strided_slice %9 {offsets = [0, 0, 0], sizes = [16, 32, 4], strides = [1, 1, 1]} : vector<18x34x4xf32> to vector<16x32x4xf32>
    %11 = vector.shape_cast %10 : vector<16x32x4xf32> to vector<512x4xf32>
    %12 = vector.extract_strided_slice %9 {offsets = [0, 1, 0], sizes = [16, 32, 4], strides = [1, 1, 1]} : vector<18x34x4xf32> to vector<16x32x4xf32>
    %13 = vector.shape_cast %12 : vector<16x32x4xf32> to vector<512x4xf32>
    %14 = vector.extract_strided_slice %9 {offsets = [0, 2, 0], sizes = [16, 32, 4], strides = [1, 1, 1]} : vector<18x34x4xf32> to vector<16x32x4xf32>
    %15 = vector.shape_cast %14 : vector<16x32x4xf32> to vector<512x4xf32>
    %16 = vector.extract_strided_slice %9 {offsets = [1, 0, 0], sizes = [16, 32, 4], strides = [1, 1, 1]} : vector<18x34x4xf32> to vector<16x32x4xf32>
    %17 = vector.shape_cast %16 : vector<16x32x4xf32> to vector<512x4xf32>
    %18 = vector.extract_strided_slice %9 {offsets = [1, 1, 0], sizes = [16, 32, 4], strides = [1, 1, 1]} : vector<18x34x4xf32> to vector<16x32x4xf32>
    %19 = vector.shape_cast %18 : vector<16x32x4xf32> to vector<512x4xf32>
    %20 = vector.extract_strided_slice %9 {offsets = [1, 2, 0], sizes = [16, 32, 4], strides = [1, 1, 1]} : vector<18x34x4xf32> to vector<16x32x4xf32>
    %21 = vector.shape_cast %20 : vector<16x32x4xf32> to vector<512x4xf32>
    %22 = vector.extract_strided_slice %9 {offsets = [2, 0, 0], sizes = [16, 32, 4], strides = [1, 1, 1]} : vector<18x34x4xf32> to vector<16x32x4xf32>
    %23 = vector.shape_cast %22 : vector<16x32x4xf32> to vector<512x4xf32>
    %24 = vector.extract_strided_slice %9 {offsets = [2, 1, 0], sizes = [16, 32, 4], strides = [1, 1, 1]} : vector<18x34x4xf32> to vector<16x32x4xf32>
    %25 = vector.shape_cast %24 : vector<16x32x4xf32> to vector<512x4xf32>
    %26 = vector.extract_strided_slice %9 {offsets = [2, 2, 0], sizes = [16, 32, 4], strides = [1, 1, 1]} : vector<18x34x4xf32> to vector<16x32x4xf32>
    %27 = vector.shape_cast %26 : vector<16x32x4xf32> to vector<512x4xf32>
    %28 = tpu.concatenate %11, %13, %15, %17, %19, %21, %23, %25, %27 in 1 : vector<512x4xf32>, vector<512x4xf32>, vector<512x4xf32>, vector<512x4xf32>, vector<512x4xf32>, vector<512x4xf32>, vector<512x4xf32>, vector<512x4xf32>, vector<512x4xf32> -> vector<512x36xf32>
    %c0_2 = arith.constant 0 : index
    %c0_3 = arith.constant 0 : index
    %29 = vector.load %arg3[%c0_2, %c0_3] : memref<16x36xf32, #tpu.memory_space<vmem>>, vector<16x36xf32>
    %cst = arith.constant dense<0.000000e+00> : vector<16x512xf32>
    %30 = tpu.matmul %29, %28, %cst {dimension_numbers = #tpu.dot_dimension_numbers<[1], [1], [0], [0], [0, 0, 1, 0], [], []>} : vector<16x36xf32>, vector<512x36xf32>, vector<16x512xf32> -> vector<16x512xf32>
    %c0_4 = arith.constant 0 : index
    %c0_5 = arith.constant 0 : index
    %31 = vector.load %arg4[%c0_4, %c0_5] : memref<16x1xf32, #tpu.memory_space<vmem>>, vector<16x1xf32>
    %32 = vector.broadcast %31 : vector<16x1xf32> to vector<16x512xf32>
    %33 = arith.addf %30, %32 : vector<16x512xf32>
    %34 = vector.extract_strided_slice %33 {offsets = [0, 0], sizes = [8, 512], strides = [1, 1]} : vector<16x512xf32> to vector<8x512xf32>
    %35 = vector.extract_strided_slice %33 {offsets = [8, 0], sizes = [8, 512], strides = [1, 1]} : vector<16x512xf32> to vector<8x512xf32>
    %36 = arith.negf %35 : vector<8x512xf32>
    %37 = math.exp %36 : vector<8x512xf32>
    %cst_6 = arith.constant 1.000000e+00 : f32
    %38 = vector.broadcast %cst_6 : f32 to vector<8x512xf32>
    %39 = arith.addf %38, %37 : vector<8x512xf32>
    %40 = arith.divf %38, %39 : vector<8x512xf32>
    %41 = arith.mulf %34, %40 : vector<8x512xf32>
    %c0_7 = arith.constant 0 : index
    %c0_8 = arith.constant 0 : index
    %42 = vector.load %arg5[%c0_7, %c0_8] : memref<8x1xf32, #tpu.memory_space<vmem>>, vector<8x1xf32>
    %43 = vector.broadcast %42 : vector<8x1xf32> to vector<8x512xf32>
    %44 = arith.mulf %41, %43 : vector<8x512xf32>
    %c0_9 = arith.constant 0 : index
    %c0_10 = arith.constant 0 : index
    %45 = vector.load %arg6[%c0_9, %c0_10] : memref<8x1xf32, #tpu.memory_space<vmem>>, vector<8x1xf32>
    %46 = vector.broadcast %45 : vector<8x1xf32> to vector<8x512xf32>
    %47 = arith.addf %44, %46 : vector<8x512xf32>
    %cst_11 = arith.constant 0.000000e+00 : f32
    %48 = vector.broadcast %cst_11 : f32 to vector<8x512xf32>
    %49 = arith.maximumf %47, %48 : vector<8x512xf32>
    %50 = vector.shape_cast %49 : vector<8x512xf32> to vector<1x8x512xf32>
    %c0_12 = arith.constant 0 : index
    %c0_13 = arith.constant 0 : index
    %c0_14 = arith.constant 0 : index
    %51 = vector.load %arg7[%c0_12, %c0_13, %c0_14] : memref<1x8x512xf32, #tpu.memory_space<vmem>>, vector<1x8x512xf32>
    tpu.vector_store %arg7[%c0_12, %c0_13, %c0_14], %50 {strides = array<i32>} : memref<1x8x512xf32, #tpu.memory_space<vmem>>, vector<1x8x512xf32>,
    return
  }
  func.func @transform_0(%arg0: i32, %arg1: i32) -> (i32, i32, i32, i32) {
    %c0_i32 = arith.constant 0 : i32
    %c0_i32_0 = arith.constant 0 : i32
    %c0_i32_1 = arith.constant 0 : i32
    %c0_i32_2 = arith.constant 0 : i32
    return %arg0, %c0_i32, %c0_i32_0, %c0_i32_1 : i32, i32, i32, i32
  }
  func.func @transform_1(%arg0: i32, %arg1: i32) -> (i32, i32) {
    %c0_i32 = arith.constant 0 : i32
    %c0_i32_0 = arith.constant 0 : i32
    %c0_i32_1 = arith.constant 0 : i32
    return %c0_i32, %c0_i32_0 : i32, i32
  }
  func.func @transform_2(%arg0: i32, %arg1: i32) -> (i32, i32) {
    %c0_i32 = arith.constant 0 : i32
    %c0_i32_0 = arith.constant 0 : i32
    %c0_i32_1 = arith.constant 0 : i32
    return %c0_i32, %c0_i32_0 : i32, i32
  }
  func.func @transform_3(%arg0: i32, %arg1: i32) -> (i32, i32) {
    %c0_i32 = arith.constant 0 : i32
    %c0_i32_0 = arith.constant 0 : i32
    %c0_i32_1 = arith.constant 0 : i32
    return %c0_i32, %c0_i32_0 : i32, i32
  }
  func.func @transform_4(%arg0: i32, %arg1: i32) -> (i32, i32) {
    %c0_i32 = arith.constant 0 : i32
    %c0_i32_0 = arith.constant 0 : i32
    %c0_i32_1 = arith.constant 0 : i32
    return %c0_i32, %c0_i32_0 : i32, i32
  }
  func.func @transform_5(%arg0: i32, %arg1: i32) -> (i32, i32, i32) {
    %c0_i32 = arith.constant 0 : i32
    %c0_i32_0 = arith.constant 0 : i32
    return %arg0, %c0_i32, %arg1 : i32, i32, i32
  }
}

</mosaic_0001>

<bundles_post_ra>
// kernel: gated_up_conv2d_block.3
= control target key start
LH: loop header
LB: loop body
LE: loop exit
PB: predicated region body
PF: predicated region fallthrough
CT: control target
= control target key end

     0   :  { %s2671_s18 = smov 0   ;;  %s2673_s19 = smov 0   ;;  %s5345_s0 = inlined_call_operand.vmem [shape: f32[2,18,34,4], index: 0, kind: input, shape index: {}]   ;;  %s5346_s1 = inlined_call_operand.vmem [shape: f32[16,36], index: 1, kind: input, shape index: {}]   ;;  %s5347_s2 = inlined_call_operand.vmem [shape: f32[16,1], index: 2, kind: input, shape index: {}]   ;;  %s5348_s3 = inlined_call_operand.vmem [shape: f32[8,1], index: 3, kind: input, shape index: {}]   ;;  %s5349_s4 = inlined_call_operand.vmem [shape: f32[8,1], index: 4, kind: input, shape index: {}]   ;;  %s5350_s5 = inlined_call_operand.vmem [shape: f32[2,8,1024], index: 5, kind: output, shape index: {}]  }
   0x1   :  { %s2675_s20 = smov 0   ;;  %s2677_s21 = smov 0  }
   0x2   :  { %s2679_s22 = smov 0  }
   0x3 LB: > { %s24_s23 = sadd.s32 1, %s2622_s20  ;;  %s27_s24 = sadd.s32 1, %s2626_s21  ;;  %s2630_s22 = sphi %s2679_s22, %s15_s22   ;;  %s2626_s21 = sphi %s2677_s21, %s6005_s21   ;;  %s2622_s20 = sphi %s2675_s20, %s6004_s20   ;;  %s2618_s19 = sphi %s2673_s19, %s6003_s19   ;;  %s2614_s18 = sphi %s2671_s18, %s6002_s18  }
   0x4   : > { %p25_p0 = scmp.ge.s32.totalorder %s24_s23, 2  ;;  %p2338_p1 = scmp.ge.s32.totalorder %s2630_s22, 1 }
   0x5   : > { %p201_p2 = scmp.lt.s32.totalorder %s2630_s22, 5 }
   0x6   : > { %s6007_s23 = smov (%p25_p0, %s24_s23), 0  ;;  %s6009_s24 = smov (!%p25_p0, %s27_s24), %s2626_s21 }
   0x7   : > { %p202_p3 = pnand %p2338_p1, %p201_p2  ;;  %p29_p4 = scmp.ge.s32.totalorder %s6009_s24, 2 }
   0x9   : > { %s6011_s24 = smov (%p29_p4, %s6009_s24), 0  ;;  %205 = sbr.rel (%p202_p3) target bundleno = 936 (0x3a8), region = 40 }
   0xe   : > { %p233_p5 = scmp.lt.s32.totalorder %s2618_s19, 1  ;;  %s2344_s25 = smul.u32 320, %s2614_s18  ;;  %vm346_vm0 = vcmask 1046528   ;;  %vm428_vm1 = vcmask 1045504   ;;  %vm1361_vm2 = vcmask 31744   ;;  %vm1398_vm3 = vcmask 64512  }
   0xf   : > { %s2632_s6 = smov 4   ;;  %s2633_s7 = smov 8   ;;  %vm1435_vm4 = vcmask 97280   ;;  %vm1500_vm5 = vcmask 130048   ;;  %vm1565_vm6 = vcmask 162816   ;;  %vm1630_vm7 = vcmask 195584  }
  0x10   : > { %s6013_s19 = smov (!%p233_p5, %s2618_s19), 1  ;;  %s2634_s8 = smov 12   ;;  %vm1695_vm8 = vcmask 228352   ;;  %vm1760_vm9 = vcmask 261120   ;;  %vm1839_vm10 = vcmask 293888  }
  0x11   : > { %s2491_s26 = smul.u32 720, %s6013_s19  ;;  %s2635_s9 = smov 16  }
  0x12   : > { %s2636_s10 = smov 20   ;;  %s2637_s11 = smov 24  }
  0x13   : > { %s237_s29 = scalar_lea.vmem %s5345_s0, %s2491_s26  ;;  %s2638_s12 = smov 28  }
  0x14   : > { %s2710_s30 = scalar_lea.vmem %s237_s29, %s2344_s25  ;;  %s2639_s13 = smov 32  }
  0x15   : > { %v2713_v0 = vld [vmem:[%s2710_s30 + $0x10] sm:$0xff]  ;;  %v2716_v1 = vld [vmem:[%s2710_s30 + $0x18] sm:$0xff]  ;;  %v2719_v2 = vld [vmem:[%s2710_s30] sm:$0xff] }
  0x16   : > { %v350_v3 = vrot.slane %v2713_v0, 1  ;;  %v352_v4 = vrot.slane %v2716_v1, 1  ;;  %v2724_v5 = vld [vmem:[%s2710_s30 + $0x8] sm:$0xff]  ;;  %v347_v6 = vrot.slane %v2719_v2, 1  ;;  %v2728_v7 = vld [vmem:[%s2710_s30 + $0x20] sm:$0x3] }
  0x17   : > { %v348_v8 = vrot.slane %v2724_v5, 1  ;;  %v354_v9 = vrot.slane %v2728_v7, 1  ;;  %v2733_v10 = vld [vmem:[%s2710_s30 + $0x30] sm:$0xff]  ;;  %v2736_v11 = vld [vmem:[%s2710_s30 + $0x38] sm:$0xff]  ;;  %v2740_v13 = vld [vmem:[%s2710_s30 + $0x28] sm:$0xff] }
  0x18   : > { %v353_v12 = vsel %vm346_vm0, %v350_v3, %v352_v4  ;;  %v357_v16 = vrot.slane %v2733_v10, 1  ;;  %v359_v17 = vrot.slane %v2736_v11, 1  ;;  %v356_v19 = vrot.slane %v2740_v13, 1  ;;  %v2751_v20 = vld [vmem:[%s2710_s30 + $0x40] sm:$0xff]  ;;  %v2754_v21 = vld [vmem:[%s2710_s30 + $0x48] sm:$0x3] }
  0x19   : > { %537 = vrot.lane.b32.xlu1 %v353_v12, %s2632_s6  ;;  %v349_v14 = vsel %vm346_vm0, %v347_v6, %v348_v8  ;;  %v355_v15 = vsel %vm346_vm0, %v352_v4, %v354_v9  ;;  %v351_v18 = vsel %vm346_vm0, %v348_v8, %v350_v3  ;;  %v361_v23 = vrot.slane %v2751_v20, 1  ;;  %v2767_v26 = vld [vmem:[%s2710_s30 + $0x58] sm:$0xff]  ;;  %v2770_v27 = vld [vmem:[%s2710_s30 + $0x60] sm:$0xff]  ;;  %v2773_v28 = vld [vmem:[%s2710_s30 + $0x50] sm:$0xff] }
  0x1a   : > { %533 = vrot.lane.b32.xlu0 %v349_v14, %s2632_s6  ;;  %v2759_v22 = vsel %vm346_vm0, %v357_v16, %v359_v17  ;;  %v363_v24 = vrot.slane %v2754_v21, 1  ;;  %v2764_v25 = vsel %vm346_vm0, %v356_v19, %v357_v16  ;;  %v366_v30 = vrot.slane %v2767_v26, 1  ;;  %v2789_v34 = vld [vmem:[%s2710_s30 + $0x68] sm:$0xff]  ;;  %v2792_v35 = vld [vmem:[%s2710_s30 + $0x70] sm:$0x3]  ;;  %v2807_v40 = vld [vmem:[%s2710_s30 + $0x80] sm:$0xff] }
  0x1b   : > { %5546 = vst [vmem:[#allocation2_spill] sm:$0xff] %v2759_v22  ;;  %5547 = vst [vmem:[#allocation3_spill] sm:$0xff] %v2764_v25  ;;  %v368_v31 = vrot.slane %v2770_v27, 1  ;;  %v2785_v32 = vsel %vm346_vm0, %v359_v17, %v361_v23  ;;  %v365_v33 = vrot.slane %v2773_v28, 1  ;;  %v370_v37 = vrot.slane %v2789_v34, 1  ;;  %v2810_v41 = vld [vmem:[%s2710_s30 + $0x88] sm:$0xff] }
  0x1c   : > { %v2780_v29 = vsel %vm346_vm0, %v361_v23, %v363_v24  ;;  %5549 = vst [vmem:[#allocation5_spill] sm:$0xff] %v2785_v32  ;;  %v372_v38 = vrot.slane %v2792_v35, 1  ;;  %v2813_v42 = vld [vmem:[%s2710_s30 + $0x78] sm:$0xff]  ;;  %v375_v44 = vrot.slane %v2807_v40, 1  ;;  %v377_v45 = vrot.slane %v2810_v41, 1  ;;  %v2829_v48 = vld [vmem:[%s2710_s30 + $0x90] sm:$0xff] }
  0x1d   : > { %539 = vrot.lane.b32.xlu1 %v355_v15, %s2632_s6  ;;  %5548 = vst [vmem:[#allocation4_spill] sm:$0xff] %v2780_v29  ;;  %v2799_v36 = vsel %vm346_vm0, %v366_v30, %v368_v31  ;;  %v2804_v39 = vsel %vm346_vm0, %v365_v33, %v366_v30  ;;  %v2825_v46 = vsel %vm346_vm0, %v368_v31, %v370_v37  ;;  %v374_v47 = vrot.slane %v2813_v42, 1  ;;  %v2832_v49 = vld [vmem:[%s2710_s30 + $0x98] sm:$0x3]  ;;  %v2847_v54 = vld [vmem:[%s2710_s30 + $0xa8] sm:$0xff]  ;;  %v2850_v55 = vld [vmem:[%s2710_s30 + $0xb0] sm:$0xff] }
  0x1e   : > { %535 = vrot.lane.b32.xlu0 %v351_v18, %s2632_s6  ;;  %5550 = vst [vmem:[#allocation6_spill] sm:$0xff] %v2799_v36  ;;  %5551 = vst [vmem:[#allocation7_spill] sm:$0xff] %v2804_v39  ;;  %v2820_v43 = vsel %vm346_vm0, %v370_v37, %v372_v38  ;;  %v2839_v50 = vsel %vm346_vm0, %v375_v44, %v377_v45  ;;  %v379_v51 = vrot.slane %v2829_v48, 1  ;;  %v381_v52 = vrot.slane %v2832_v49, 1  ;;  %v2853_v56 = vld [vmem:[%s2710_s30 + $0xa0] sm:$0xff]  ;;  %v2869_v62 = vld [vmem:[%s2710_s30 + $0xb8] sm:$0xff] }
  0x1f   : > { %5552 = vst [vmem:[#allocation8_spill] sm:$0xff] %v2825_v46  ;;  %5553 = vst [vmem:[#allocation9_spill] sm:$0xff] %v2839_v50  ;;  %v2844_v53 = vsel %vm346_vm0, %v374_v47, %v375_v44  ;;  %v384_v58 = vrot.slane %v2847_v54, 1  ;;  %v386_v59 = vrot.slane %v2850_v55, 1  ;;  %v383_v61 = vrot.slane %v2853_v56, 1  ;;  %v2887_v9 = vld [vmem:[%s2710_s30 + $0xd0] sm:$0xff] }
  0x20   : > { %5554 = vst [vmem:[#allocation10_spill] sm:$0xff] %v2844_v53  ;;  %v2860_v57 = vsel %vm346_vm0, %v379_v51, %v381_v52  ;;  %v2865_v60 = vsel %vm346_vm0, %v377_v45, %v379_v51  ;;  %v2872_v63 = vld [vmem:[%s2710_s30 + $0xc0] sm:$0x3]  ;;  %v388_v4 = vrot.slane %v2869_v62, 1  ;;  %v2890_v12 = vld [vmem:[%s2710_s30 + $0xd8] sm:$0xff]  ;;  %v2893_v14 = vld [vmem:[%s2710_s30 + $0xc8] sm:$0xff] }
  0x21   : > { %543 = vrot.lane.b32.xlu1 %v2759_v22, %s2632_s6  ;;  %5555 = vst [vmem:[#allocation11_spill] sm:$0xff] %v2860_v57  ;;  %5556 = vst [vmem:[#allocation12_spill] sm:$0xff] %v2865_v60  ;;  %v2879_v3 = vsel %vm346_vm0, %v384_v58, %v386_v59  ;;  %v390_v6 = vrot.slane %v2872_v63, 1  ;;  %v2884_v8 = vsel %vm346_vm0, %v383_v61, %v384_v58  ;;  %v393_v16 = vrot.slane %v2887_v9, 1  ;;  %v2909_v23 = vld [vmem:[%s2710_s30 + $0xe0] sm:$0xff]  ;;  %v2927_v38 = vld [vmem:[%s2710_s30 + $0xf8] sm:$0xff] }
  0x22   : > { %541 = vrot.lane.b32.xlu0 %v2764_v25, %s2632_s6  ;;  %5557 = vst [vmem:[#allocation13_spill] sm:$0xff] %v2879_v3  ;;  %5558 = vst [vmem:[#allocation14_spill] sm:$0xff] %v2884_v8  ;;  %v395_v17 = vrot.slane %v2890_v12, 1  ;;  %v2905_v18 = vsel %vm346_vm0, %v386_v59, %v388_v4  ;;  %v392_v19 = vrot.slane %v2893_v14, 1  ;;  %v2912_v24 = vld [vmem:[%s2710_s30 + $0xe8] sm:$0x3] }
  0x23   : > { %v2900_v15 = vsel %vm346_vm0, %v388_v4, %v390_v6  ;;  %v397_v31 = vrot.slane %v2909_v23, 1  ;;  %v399_v33 = vrot.slane %v2912_v24, 1  ;;  %v2930_v44 = vld [vmem:[%s2710_s30 + $0x100] sm:$0xff]  ;;  %v2933_v45 = vld [vmem:[%s2710_s30 + $0xf0] sm:$0xff]  ;;  %v402_v51 = vrot.slane %v2927_v38, 1  ;;  %v2949_v61 = vld [vmem:[%s2710_s30 + $0x108] sm:$0xff] }
  0x24   : > { %v2919_v30 = vsel %vm346_vm0, %v393_v16, %v395_v17  ;;  %v2924_v37 = vsel %vm346_vm0, %v392_v19, %v393_v16  ;;  %v404_v52 = vrot.slane %v2930_v44, 1  ;;  %v401_v59 = vrot.slane %v2933_v45, 1  ;;  %v2952_v4 = vld [vmem:[%s2710_s30 + $0x110] sm:$0x3]  ;;  %v2973_v25 = vld [vmem:[%s2710_s30 + $0x118] sm:$0xff] }
  0x25   : > { %547 = vrot.lane.b32.xlu1 %v2780_v29, %s2632_s6  ;;  %5559 = vst [vmem:[#allocation15_spill] sm:$0xff] %v2919_v30  ;;  %5560 = vst [vmem:[#allocation16_spill] sm:$0xff] %v2924_v37  ;;  %v2940_v47 = vsel %vm346_vm0, %v397_v31, %v399_v33  ;;  %v2945_v58 = vsel %vm346_vm0, %v395_v17, %v397_v31  ;;  %v406_v16 = vrot.slane %v2949_v61, 1  ;;  %v408_v17 = vrot.slane %v2952_v4, 1  ;;  %v2967_v31 = vld [vmem:[%s2710_s30 + $0x120] sm:$0xff]  ;;  %v2970_v33 = vld [vmem:[%s2710_s30 + $0x128] sm:$0xff] }
  0x26   : > { %545 = vrot.lane.b32.xlu0 %v2785_v32, %s2632_s6  ;;  %5561 = vst [vmem:[#allocation17_spill] sm:$0xff] %v2940_v47  ;;  %5562 = vst [vmem:[#allocation18_spill] sm:$0xff] %v2945_v58  ;;  %v2959_v6 = vsel %vm346_vm0, %v402_v51, %v404_v52  ;;  %v2964_v19 = vsel %vm346_vm0, %v401_v59, %v402_v51  ;;  %v411_v51 = vrot.slane %v2967_v31, 1  ;;  %v413_v59 = vrot.slane %v2970_v33, 1 }
  0x27   : > { %5563 = vst [vmem:[#allocation19_spill] sm:$0xff] %v2959_v6  ;;  %5564 = vst [vmem:[#allocation20_spill] sm:$0xff] %v2964_v19  ;;  %v2980_v22 = vsel %vm346_vm0, %v406_v16, %v408_v17  ;;  %v2985_v32 = vsel %vm346_vm0, %v404_v52, %v406_v16  ;;  %v410_v29 = vrot.slane %v2973_v25, 1 }
  0x28   : > { %v2999_v17 = vsel %vm346_vm0, %v411_v51, %v413_v59 }
  0x29   : > { %551 = vrot.lane.b32.xlu1 %v2799_v36, %s2632_s6  ;;  %5565 = vst [vmem:[#allocation21_spill] sm:$0xff] %v2999_v17 }
  0x2a   : > { %549 = vrot.lane.b32.xlu0 %v2804_v39, %s2632_s6  ;;  %v3004_v39 = vsel %vm346_vm0, %v410_v29, %v411_v51 }
  0x2b   : > { %5566 = vst [vmem:[#allocation22_spill] sm:$0xff] %v3004_v39 }
  0x2d   : > { %555 = vrot.lane.b32.xlu1 %v2820_v43, %s2632_s6 }
  0x2e   : > { %553 = vrot.lane.b32.xlu0 %v2825_v46, %s2632_s6 }
  0x31   : > { %559 = vrot.lane.b32.xlu1 %v2839_v50, %s2632_s6  ;;  %v3010_v50 = vld [vmem:[%s2710_s30 + $0x150] sm:$0xff] }
  0x32   : > { %557 = vrot.lane.b32.xlu0 %v2844_v53, %s2632_s6  ;;  %v2989_v53 = vld [vmem:[%s2710_s30 + $0x130] sm:$0xff]  ;;  %v422_v29 = vrot.slane %v3010_v50, 1 }
  0x33   : > { %v415_v52 = vrot.slane %v2989_v53, 1 }
  0x35   : > { %563 = vrot.lane.b32.xlu1 %v2860_v57, %s2632_s6  ;;  %v3025_v51 = vsel %vm346_vm0, %v413_v59, %v415_v52 }
  0x36   : > { %561 = vrot.lane.b32.xlu0 %v2865_v60, %s2632_s6  ;;  %5568 = vst [vmem:[#allocation24_spill] sm:$0xff] %v3025_v51  ;;  %v3029_v60 = vld [vmem:[%s2710_s30 + $0x158] sm:$0xff] }
  0x39   : > { %567 = vrot.lane.b32.xlu1 %v2879_v3, %s2632_s6  ;;  %v3032_v3 = vld [vmem:[%s2710_s30 + $0x160] sm:$0x3] }
  0x3a   : > { %565 = vrot.lane.b32.xlu0 %v2884_v8, %s2632_s6  ;;  %v3013_v8 = vld [vmem:[%s2710_s30 + $0x140] sm:$0xff]  ;;  %v426_v59 = vrot.slane %v3032_v3, 1 }
  0x3b   : > { %v419_v36 = vrot.slane %v3013_v8, 1 }
  0x3d   : > { %571 = vrot.lane.b32.xlu1 %v2900_v15, %s2632_s6 }
  0x3e   : > { %569 = vrot.lane.b32.xlu0 %v2905_v18, %s2632_s6 }
  0x41   : > { %575 = vrot.lane.b32.xlu1 %v2919_v30, %s2632_s6 }
  0x42   : > { %573 = vrot.lane.b32.xlu0 %v2924_v37, %s2632_s6  ;;  %v2992_v37 = vld [vmem:[%s2710_s30 + $0x138] sm:$0x3] }
  0x43   : > { %v417_v16 = vrot.slane %v2992_v37, 1 }
  0x45   : > { %579 = vrot.lane.b32.xlu1 %v2940_v47, %s2632_s6  ;;  %v3020_v30 = vsel %vm346_vm0, %v415_v52, %v417_v16 }
  0x46   : > { %577 = vrot.lane.b32.xlu0 %v2945_v58, %s2632_s6  ;;  %5567 = vst [vmem:[#allocation23_spill] sm:$0xff] %v3020_v30  ;;  %v432_v58 = vrot.slane %v2713_v0, 2 }
  0x49   : > { %583 = vrot.lane.b32.xlu1 %v2959_v6, %s2632_s6 }
  0x4a   : > { %581 = vrot.lane.b32.xlu0 %v2964_v19, %s2632_s6  ;;  %v3007_v19 = vld [vmem:[%s2710_s30 + $0x148] sm:$0xff] }
  0x4b   : > { %v420_v6 = vrot.slane %v3007_v19, 1 }
  0x4d   : > { %587 = vrot.lane.b32.xlu1 %v2980_v22, %s2632_s6  ;;  %v3039_v16 = vsel %vm346_vm0, %v420_v6, %v422_v29  ;;  %v3044_v52 = vsel %vm346_vm0, %v419_v36, %v420_v6  ;;  %v429_v36 = vrot.slane %v2719_v2, 2 }
  0x4e   : > { %585 = vrot.lane.b32.xlu0 %v2985_v32, %s2632_s6  ;;  %5569 = vst [vmem:[#allocation25_spill] sm:$0xff] %v3039_v16  ;;  %5570 = vst [vmem:[#allocation26_spill] sm:$0xff] %v3044_v52 }
  0x51   : > { %591 = vrot.lane.b32.xlu1 %v2999_v17, %s2632_s6 }
  0x52   : > { %589 = vrot.lane.b32.xlu0 %v3004_v39, %s2632_s6  ;;  %v424_v39 = vrot.slane %v3029_v60, 1 }
  0x54   : > { %v3051_v17 = vsel %vm346_vm0, %v424_v39, %v426_v59  ;;  %v3056_v46 = vsel %vm346_vm0, %v422_v29, %v424_v39  ;;  %v434_v59 = vrot.slane %v2716_v1, 2  ;;  %v439_v39 = vrot.slane %v2733_v10, 2 }
  0x55   : > { %595 = vrot.lane.b32.xlu1 %v3020_v30, %s2632_s6  ;;  %v441_v29 = vrot.slane %v2736_v11, 2 }
  0x56   : > { %593 = vrot.lane.b32.xlu0 %v3025_v51, %s2632_s6  ;;  %v430_v51 = vrot.slane %v2724_v5, 2  ;;  %v436_v5 = vrot.slane %v2728_v7, 2  ;;  %v443_v7 = vrot.slane %v2751_v20, 2 }
  0x57   : > { %v3077_v1 = vsel %vm428_vm1, %v439_v39, %v441_v29 }
  0x58   : > { %v433_v6 = vsel %vm428_vm1, %v430_v51, %v432_v58  ;;  %v431_v0 = vsel %vm428_vm1, %v429_v36, %v430_v51  ;;  %v437_v2 = vsel %vm428_vm1, %v434_v59, %v436_v5  ;;  %5571 = vst [vmem:[#allocation27_spill] sm:$0xff] %v3077_v1  ;;  %v445_v51 = vrot.slane %v2754_v21, 2 }
  0x59   : > { %599 = vrot.lane.b32.xlu1 %v3039_v16, %s2632_s6  ;;  %v438_v16 = vrot.slane %v2740_v13, 2  ;;  %v447_v21 = vrot.slane %v2773_v28, 2  ;;  %v452_v5 = vrot.slane %v2789_v34, 2 }
  0x5a   : > { %597 = vrot.lane.b32.xlu0 %v3044_v52, %s2632_s6  ;;  %v435_v52 = vsel %vm428_vm1, %v432_v58, %v434_v59  ;;  %v3089_v58 = vsel %vm428_vm1, %v443_v7, %v445_v51  ;;  %v3094_v59 = vsel %vm428_vm1, %v441_v29, %v443_v7  ;;  %v457_v29 = vrot.slane %v2807_v40, 2 }
  0x5b   : > { %v3082_v36 = vsel %vm428_vm1, %v438_v16, %v439_v39  ;;  %5573 = vst [vmem:[#allocation29_spill] sm:$0xff] %v3089_v58  ;;  %5574 = vst [vmem:[#allocation30_spill] sm:$0xff] %v3094_v59  ;;  %v459_v7 = vrot.slane %v2810_v41, 2 }
  0x5c   : > { %5572 = vst [vmem:[#allocation28_spill] sm:$0xff] %v3082_v36 }
  0x5d   : > { %603 = vrot.lane.b32.xlu1 %v3051_v17, %s2632_s6 }
  0x5e   : > { %601 = vrot.lane.b32.xlu0 %v3056_v46, %s2632_s6 }
  0x61   : > { %643 = vrot.lane.b32.xlu1 %v433_v6, %s2633_s7  ;;  %v450_v6 = vrot.slane %v2770_v27, 2 }
  0x62   : > { %641 = vrot.lane.b32.xlu0 %v431_v0, %s2633_s7  ;;  %v454_v0 = vrot.slane %v2792_v35, 2  ;;  %v456_v35 = vrot.slane %v2813_v42, 2 }
  0x63   : > { %v3119_v51 = vsel %vm428_vm1, %v450_v6, %v452_v5 }
  0x64   : > { %v3114_v39 = vsel %vm428_vm1, %v452_v5, %v454_v0  ;;  %5577 = vst [vmem:[#allocation33_spill] sm:$0xff] %v3119_v51  ;;  %v463_v0 = vrot.slane %v2832_v49, 2  ;;  %v466_v5 = vrot.slane %v2847_v54, 2  ;;  %v465_v49 = vrot.slane %v2853_v56, 2 }
  0x65   : > { %647 = vrot.lane.b32.xlu1 %v437_v2, %s2633_s7 }
  0x66   : > { %645 = vrot.lane.b32.xlu0 %v435_v52, %s2633_s7  ;;  %v448_v52 = vrot.slane %v2767_v26, 2 }
  0x68   : > { %v3102_v16 = vsel %vm428_vm1, %v448_v52, %v450_v6  ;;  %v3107_v2 = vsel %vm428_vm1, %v447_v21, %v448_v52  ;;  %v3127_v52 = vsel %vm428_vm1, %v457_v29, %v459_v7  ;;  %v461_v21 = vrot.slane %v2829_v48, 2 }
  0x69   : > { %651 = vrot.lane.b32.xlu1 %v3077_v1, %s2633_s7  ;;  %5575 = vst [vmem:[#allocation31_spill] sm:$0xff] %v3102_v16  ;;  %5576 = vst [vmem:[#allocation32_spill] sm:$0xff] %v3107_v2  ;;  %v468_v1 = vrot.slane %v2850_v55, 2 }
  0x6a   : > { %649 = vrot.lane.b32.xlu0 %v3082_v36, %s2633_s7  ;;  %5578 = vst [vmem:[#allocation34_spill] sm:$0xff] %v3127_v52  ;;  %v3132_v36 = vsel %vm428_vm1, %v456_v35, %v457_v29  ;;  %v3139_v6 = vsel %vm428_vm1, %v461_v21, %v463_v0  ;;  %v470_v35 = vrot.slane %v2869_v62, 2  ;;  %v472_v0 = vrot.slane %v2872_v63, 2 }
  0x6b   : > { %5579 = vst [vmem:[#allocation35_spill] sm:$0xff] %v3132_v36  ;;  %5580 = vst [vmem:[#allocation36_spill] sm:$0xff] %v3139_v6  ;;  %v3152_v29 = vsel %vm428_vm1, %v466_v5, %v468_v1  ;;  %v474_v63 = vrot.slane %v2893_v14, 2 }
  0x6c   : > { %5582 = vst [vmem:[#allocation38_spill] sm:$0xff] %v3152_v29 }
  0x6d   : > { %655 = vrot.lane.b32.xlu1 %v3089_v58, %s2633_s7  ;;  %v3157_v58 = vsel %vm428_vm1, %v465_v49, %v466_v5  ;;  %v479_v49 = vrot.slane %v2909_v23, 2 }
  0x6e   : > { %653 = vrot.lane.b32.xlu0 %v3094_v59, %s2633_s7  ;;  %v3144_v59 = vsel %vm428_vm1, %v459_v7, %v461_v21  ;;  %5583 = vst [vmem:[#allocation39_spill] sm:$0xff] %v3157_v58  ;;  %v3164_v7 = vsel %vm428_vm1, %v470_v35, %v472_v0  ;;  %v475_v21 = vrot.slane %v2887_v9, 2  ;;  %v481_v0 = vrot.slane %v2912_v24, 2 }
  0x6f   : > { %5581 = vst [vmem:[#allocation37_spill] sm:$0xff] %v3144_v59 }
  0x71   : > { %659 = vrot.lane.b32.xlu1 %v3102_v16, %s2633_s7 }
  0x72   : > { %657 = vrot.lane.b32.xlu0 %v3107_v2, %s2633_s7  ;;  %v3169_v2 = vsel %vm428_vm1, %v468_v1, %v470_v35  ;;  %v3189_v1 = vsel %vm428_vm1, %v479_v49, %v481_v0  ;;  %v484_v35 = vrot.slane %v2927_v38, 2 }
  0x73   : > { %5584 = vst [vmem:[#allocation40_spill] sm:$0xff] %v3169_v2  ;;  %5587 = vst [vmem:[#allocation43_spill] sm:$0xff] %v3189_v1 }
  0x75   : > { %663 = vrot.lane.b32.xlu1 %v3114_v39, %s2633_s7 }
  0x76   : > { %661 = vrot.lane.b32.xlu0 %v3119_v51, %s2633_s7 }
  0x79   : > { %667 = vrot.lane.b32.xlu1 %v3127_v52, %s2633_s7  ;;  %v3182_v52 = vsel %vm428_vm1, %v474_v63, %v475_v21 }
  0x7a   : > { %665 = vrot.lane.b32.xlu0 %v3132_v36, %s2633_s7  ;;  %v477_v36 = vrot.slane %v2890_v12, 2  ;;  %5586 = vst [vmem:[#allocation42_spill] sm:$0xff] %v3182_v52 }
  0x7c   : > { %v3177_v5 = vsel %vm428_vm1, %v475_v21, %v477_v36  ;;  %v3196_v24 = vsel %vm428_vm1, %v477_v36, %v479_v49  ;;  %v483_v21 = vrot.slane %v2933_v45, 2 }
  0x7d   : > { %671 = vrot.lane.b32.xlu1 %v3139_v6, %s2633_s7  ;;  %5585 = vst [vmem:[#allocation41_spill] sm:$0xff] %v3177_v5  ;;  %5589 = vst [vmem:[#allocation45_spill] sm:$0xff] %v3196_v24 }
  0x7e   : > { %669 = vrot.lane.b32.xlu0 %v3144_v59, %s2633_s7  ;;  %v3213_v36 = vsel %vm428_vm1, %v483_v21, %v484_v35  ;;  %v493_v59 = vrot.slane %v2967_v31, 2  ;;  %v492_v21 = vrot.slane %v2973_v25, 2 }
  0x7f   : > { %5593 = vst [vmem:[#allocation49_spill] sm:$0xff] %v3213_v36 }
  0x81   : > { %675 = vrot.lane.b32.xlu1 %v3152_v29, %s2633_s7 }
  0x82   : > { %673 = vrot.lane.b32.xlu0 %v3157_v58, %s2633_s7  ;;  %v486_v58 = vrot.slane %v2930_v44, 2 }
  0x84   : > { %v3206_v0 = vsel %vm428_vm1, %v484_v35, %v486_v58 }
  0x85   : > { %679 = vrot.lane.b32.xlu1 %v3164_v7, %s2633_s7  ;;  %5591 = vst [vmem:[#allocation47_spill] sm:$0xff] %v3206_v0 }
  0x86   : > { %677 = vrot.lane.b32.xlu0 %v3169_v2, %s2633_s7 }
  0x89   : > { %683 = vrot.lane.b32.xlu1 %v3177_v5, %s2633_s7 }
  0x8a   : > { %681 = vrot.lane.b32.xlu0 %v3182_v52, %s2633_s7  ;;  %v488_v52 = vrot.slane %v2949_v61, 2 }
  0x8b   : > { %v3193_v16 = vpop.permute.xlu1 %537 }
  0x8c   : > { %5588 = vst [vmem:[#allocation44_spill] sm:$0xff] %v3193_v16  ;;  %v3199_v63 = vpop.permute.xlu0 %533  ;;  %v490_v16 = vrot.slane %v2952_v4, 2  ;;  %v495_v4 = vrot.slane %v2970_v33, 2  ;;  %v3229_v35 = vsel %vm428_vm1, %v486_v58, %v488_v52  ;;  %v3246_v58 = vsel %vm428_vm1, %v492_v21, %v493_v59 }
  0x8d   : > { %5590 = vst [vmem:[#allocation46_spill] sm:$0xff] %v3199_v63  ;;  %687 = vrot.lane.b32.xlu1 %v3189_v1, %s2633_s7  ;;  %5596 = vst [vmem:[#allocation52_spill] sm:$0xff] %v3229_v35  ;;  %v501_v21 = vrot.slane %v3013_v8, 2 }
  0x8e   : > { %685 = vrot.lane.b32.xlu0 %v3196_v24, %s2633_s7  ;;  %v3222_v63 = vsel %vm428_vm1, %v488_v52, %v490_v16  ;;  %v3239_v16 = vsel %vm428_vm1, %v493_v59, %v495_v4  ;;  %5600 = vst [vmem:[#allocation56_spill] sm:$0xff] %v3246_v58 }
  0x8f   : > { %v3210_v5 = vpop.permute.xlu1 %539  ;;  %5598 = vst [vmem:[#allocation54_spill] sm:$0xff] %v3239_v16 }
  0x90   : > { %5592 = vst [vmem:[#allocation48_spill] sm:$0xff] %v3210_v5  ;;  %v3215_v49 = vpop.permute.xlu0 %535  ;;  %v497_v5 = vrot.slane %v2989_v53, 2 }
  0x91   : > { %5594 = vst [vmem:[#allocation50_spill] sm:$0xff] %v3215_v49  ;;  %691 = vrot.lane.b32.xlu1 %v3206_v0, %s2633_s7  ;;  %v502_v0 = vrot.slane %v3007_v19, 2 }
  0x92   : > { %689 = vrot.lane.b32.xlu0 %v3213_v36, %s2633_s7  ;;  %v3262_v59 = vsel %vm428_vm1, %v495_v4, %v497_v5 }
  0x93   : > { %v3226_v29 = vpop.permute.xlu1 %543  ;;  %5604 = vst [vmem:[#allocation60_spill] sm:$0xff] %v3262_v59 }
  0x94   : > { %5595 = vst [vmem:[#allocation51_spill] sm:$0xff] %v3226_v29  ;;  %v3232_v49 = vpop.permute.xlu0 %541  ;;  %v499_v29 = vrot.slane %v2992_v37, 2  ;;  %v504_v37 = vrot.slane %v3010_v50, 2 }
  0x95   : > { %5597 = vst [vmem:[#allocation53_spill] sm:$0xff] %v3232_v49  ;;  %695 = vrot.lane.b32.xlu1 %v3222_v63, %s2633_s7 }
  0x96   : > { %693 = vrot.lane.b32.xlu0 %v3229_v35, %s2633_s7  ;;  %v3255_v49 = vsel %vm428_vm1, %v497_v5, %v499_v29  ;;  %v3272_v29 = vsel %vm428_vm1, %v502_v0, %v504_v37  ;;  %v3279_v5 = vsel %vm428_vm1, %v501_v21, %v502_v0 }
  0x97   : > { %v3243_v36 = vpop.permute.xlu1 %547  ;;  %5602 = vst [vmem:[#allocation58_spill] sm:$0xff] %v3255_v49  ;;  %5606 = vst [vmem:[#allocation62_spill] sm:$0xff] %v3272_v29 }
  0x98   : > { %5599 = vst [vmem:[#allocation55_spill] sm:$0xff] %v3243_v36  ;;  %v3248_v52 = vpop.permute.xlu0 %545  ;;  %v506_v36 = vrot.slane %v3029_v60, 2  ;;  %5608 = vst [vmem:[#allocation64_spill] sm:$0xff] %v3279_v5 }
  0x99   : > { %5601 = vst [vmem:[#allocation57_spill] sm:$0xff] %v3248_v52  ;;  %699 = vrot.lane.b32.xlu1 %v3239_v16, %s2633_s7 }
  0x9a   : > { %697 = vrot.lane.b32.xlu0 %v3246_v58, %s2633_s7 }
  0x9b   : > { %v3259_v24 = vpop.permute.xlu1 %551 }
  0x9c   : > { %5603 = vst [vmem:[#allocation59_spill] sm:$0xff] %v3259_v24  ;;  %v3265_v52 = vpop.permute.xlu0 %549  ;;  %v508_v24 = vrot.slane %v3032_v3, 2  ;;  %v3293_v3 = vsel %vm428_vm1, %v504_v37, %v506_v36 }
  0x9d   : > { %5605 = vst [vmem:[#allocation61_spill] sm:$0xff] %v3265_v52  ;;  %703 = vrot.lane.b32.xlu1 %v3255_v49, %s2633_s7  ;;  %5610 = vst [vmem:[#allocation66_spill] sm:$0xff] %v3293_v3 }
  0x9e   : > { %701 = vrot.lane.b32.xlu0 %v3262_v59, %s2633_s7  ;;  %v3288_v52 = vsel %vm428_vm1, %v506_v36, %v508_v24 }
  0x9f   : > { %v3276_v58 = vpop.permute.xlu1 %555 }
  0xa0   : > { %5607 = vst [vmem:[#allocation63_spill] sm:$0xff] %v3276_v58  ;;  %v3281_v4 = vpop.permute.xlu0 %553 }
  0xa1   : > { %707 = vrot.lane.b32.xlu1 %v3272_v29, %s2633_s7 }
  0xa2   : > { %705 = vrot.lane.b32.xlu0 %v3279_v5, %s2633_s7 }
  0xa3   : > { %v3290_v16 = vpop.permute.xlu1 %559 }
  0xa4   : > { %5609 = vst [vmem:[#allocation65_spill] sm:$0xff] %v3290_v16  ;;  %v3295_v58 = vpop.permute.xlu0 %557 }
  0xa5   : > { %5611 = vst [vmem:[#allocation67_spill] sm:$0xff] %v3295_v58  ;;  %711 = vrot.lane.b32.xlu1 %v3288_v52, %s2633_s7 }
  0xa6   : > { %709 = vrot.lane.b32.xlu0 %v3293_v3, %s2633_s7 }
  0xa7   : > { %v3301_v0 = vpop.permute.xlu1 %563 }
  0xa8   : > { %5612 = vst [vmem:[#allocation68_spill] sm:$0xff] %v3301_v0  ;;  %v3303_v21 = vpop.permute.xlu0 %561 }
  0xa9   : > { %5613 = vst [vmem:[#allocation69_spill] sm:$0xff] %v3303_v21  ;;  %751 = vrot.lane.b32.xlu1 %v2733_v10, %s2634_s8 }
  0xaa   : > { %749 = vrot.lane.b32.xlu0 %v2740_v13, %s2634_s8 }
  0xab   : > { %v3309_v24 = vpop.permute.xlu1 %567 }
  0xac   : > { %5614 = vst [vmem:[#allocation70_spill] sm:$0xff] %v3309_v24  ;;  %v3311_v36 = vpop.permute.xlu0 %565 }
  0xad   : > { %5615 = vst [vmem:[#allocation71_spill] sm:$0xff] %v3311_v36  ;;  %755 = vrot.lane.b32.xlu1 %v2751_v20, %s2634_s8 }
  0xae   : > { %753 = vrot.lane.b32.xlu0 %v2736_v11, %s2634_s8 }
  0xaf   : > { %v3317_v37 = vpop.permute.xlu1 %571 }
  0xb0   : > { %v3319_v58 = vpop.permute.xlu0 %569 }
  0xb1   : > { %759 = vrot.lane.b32.xlu1 %v2767_v26, %s2634_s8 }
  0xb2   : > { %757 = vrot.lane.b32.xlu0 %v2773_v28, %s2634_s8 }
  0xb3   : > { %v3325_v10 = vpop.permute.xlu1 %575 }
  0xb4   : > { %5616 = vst [vmem:[#allocation72_spill] sm:$0xff] %v3325_v10  ;;  %v3327_v13 = vpop.permute.xlu0 %573 }
  0xb5   : > { %5617 = vst [vmem:[#allocation73_spill] sm:$0xff] %v3327_v13  ;;  %763 = vrot.lane.b32.xlu1 %v2789_v34, %s2634_s8 }
  0xb6   : > { %761 = vrot.lane.b32.xlu0 %v2770_v27, %s2634_s8 }
  0xb7   : > { %v3333_v11 = vpop.permute.xlu1 %579 }
  0xb8   : > { %5618 = vst [vmem:[#allocation74_spill] sm:$0xff] %v3333_v11  ;;  %v3335_v20 = vpop.permute.xlu0 %577 }
  0xb9   : > { %5619 = vst [vmem:[#allocation75_spill] sm:$0xff] %v3335_v20  ;;  %767 = vrot.lane.b32.xlu1 %v2807_v40, %s2634_s8 }
  0xba   : > { %765 = vrot.lane.b32.xlu0 %v2813_v42, %s2634_s8 }
  0xbb   : > { %v3341_v26 = vpop.permute.xlu1 %583 }
  0xbc   : > { %5620 = vst [vmem:[#allocation76_spill] sm:$0xff] %v3341_v26  ;;  %v3343_v28 = vpop.permute.xlu0 %581 }
  0xbd   : > { %5621 = vst [vmem:[#allocation77_spill] sm:$0xff] %v3343_v28  ;;  %771 = vrot.lane.b32.xlu1 %v2829_v48, %s2634_s8 }
  0xbe   : > { %769 = vrot.lane.b32.xlu0 %v2810_v41, %s2634_s8 }
  0xbf   : > { %v3349_v27 = vpop.permute.xlu1 %587 }
  0xc0   : > { %v3351_v34 = vpop.permute.xlu0 %585 }
  0xc1   : > { %775 = vrot.lane.b32.xlu1 %v2847_v54, %s2634_s8 }
  0xc2   : > { %773 = vrot.lane.b32.xlu0 %v2853_v56, %s2634_s8 }
  0xc3   : > { %v3357_v13 = vpop.permute.xlu1 %591 }
  0xc4   : > { %5622 = vst [vmem:[#allocation78_spill] sm:$0xff] %v3357_v13  ;;  %v3359_v10 = vpop.permute.xlu0 %589 }
  0xc5   : > { %5623 = vst [vmem:[#allocation79_spill] sm:$0xff] %v3359_v10  ;;  %779 = vrot.lane.b32.xlu1 %v2869_v62, %s2634_s8 }
  0xc6   : > { %777 = vrot.lane.b32.xlu0 %v2850_v55, %s2634_s8 }
  0xc7   : > { %v3365_v16 = vpop.permute.xlu1 %595 }
  0xc8   : > { %5624 = vst [vmem:[#allocation80_spill] sm:$0xff] %v3365_v16  ;;  %v3367_v20 = vpop.permute.xlu0 %593  ;;  %v300_v16 = vld [vmem:[%s2710_s30 + $0x188] sm:$0x3] }
  0xc9   : > { %5625 = vst [vmem:[#allocation81_spill] sm:$0xff] %v3367_v20  ;;  %783 = vrot.lane.b32.xlu1 %v2887_v9, %s2634_s8 }
  0xca   : > { %781 = vrot.lane.b32.xlu0 %v2893_v14, %s2634_s8 }
  0xcb   : > { %v3373_v54 = vpop.permute.xlu1 %599 }
  0xcc   : > { %5626 = vst [vmem:[#allocation82_spill] sm:$0xff] %v3373_v54  ;;  %v3375_v56 = vpop.permute.xlu0 %597 }
  0xcd   : > { %5627 = vst [vmem:[#allocation83_spill] sm:$0xff] %v3375_v56  ;;  %787 = vrot.lane.b32.xlu1 %v2909_v23, %s2634_s8 }
  0xce   : > { %785 = vrot.lane.b32.xlu0 %v2890_v12, %s2634_s8 }
  0xcf   : > { %v3381_v55 = vpop.permute.xlu1 %603 }
  0xd0   : > { %v3383_v10 = vpop.permute.xlu0 %601 }
  0xd1   : > { %791 = vrot.lane.b32.xlu1 %v2927_v38, %s2634_s8 }
  0xd2   : > { %789 = vrot.lane.b32.xlu0 %v2933_v45, %s2634_s8 }
  0xd3   : > { %v3389_v13 = vpop.permute.xlu1 %643 }
  0xd4   : > { %5628 = vst [vmem:[#allocation84_spill] sm:$0xff] %v3389_v13  ;;  %v3391_v21 = vpop.permute.xlu0 %641 }
  0xd5   : > { %5629 = vst [vmem:[#allocation85_spill] sm:$0xff] %v3391_v21  ;;  %795 = vrot.lane.b32.xlu1 %v2949_v61, %s2634_s8 }
  0xd6   : > { %793 = vrot.lane.b32.xlu0 %v2930_v44, %s2634_s8 }
  0xd7   : > { %v3397_v20 = vpop.permute.xlu1 %647 }
  0xd8   : > { %5630 = vst [vmem:[#allocation86_spill] sm:$0xff] %v3397_v20  ;;  %v3399_v11 = vpop.permute.xlu0 %645 }
  0xd9   : > { %5631 = vst [vmem:[#allocation87_spill] sm:$0xff] %v3399_v11  ;;  %799 = vrot.lane.b32.xlu1 %v2967_v31, %s2634_s8 }
  0xda   : > { %797 = vrot.lane.b32.xlu0 %v2973_v25, %s2634_s8 }
  0xdb   : > { %v3405_v38 = vpop.permute.xlu1 %651 }
  0xdc   : > { %5632 = vst [vmem:[#allocation88_spill] sm:$0xff] %v3405_v38  ;;  %v3407_v45 = vpop.permute.xlu0 %649 }
  0xdd   : > { %5633 = vst [vmem:[#allocation89_spill] sm:$0xff] %v3407_v45  ;;  %803 = vrot.lane.b32.xlu1 %v2989_v53, %s2634_s8 }
  0xde   : > { %801 = vrot.lane.b32.xlu0 %v2970_v33, %s2634_s8 }
  0xdf   : > { %v3413_v44 = vpop.permute.xlu1 %655 }
  0xe0   : > { %5634 = vst [vmem:[#allocation90_spill] sm:$0xff] %v3413_v44  ;;  %v3415_v21 = vpop.permute.xlu0 %653 }
  0xe1   : > { %5635 = vst [vmem:[#allocation91_spill] sm:$0xff] %v3415_v21  ;;  %875 = vrot.lane.b32.xlu1 %v2900_v15, %s2635_s9 }
  0xe2   : > { %811 = vrot.lane.b32.xlu0 %v3029_v60, %s2634_s8 }
  0xe3   : > { %v3421_v11 = vpop.permute.xlu1 %659 }
  0xe4   : > { %5636 = vst [vmem:[#allocation92_spill] sm:$0xff] %v3421_v11  ;;  %v3423_v20 = vpop.permute.xlu0 %657 }
  0xe5   : > { %5637 = vst [vmem:[#allocation93_spill] sm:$0xff] %v3423_v20  ;;  %859 = vrot.lane.b32.xlu1 %v2820_v43, %s2635_s9 }
  0xe6   : > { %907 = vrot.lane.b32.xlu0 %v3051_v17, %s2635_s9 }
  0xe7   : > { %v3429_v13 = vpop.permute.xlu1 %663 }
  0xe8   : > { %v3431_v45 = vpop.permute.xlu0 %661 }
  0xe9   : > { %971 = vrot.lane.b32.xlu1 %v3164_v7, %s2636_s10 }
  0xea   : > { %891 = vrot.lane.b32.xlu0 %v2980_v22, %s2635_s9 }
  0xeb   : > { %v3437_v38 = vpop.permute.xlu1 %667 }
  0xec   : > { %5638 = vst [vmem:[#allocation94_spill] sm:$0xff] %v3437_v38  ;;  %v3439_v21 = vpop.permute.xlu0 %665 }
  0xed   : > { %5639 = vst [vmem:[#allocation95_spill] sm:$0xff] %v3439_v21  ;;  %955 = vrot.lane.b32.xlu1 %v3114_v39, %s2636_s10  ;;  %v3456_v21 = vld [vmem:[%s2710_s30 + $0x180] sm:$0xff] }
  0xee   : > { %1003 = vrot.lane.b32.xlu0 %v3288_v52, %s2636_s10 }
  0xef   : > { %v3445_v44 = vpop.permute.xlu1 %671 }
  0xf0   : > { %5640 = vst [vmem:[#allocation96_spill] sm:$0xff] %v3445_v44  ;;  %v3447_v0 = vpop.permute.xlu0 %669  ;;  %v520_v44 = vrot.slane %v3456_v21, 1 }
  0xf1   : > { %5641 = vst [vmem:[#allocation97_spill] sm:$0xff] %v3447_v0  ;;  %1075 = vrot.lane.b32.xlu1 %v2909_v23, %s2637_s11  ;;  %v522_v0 = vrot.slane %v300_v16, 1 }
  0xf2   : > { %987 = vrot.lane.b32.xlu0 %v3222_v63, %s2636_s10 }
  0xf3   : > { %v3453_v38 = vpop.permute.xlu1 %675 }
  0xf4   : > { %5642 = vst [vmem:[#allocation98_spill] sm:$0xff] %v3453_v38  ;;  %v3459_v20 = vpop.permute.xlu0 %673  ;;  %v5676_v38 = vld [vmem:[#allocation6_spill] sm:$0xff] }
  0xf5   : > { %5643 = vst [vmem:[#allocation99_spill] sm:$0xff] %v3459_v20  ;;  %809 = vrot.lane.b32.xlu1 %v3010_v50, %s2634_s8  ;;  %v523_v20 = vsel %vm346_vm0, %v520_v44, %v522_v0 }
  0xf6   : > { %1107 = vrot.lane.b32.xlu0 %v3456_v21, %s2637_s11 }
  0xf7   : > { %v3466_v23 = vpop.permute.xlu1 %679 }
  0xf8   : > { %v3468_v28 = vpop.permute.xlu0 %677 }
  0xf9   : > { %1091 = vrot.lane.b32.xlu1 %v2989_v53, %s2637_s11  ;;  %v531_v53 = vrot.slane %v300_v16, 2 }
  0xfa   : > { %1059 = vrot.lane.b32.xlu0 %v2829_v48, %s2637_s11  ;;  %v529_v48 = vrot.slane %v3456_v21, 2 }
  0xfb   : > { %v3475_v36 = vpop.permute.xlu1 %683 }
  0xfc   : > { %5644 = vst [vmem:[#allocation100_spill] sm:$0xff] %v3475_v36  ;;  %v3477_v56 = vpop.permute.xlu0 %681 }
  0xfd   : > { %5645 = vst [vmem:[#allocation101_spill] sm:$0xff] %v3477_v56  ;;  %1215 = vrot.lane.b32.xlu1 %v523_v20, %s2638_s12  ;;  %v532_v20 = vsel %vm428_vm1, %v529_v48, %v531_v53  ;;  %v5653_v53 = vld [vmem:[#allocation8_spill] sm:$0xff] }
  0xfe   : > { %1183 = vrot.lane.b32.xlu0 %v2940_v47, %s2638_s12 }
  0xff   : > { %v3482_v11 = vpop.permute.xlu1 %687 }
 0x100   : > { %5646 = vst [vmem:[#allocation102_spill] sm:$0xff] %v3482_v11  ;;  %v3484_v26 = vpop.permute.xlu0 %685 }
 0x101   : > { %5647 = vst [vmem:[#allocation103_spill] sm:$0xff] %v3484_v26  ;;  %905 = vrot.lane.b32.xlu1 %v3056_v46, %s2635_s9 }
 0x102   : > { %873 = vrot.lane.b32.xlu0 %v2905_v18, %s2635_s9 }
 0x103   : > { %v3491_v0 = vpop.permute.xlu1 %691 }
 0x104   : > { %5648 = vst [vmem:[#allocation104_spill] sm:$0xff] %v3491_v0  ;;  %v3493_v56 = vpop.permute.xlu0 %689  ;;  %v5672_v0 = vld [vmem:[#allocation45_spill] sm:$0xff] }
 0x105   : > { %5649 = vst [vmem:[#allocation105_spill] sm:$0xff] %v3493_v56  ;;  %1199 = vrot.lane.b32.xlu1 %v3020_v30, %s2638_s12 }
 0x106   : > { %1167 = vrot.lane.b32.xlu0 %v2860_v57, %s2638_s12  ;;  %v5664_v57 = vld [vmem:[#allocation18_spill] sm:$0xff] }
 0x107   : > { %v3500_v36 = vpop.permute.xlu1 %695 }
 0x108   : > { %v3502_v26 = vpop.permute.xlu0 %693 }
 0x109   : > { %5650 = vst [vmem:[#allocation106_spill] sm:$0xff] %v3502_v26  ;;  %1323 = vrot.lane.b32.xlu1 %v532_v20, %s2639_s13 }
 0x10a   : > { %1291 = vrot.lane.b32.xlu0 %v3189_v1, %s2639_s13 }
 0x10b   : > { %v3507_v16 = vpop.permute.xlu1 %699 }
 0x10c   : > { %5651 = vst [vmem:[#allocation107_spill] sm:$0xff] %v3507_v16  ;;  %v3509_v21 = vpop.permute.xlu0 %697 }
 0x10d   : > { %5652 = vst [vmem:[#allocation108_spill] sm:$0xff] %v3509_v21  ;;  %889 = vrot.lane.b32.xlu1 %v2985_v32, %s2635_s9 }
 0x10e   : > { %857 = vrot.lane.b32.xlu0 %v5653_v53, %s2635_s9 }
 0x10f   : > { %v3515_v11 = vpop.permute.xlu1 %703 }
 0x110   : > { %5654 = vst [vmem:[#allocation8_spill] sm:$0xff] %v3515_v11  ;;  %v3517_v56 = vpop.permute.xlu0 %701 }
 0x111   : > { %5655 = vst [vmem:[#allocation109_spill] sm:$0xff] %v3517_v56  ;;  %1001 = vrot.lane.b32.xlu1 %v3293_v3, %s2636_s10  ;;  %v3540_v56 = vld [vmem:[%s2710_s30 + $0x178] sm:$0xff] }
 0x112   : > { %969 = vrot.lane.b32.xlu0 %v3169_v2, %s2636_s10  ;;  %v527_v30 = vrot.slane %v3540_v56, 2 }
 0x113   : > { %v3523_v20 = vpop.permute.xlu1 %707 }
 0x114   : > { %5656 = vst [vmem:[#allocation110_spill] sm:$0xff] %v3523_v20  ;;  %v3525_v16 = vpop.permute.xlu0 %705  ;;  %v5684_v20 = vld [vmem:[#allocation31_spill] sm:$0xff] }
 0x115   : > { %5657 = vst [vmem:[#allocation111_spill] sm:$0xff] %v3525_v16  ;;  %1307 = vrot.lane.b32.xlu1 %v3255_v49, %s2639_s13 }
 0x116   : > { %1275 = vrot.lane.b32.xlu0 %v3139_v6, %s2639_s13 }
 0x117   : > { %v3531_v21 = vpop.permute.xlu1 %711 }
 0x118   : > { %v3533_v11 = vpop.permute.xlu0 %709 }
 0x119   : > { %985 = vrot.lane.b32.xlu1 %v3229_v35, %s2636_s10 }
 0x11a   : > { %953 = vrot.lane.b32.xlu0 %v3119_v51, %s2636_s10  ;;  %v5707_v51 = vld [vmem:[#allocation49_spill] sm:$0xff] }
 0x11b   : > { %v3542_v1 = vpop.permute.xlu1 %751 }
 0x11c   : > { %5658 = vst [vmem:[#allocation112_spill] sm:$0xff] %v3542_v1  ;;  %v3544_v16 = vpop.permute.xlu0 %749  ;;  %v518_v1 = vrot.slane %v3540_v56, 1 }
 0x11d   : > { %5659 = vst [vmem:[#allocation113_spill] sm:$0xff] %v3544_v16  ;;  %1105 = vrot.lane.b32.xlu1 %v3540_v56, %s2637_s11 }
 0x11e   : > { %1073 = vrot.lane.b32.xlu0 %v2890_v12, %s2637_s11 }
 0x11f   : > { %v3550_v6 = vpop.permute.xlu1 %755 }
 0x120   : > { %5660 = vst [vmem:[#allocation114_spill] sm:$0xff] %v3550_v6  ;;  %v3552_v49 = vpop.permute.xlu0 %753 }
 0x121   : > { %5661 = vst [vmem:[#allocation115_spill] sm:$0xff] %v3552_v49  ;;  %1057 = vrot.lane.b32.xlu1 %v2810_v41, %s2637_s11  ;;  %v521_v49 = vsel %vm346_vm0, %v518_v1, %v520_v44 }
 0x122   : > { %807 = vrot.lane.b32.xlu0 %v3007_v19, %s2634_s8  ;;  %v5665_v19 = vld [vmem:[#allocation13_spill] sm:$0xff] }
 0x123   : > { %v3559_v47 = vpop.permute.xlu1 %759 }
 0x124   : > { %5662 = vst [vmem:[#allocation116_spill] sm:$0xff] %v3559_v47  ;;  %v3561_v16 = vpop.permute.xlu0 %757 }
 0x125   : > { %5663 = vst [vmem:[#allocation117_spill] sm:$0xff] %v3561_v16  ;;  %1181 = vrot.lane.b32.xlu1 %v5664_v57, %s2638_s12  ;;  %v5668_v57 = vld [vmem:[#allocation12_spill] sm:$0xff] }
 0x126   : > { %1089 = vrot.lane.b32.xlu0 %v2970_v33, %s2637_s11  ;;  %v5669_v33 = vld [vmem:[#allocation25_spill] sm:$0xff] }
 0x127   : > { %v3567_v12 = vpop.permute.xlu1 %763 }
 0x128   : > { %v3570_v41 = vpop.permute.xlu0 %761 }
 0x129   : > { %871 = vrot.lane.b32.xlu1 %v5665_v19, %s2635_s9  ;;  %v5703_v19 = vld [vmem:[#allocation54_spill] sm:$0xff] }
 0x12a   : > { %1213 = vrot.lane.b32.xlu0 %v521_v49, %s2638_s12  ;;  %v5673_v49 = vld [vmem:[#allocation24_spill] sm:$0xff] }
 0x12b   : > { %v3575_v6 = vpop.permute.xlu1 %767 }
 0x12c   : > { %5666 = vst [vmem:[#allocation118_spill] sm:$0xff] %v3575_v6  ;;  %v3577_v16 = vpop.permute.xlu0 %765 }
 0x12d   : > { %5667 = vst [vmem:[#allocation119_spill] sm:$0xff] %v3577_v16  ;;  %1165 = vrot.lane.b32.xlu1 %v5668_v57, %s2638_s12  ;;  %v530_v16 = vsel %vm428_vm1, %v527_v30, %v529_v48 }
 0x12e   : > { %903 = vrot.lane.b32.xlu0 %v5669_v33, %s2635_s9 }
 0x12f   : > { %v3584_v44 = vpop.permute.xlu1 %771 }
 0x130   : > { %5670 = vst [vmem:[#allocation120_spill] sm:$0xff] %v3584_v44  ;;  %v3586_v47 = vpop.permute.xlu0 %769  ;;  %v5677_v44 = vld [vmem:[#allocation38_spill] sm:$0xff] }
 0x131   : > { %5671 = vst [vmem:[#allocation121_spill] sm:$0xff] %v3586_v47  ;;  %1289 = vrot.lane.b32.xlu1 %v5672_v0, %s2639_s13  ;;  %v5678_v0 = vld [vmem:[#allocation19_spill] sm:$0xff] }
 0x132   : > { %1197 = vrot.lane.b32.xlu0 %v5673_v49, %s2638_s12 }
 0x133   : > { %v3592_v6 = vpop.permute.xlu1 %775 }
 0x134   : > { %5674 = vst [vmem:[#allocation122_spill] sm:$0xff] %v3592_v6  ;;  %v3595_v57 = vpop.permute.xlu0 %773 }
 0x135   : > { %5675 = vst [vmem:[#allocation123_spill] sm:$0xff] %v3595_v57  ;;  %855 = vrot.lane.b32.xlu1 %v5676_v38, %s2635_s9  ;;  %v5681_v57 = vld [vmem:[#allocation37_spill] sm:$0xff]  ;;  %v5700_v38 = vld [vmem:[#allocation7_spill] sm:$0xff] }
 0x136   : > { %1321 = vrot.lane.b32.xlu0 %v530_v16, %s2639_s13 }
 0x137   : > { %v3600_v56 = vpop.permute.xlu1 %779 }
 0x138   : > { %v3602_v47 = vpop.permute.xlu0 %777 }
 0x139   : > { %967 = vrot.lane.b32.xlu1 %v5677_v44, %s2636_s10 }
 0x13a   : > { %887 = vrot.lane.b32.xlu0 %v5678_v0, %s2635_s9 }
 0x13b   : > { %v3608_v49 = vpop.permute.xlu1 %783 }
 0x13c   : > { %5679 = vst [vmem:[#allocation124_spill] sm:$0xff] %v3608_v49  ;;  %v3610_v48 = vpop.permute.xlu0 %781 }
 0x13d   : > { %5680 = vst [vmem:[#allocation125_spill] sm:$0xff] %v3610_v48  ;;  %1273 = vrot.lane.b32.xlu1 %v5681_v57, %s2639_s13  ;;  %v5687_v48 = vld [vmem:[#allocation47_spill] sm:$0xff] }
 0x13e   : > { %999 = vrot.lane.b32.xlu0 %v3272_v29, %s2636_s10 }
 0x13f   : > { %v3616_v16 = vpop.permute.xlu1 %787 }
 0x140   : > { %5682 = vst [vmem:[#allocation126_spill] sm:$0xff] %v3616_v16  ;;  %v3618_v6 = vpop.permute.xlu0 %785  ;;  %v3635_v16 = vld [vmem:[%s2710_s30 + $0x170] sm:$0xff] }
 0x141   : > { %5683 = vst [vmem:[#allocation127_spill] sm:$0xff] %v3618_v6  ;;  %951 = vrot.lane.b32.xlu1 %v5684_v20, %s2636_s10 }
 0x142   : > { %1305 = vrot.lane.b32.xlu0 %v3262_v59, %s2639_s13  ;;  %v516_v59 = vrot.slane %v3635_v16, 1 }
 0x143   : > { %v3624_v44 = vpop.permute.xlu1 %791 }
 0x144   : > { %5685 = vst [vmem:[#allocation128_spill] sm:$0xff] %v3624_v44  ;;  %v3626_v49 = vpop.permute.xlu0 %789  ;;  %v519_v44 = vsel %vm346_vm0, %v516_v59, %v518_v1  ;;  %v5695_v1 = vld [vmem:[#allocation14_spill] sm:$0xff] }
 0x145   : > { %5686 = vst [vmem:[#allocation129_spill] sm:$0xff] %v3626_v49  ;;  %1071 = vrot.lane.b32.xlu1 %v2887_v9, %s2637_s11 }
 0x146   : > { %983 = vrot.lane.b32.xlu0 %v5687_v48, %s2636_s10  ;;  %v5693_v48 = vld [vmem:[#allocation15_spill] sm:$0xff] }
 0x147   : > { %v3632_v57 = vpop.permute.xlu1 %795 }
 0x148   : > { %v3637_v6 = vpop.permute.xlu0 %793 }
 0x149   : > { %5688 = vst [vmem:[#allocation130_spill] sm:$0xff] %v3637_v6  ;;  %805 = vrot.lane.b32.xlu1 %v3013_v8, %s2634_s8  ;;  %s2340_s8 = sshll.u32 %s2614_s18, 2 }
 0x14a   : > { %1103 = vrot.lane.b32.xlu0 %v3635_v16, %s2637_s11  ;;  %p241_p6 = scmp.lt.s32.totalorder %s2340_s8, 7 }
 0x14b   : > { %v3644_v49 = vpop.permute.xlu1 %799 }
 0x14c   : > { %5689 = vst [vmem:[#allocation131_spill] sm:$0xff] %v3644_v49  ;;  %v3646_v9 = vpop.permute.xlu0 %797  ;;  %s6015_s8 = smov (!%p241_p6, %s2340_s8), 7 }
 0x14d   : > { %5690 = vst [vmem:[#allocation132_spill] sm:$0xff] %v3646_v9  ;;  %1087 = vrot.lane.b32.xlu1 %v2967_v31, %s2637_s11  ;;  %v5694_v31 = vld [vmem:[#allocation26_spill] sm:$0xff] }
 0x14e   : > { %1055 = vrot.lane.b32.xlu0 %v2807_v40, %s2637_s11  ;;  %v5461_v40 = vrot.slane %v3635_v16, 2 }
 0x14f   : > { %v3653_v20 = vpop.permute.xlu1 %803 }
 0x150   : > { %5691 = vst [vmem:[#allocation133_spill] sm:$0xff] %v3653_v20  ;;  %v3655_v8 = vpop.permute.xlu0 %801  ;;  %v528_v24 = vsel %vm428_vm1, %v5461_v40, %v527_v30 }
 0x151   : > { %5692 = vst [vmem:[#allocation134_spill] sm:$0xff] %v3655_v8  ;;  %1211 = vrot.lane.b32.xlu1 %v519_v44, %s2638_s12  ;;  %v5696_v44 = vld [vmem:[#allocation21_spill] sm:$0xff] }
 0x152   : > { %1179 = vrot.lane.b32.xlu0 %v5693_v48, %s2638_s12  ;;  %v5697_v48 = vld [vmem:[#allocation9_spill] sm:$0xff] }
 0x153   : > { %v3660_v49 = vpop.permute.xlu1 %875 }
 0x154   : > { %v3662_v9 = vpop.permute.xlu0 %811 }
 0x155   : > { %901 = vrot.lane.b32.xlu1 %v5694_v31, %s2635_s9 }
 0x156   : > { %869 = vrot.lane.b32.xlu0 %v5695_v1, %s2635_s9  ;;  %v5698_v1 = vld [vmem:[#allocation41_spill] sm:$0xff] }
 0x157   : > { %v3669_v20 = vpop.permute.xlu1 %859 }
 0x158   : > { %v3671_v8 = vpop.permute.xlu0 %907 }
 0x159   : > { %1195 = vrot.lane.b32.xlu1 %v5696_v44, %s2638_s12 }
 0x15a   : > { %1163 = vrot.lane.b32.xlu0 %v5697_v48, %s2638_s12  ;;  %v5699_v48 = vld [vmem:[#allocation20_spill] sm:$0xff] }
 0x15b   : > { %v3680_v31 = vpop.permute.xlu1 %971 }
 0x15c   : > { %v3682_v29 = vpop.permute.xlu0 %891 }
 0x15d   : > { %1319 = vrot.lane.b32.xlu1 %v528_v24, %s2639_s13  ;;  %v5702_v24 = vld [vmem:[#allocation39_spill] sm:$0xff] }
 0x15e   : > { %1287 = vrot.lane.b32.xlu0 %v5698_v1, %s2639_s13 }
 0x15f   : > { %v3687_v54 = vpop.permute.xlu1 %955 }
 0x160   : > { %v3689_v44 = vpop.permute.xlu0 %1003 }
 0x161   : > { %885 = vrot.lane.b32.xlu1 %v5699_v48, %s2635_s9  ;;  %v5704_v48 = vld [vmem:[#allocation34_spill] sm:$0xff] }
 0x162   : > { %853 = vrot.lane.b32.xlu0 %v5700_v38, %s2635_s9 }
 0x163   : > { %v3695_v30 = vpop.permute.xlu1 %1075 }
 0x164   : > { %5701 = vst [vmem:[#allocation135_spill] sm:$0xff] %v3695_v30  ;;  %v3697_v40 = vpop.permute.xlu0 %987 }
 0x165   : > { %997 = vrot.lane.b32.xlu1 %v3279_v5, %s2636_s10  ;;  %v5708_v5 = vld [vmem:[#allocation32_spill] sm:$0xff] }
 0x166   : > { %965 = vrot.lane.b32.xlu0 %v5702_v24, %s2636_s10  ;;  %v296_v24 = vld [vmem:[%s2710_s30 + $0x168] sm:$0xff] }
 0x167   : > { %v3703_v1 = vpop.permute.xlu1 %809 }
 0x168   : > { %v1108_v0 = vpop.permute.xlu0 %1107 }
 0x169   : > { %1303 = vrot.lane.b32.xlu1 %v5703_v19, %s2639_s13  ;;  %v515_v19 = vrot.slane %v296_v24, 1 }
 0x16a   : > { %1271 = vrot.lane.b32.xlu0 %v5704_v48, %s2639_s13 }
 0x16b   : > { %v3709_v38 = vpop.permute.xlu1 %1091  ;;  %v517_v6 = vsel %vm346_vm0, %v515_v19, %v516_v59  ;;  %v5713_v19 = vld [vmem:[#allocation16_spill] sm:$0xff] }
 0x16c   : > { %5705 = vst [vmem:[#allocation136_spill] sm:$0xff] %v3709_v38  ;;  %v3711_v33 = vpop.permute.xlu0 %1059 }
 0x16d   : > { %5706 = vst [vmem:[#allocation137_spill] sm:$0xff] %v3711_v33  ;;  %981 = vrot.lane.b32.xlu1 %v5707_v51, %s2636_s10  ;;  %v1397_v51 = vsel %vm1361_vm2, %v3029_v60, %v3381_v55 }
 0x16e   : > { %949 = vrot.lane.b32.xlu0 %v5708_v5, %s2636_s10  ;;  %v1381_v5 = vsel %vm1361_vm2, %v2869_v62, %v3317_v37 }
 0x16f   : > { %v1216_v35 = vpop.permute.xlu1 %1215  ;;  %v3742_v55 = vsel %vm1398_vm3, %v1381_v5, %v3466_v23 }
 0x170   : > { %v3718_v2 = vpop.permute.xlu0 %1183  ;;  %5710 = vst [vmem:[#allocation139_spill] sm:$0xff] %v3742_v55  ;;  %v1467_v62 = vsel %vm1435_vm4, %v3742_v55, %v3600_v56 }
 0x171   : > { %5709 = vst [vmem:[#allocation138_spill] sm:$0xff] %v3718_v2  ;;  %1101 = vrot.lane.b32.xlu1 %v296_v24, %s2637_s11  ;;  %v1532_v59 = vsel %vm1500_vm5, %v1467_v62, %v3660_v49 }
 0x172   : > { %1069 = vrot.lane.b32.xlu0 %v2893_v14, %s2637_s11  ;;  %v1434_v14 = vsel %vm1398_vm3, %v1397_v51, %v3531_v21  ;;  %v1597_v37 = vsel %vm1565_vm6, %v1532_v59, %v3680_v31  ;;  %v524_v21 = vrot.slane %v296_v24, 2 }
 0x173   : > { %v3723_v48 = vpop.permute.xlu1 %905 }
 0x174   : > { %v3725_v3 = vpop.permute.xlu0 %873 }
 0x175   : > { %1085 = vrot.lane.b32.xlu1 %v2973_v25, %s2637_s11  ;;  %v1499_v25 = vsel %vm1435_vm4, %v1434_v14, %v3662_v9  ;;  %v1662_v14 = vsel %vm1630_vm7, %v1597_v37, %v3695_v30 }
 0x176   : > { %1053 = vrot.lane.b32.xlu0 %v2813_v42, %s2637_s11  ;;  %v1564_v51 = vsel %vm1500_vm5, %v1499_v25, %v3671_v8 }
 0x177   : > { %v3746_v26 = vpop.permute.xlu1 %1199  ;;  %v1629_v5 = vsel %vm1565_vm6, %v1564_v51, %v3689_v44 }
 0x178   : > { %5711 = vst [vmem:[#allocation140_spill] sm:$0xff] %v3746_v26  ;;  %v3753_v42 = vpop.permute.xlu0 %1167  ;;  %v1694_v23 = vsel %vm1630_vm7, %v1629_v5, %v1108_v0  ;;  %v5715_v0 = vld [vmem:[#allocation22_spill] sm:$0xff] }
 0x179   : > { %5712 = vst [vmem:[#allocation141_spill] sm:$0xff] %v3753_v42  ;;  %1209 = vrot.lane.b32.xlu1 %v517_v6, %s2638_s12  ;;  %v1759_v25 = vsel %vm1695_vm8, %v1694_v23, %v1216_v35  ;;  %v1727_v6 = vsel %vm1695_vm8, %v1662_v14, %v3718_v2  ;;  %v5716_v5 = vld [vmem:[#allocation10_spill] sm:$0xff]  ;;  %v5717_v35 = vrot.slane %v3635_v16, 2 }
 0x17a   : > { %1177 = vrot.lane.b32.xlu0 %v5713_v19, %s2638_s12  ;;  %v5720_v16 = vld [vmem:[#allocation42_spill] sm:$0xff] }
 0x17b   : > { %v1324_v62 = vpop.permute.xlu1 %1323  ;;  %v526_v37 = vsel %vm428_vm1, %v524_v21, %v5717_v35 }
 0x17c   : > { %v3768_v51 = vpop.permute.xlu0 %1291  ;;  %v1824_v59 = vsel %vm1760_vm9, %v1759_v25, %v1324_v62  ;;  %v1389_v25 = vsel %vm1361_vm2, %v2949_v61, %v3349_v27  ;;  %v2559_v62 = vld [vmem:[%s2710_s30 + $0x68] sm:$0xff] }
 0x17d   : > { %5714 = vst [vmem:[#allocation16_spill] sm:$0xff] %v3768_v51  ;;  %1193 = vrot.lane.b32.xlu1 %v5715_v0, %s2638_s12  ;;  %v1792_v24 = vsel %vm1760_vm9, %v1727_v6, %v3768_v51  ;;  %2455 = vmatprep.subr.msk.mxu1 %vm1839_vm10, %v1824_v59  ;;  %v5718_v6 = vld [vmem:[#allocation63_spill] sm:$0xff] }
 0x17e   : > { %1161 = vrot.lane.b32.xlu0 %v5716_v5, %s2638_s12  ;;  %2419 = vmatprep.subr.msk.mxu0 %vm1839_vm10, %v1792_v24  ;;  %v1373_v59 = vsel %vm1361_vm2, %v2559_v62, %v5718_v6  ;;  %v3797_v24 = vsel %vm1398_vm3, %v1389_v25, %v3500_v36 }
 0x17f   : > { %v3784_v23 = vpop.permute.xlu1 %889  ;;  %5719 = vst [vmem:[#allocation22_spill] sm:$0xff] %v3797_v24  ;;  %v3803_v21 = vsel %vm1398_vm3, %v1373_v59, %v3429_v13  ;;  %v1483_v27 = vsel %vm1435_vm4, %v3797_v24, %v3632_v57  ;;  %v5722_v59 = vld [vmem:[#allocation56_spill] sm:$0xff] }
 0x180   : > { %v3786_v14 = vpop.permute.xlu0 %857  ;;  %5721 = vst [vmem:[#allocation10_spill] sm:$0xff] %v3803_v21  ;;  %v1548_v36 = vsel %vm1500_vm5, %v1483_v27, %v3682_v29  ;;  %v5723_v27 = vld [vmem:[#allocation35_spill] sm:$0xff] }
 0x181   : > { %1317 = vrot.lane.b32.xlu1 %v526_v37, %s2639_s13  ;;  %v1451_v37 = vsel %vm1435_vm4, %v3803_v21, %v3567_v12  ;;  %v1613_v6 = vsel %vm1565_vm6, %v1548_v36, %v3697_v40 }
 0x182   : > { %1285 = vrot.lane.b32.xlu0 %v5720_v16, %s2639_s13  ;;  %v1516_v13 = vsel %vm1500_vm5, %v1451_v37, %v3669_v20  ;;  %v1678_v2 = vsel %vm1630_vm7, %v1613_v6, %v3709_v38 }
 0x183   : > { %v3808_v35 = vpop.permute.xlu1 %1001  ;;  %v1581_v51 = vsel %vm1565_vm6, %v1516_v13, %v3687_v54  ;;  %v1743_v37 = vsel %vm1695_vm8, %v1678_v2, %v3746_v26 }
 0x184   : > { %v3815_v25 = vpop.permute.xlu0 %969  ;;  %v1646_v30 = vsel %vm1630_vm7, %v1581_v51, %v3711_v33  ;;  %v2560_v51 = vld [vmem:[%s2710_s30 + $0xb8] sm:$0xff] }
 0x185   : > { %1301 = vrot.lane.b32.xlu1 %v5722_v59, %s2639_s13  ;;  %v1711_v36 = vsel %vm1695_vm8, %v1646_v30, %v3753_v42  ;;  %v5760_v42 = vld [vmem:[#allocation82_spill] sm:$0xff] }
 0x186   : > { %1269 = vrot.lane.b32.xlu0 %v5723_v27, %s2639_s13 }
 0x187   : > { %v3833_v55 = vpop.permute.xlu1 %1307 }
 0x188   : > { %5724 = vst [vmem:[#allocation63_spill] sm:$0xff] %v3833_v55  ;;  %v3837_v21 = vpop.permute.xlu0 %1275  ;;  %v1808_v13 = vsel %vm1760_vm9, %v1743_v37, %v3833_v55 }
 0x189   : > { %5725 = vst [vmem:[#allocation42_spill] sm:$0xff] %v3837_v21  ;;  %1099 = vrot.lane.b32.xlu1 %v3029_v60, %s2637_s11  ;;  %v1776_v6 = vsel %vm1760_vm9, %v1711_v36, %v3837_v21  ;;  %2456 = vmatpush3.xpose.msk.msra.mxu1 %vm1839_vm10, %v1808_v13 }
 0x18a   : > { %1067 = vrot.lane.b32.xlu0 %v2560_v51, %s2637_s11  ;;  %2420 = vmatpush3.xpose.msk.msra.mxu0 %vm1839_vm10, %v1776_v6  ;;  %v2561_v6 = vld [vmem:[%s2710_s30 + $0xb0] sm:$0xff] }
 0x18b   : > { %v3849_v2 = vpop.permute.xlu1 %985 }
 0x18c   : > { %v3851_v30 = vpop.permute.xlu0 %953 }
 0x18d   : > { %1083 = vrot.lane.b32.xlu1 %v2949_v61, %s2637_s11 }
 0x18e   : > { %1051 = vrot.lane.b32.xlu0 %v2559_v62, %s2637_s11 }
 0x18f   : > { %v1106_v60 = vpop.permute.xlu1 %1105 }
 0x190   : > { %v3856_v37 = vpop.permute.xlu0 %1073 }
 0x191   : > { %5726 = vst [vmem:[#allocation56_spill] sm:$0xff] %v3856_v37  ;;  %1207 = vrot.lane.b32.xlu1 %v3051_v17, %s2638_s12 }
 0x192   : > { %1175 = vrot.lane.b32.xlu0 %v2900_v15, %s2638_s12 }
 0x193   : > { %v3862_v36 = vpop.permute.xlu1 %1057 }
 0x194   : > { %5727 = vst [vmem:[#allocation35_spill] sm:$0xff] %v3862_v36  ;;  %v3864_v13 = vpop.permute.xlu0 %807 }
 0x195   : > { %1191 = vrot.lane.b32.xlu1 %v2980_v22, %s2638_s12  ;;  %v1380_v22 = vsel %vm1361_vm2, %v2561_v6, %v3319_v58 }
 0x196   : > { %1159 = vrot.lane.b32.xlu0 %v2820_v43, %s2638_s12  ;;  %v3887_v43 = vsel %vm1398_vm3, %v1380_v22, %v3468_v28 }
 0x197   : > { %v3870_v61 = vpop.permute.xlu1 %1181  ;;  %5731 = vst [vmem:[#allocation145_spill] sm:$0xff] %v3887_v43 }
 0x198   : > { %5728 = vst [vmem:[#allocation142_spill] sm:$0xff] %v3870_v61  ;;  %v3872_v62 = vpop.permute.xlu0 %1089 }
 0x199   : > { %5729 = vst [vmem:[#allocation143_spill] sm:$0xff] %v3872_v62  ;;  %1315 = vrot.lane.b32.xlu1 %v3288_v52, %s2639_s13 }
 0x19a   : > { %1283 = vrot.lane.b32.xlu0 %v3164_v7, %s2639_s13  ;;  %v1466_v7 = vsel %vm1435_vm4, %v3887_v43, %v3602_v47  ;;  %v5763_v43 = vld [vmem:[#allocation110_spill] sm:$0xff] }
 0x19b   : > { %v3878_v15 = vpop.permute.xlu1 %871  ;;  %v1531_v58 = vsel %vm1500_vm5, %v1466_v7, %v3725_v3 }
 0x19c   : > { %5730 = vst [vmem:[#allocation144_spill] sm:$0xff] %v3878_v15  ;;  %v1214_v17 = vpop.permute.xlu0 %1213 }
 0x19d   : > { %1299 = vrot.lane.b32.xlu1 %v3222_v63, %s2639_s13  ;;  %v1596_v63 = vsel %vm1565_vm6, %v1531_v58, %v3815_v25 }
 0x19e   : > { %1267 = vrot.lane.b32.xlu0 %v3114_v39, %s2639_s13  ;;  %v1396_v39 = vsel %vm1361_vm2, %v3010_v50, %v3383_v10  ;;  %v1661_v28 = vsel %vm1630_vm7, %v1596_v63, %v3856_v37  ;;  %v2563_v63 = vld [vmem:[%s2710_s30 + $0x60] sm:$0xff] }
 0x19f   : > { %v3894_v52 = vpop.permute.xlu1 %1165  ;;  %v1433_v22 = vsel %vm1398_vm3, %v1396_v39, %v3533_v11  ;;  %v1726_v7 = vsel %vm1695_vm8, %v1661_v28, %v3870_v61  ;;  %v5755_v61 = vld [vmem:[#allocation13_spill] sm:$0xff]  ;;  %v5758_v37 = vld [vmem:[#allocation6_spill] sm:$0xff] }
 0x1a0   : > { %5732 = vst [vmem:[#allocation146_spill] sm:$0xff] %v3894_v52  ;;  %v3898_v51 = vpop.permute.xlu0 %903  ;;  %v1498_v21 = vsel %vm1435_vm4, %v1433_v22, %v3703_v1 }
 0x1a1   : > { %1097 = vrot.lane.b32.xlu1 %v3010_v50, %s2637_s11  ;;  %v1563_v10 = vsel %vm1500_vm5, %v1498_v21, %v3723_v48  ;;  %v1372_v21 = vsel %vm1361_vm2, %v2563_v63, %v3281_v4 }
 0x1a2   : > { %1065 = vrot.lane.b32.xlu0 %v2561_v6, %s2637_s11  ;;  %v2562_v6 = vld [vmem:[%s2710_s30 + $0x100] sm:$0xff]  ;;  %v1628_v11 = vsel %vm1565_vm6, %v1563_v10, %v3808_v35 }
 0x1a3   : > { %v3914_v58 = vpop.permute.xlu1 %1289  ;;  %v1693_v39 = vsel %vm1630_vm7, %v1628_v11, %v1106_v60 }
 0x1a4   : > { %5733 = vst [vmem:[#allocation147_spill] sm:$0xff] %v3914_v58  ;;  %v3918_v55 = vpop.permute.xlu0 %1197  ;;  %v1791_v50 = vsel %vm1760_vm9, %v1726_v7, %v3914_v58  ;;  %v1758_v22 = vsel %vm1695_vm8, %v1693_v39, %v1214_v17 }
 0x1a5   : > { %5734 = vst [vmem:[#allocation148_spill] sm:$0xff] %v3918_v55  ;;  %1081 = vrot.lane.b32.xlu1 %v2562_v6, %s2637_s11  ;;  %2421 = vmatprep.subr.msk.mxu0 %vm1839_vm10, %v1791_v50  ;;  %v3942_v50 = vsel %vm1398_vm3, %v1372_v21, %v3431_v45 }
 0x1a6   : > { %1049 = vrot.lane.b32.xlu0 %v2563_v63, %s2637_s11  ;;  %5736 = vst [vmem:[#allocation150_spill] sm:$0xff] %v3942_v50  ;;  %v1450_v60 = vsel %vm1435_vm4, %v3942_v50, %v3570_v41 }
 0x1a7   : > { %v3932_v28 = vpop.permute.xlu1 %855  ;;  %v1515_v4 = vsel %vm1500_vm5, %v1450_v60, %v3786_v14  ;;  %v5745_v60 = vld [vmem:[#allocation40_spill] sm:$0xff] }
 0x1a8   : > { %5735 = vst [vmem:[#allocation149_spill] sm:$0xff] %v3932_v28  ;;  %v1322_v7 = vpop.permute.xlu0 %1321 }
 0x1a9   : > { %v1823_v58 = vsel %vm1760_vm9, %v1758_v22, %v1322_v7  ;;  %1205 = vrot.lane.b32.xlu1 %v3056_v46, %s2638_s12  ;;  %v1580_v46 = vsel %vm1565_vm6, %v1515_v4, %v3851_v30  ;;  %v5742_v22 = vld [vmem:[#allocation130_spill] sm:$0xff] }
 0x1aa   : > { %1173 = vrot.lane.b32.xlu0 %v2905_v18, %s2638_s12  ;;  %2457 = vmatprep.subr.msk.mxu1 %vm1839_vm10, %v1823_v58  ;;  %v1388_v18 = vsel %vm1361_vm2, %v2562_v6, %v3351_v34  ;;  %v1645_v45 = vsel %vm1630_vm7, %v1580_v46, %v3862_v36  ;;  %v5739_v58 = vld [vmem:[#allocation106_spill] sm:$0xff] }
 0x1ab   : > { %v3950_v17 = vpop.permute.xlu1 %967  ;;  %v3968_v11 = vsel %vm1398_vm3, %v1388_v18, %v5739_v58  ;;  %v1710_v63 = vsel %vm1695_vm8, %v1645_v45, %v3894_v52  ;;  %v5744_v7 = vld [vmem:[#allocation66_spill] sm:$0xff]  ;;  %v5748_v58 = vld [vmem:[#allocation52_spill] sm:$0xff] }
 0x1ac   : > { %5737 = vst [vmem:[#allocation151_spill] sm:$0xff] %v3950_v17  ;;  %v3954_v10 = vpop.permute.xlu0 %887  ;;  %5740 = vst [vmem:[#allocation106_spill] sm:$0xff] %v3968_v11 }
 0x1ad   : > { %5738 = vst [vmem:[#allocation152_spill] sm:$0xff] %v3954_v10  ;;  %1189 = vrot.lane.b32.xlu1 %v2985_v32, %s2638_s12  ;;  %v1482_v32 = vsel %vm1435_vm4, %v3968_v11, %v5742_v22 }
 0x1ae   : > { %1157 = vrot.lane.b32.xlu0 %v5653_v53, %s2638_s12  ;;  %v1547_v53 = vsel %vm1500_vm5, %v1482_v32, %v3784_v23  ;;  %v5749_v32 = vld [vmem:[#allocation33_spill] sm:$0xff] }
 0x1af   : > { %v3972_v39 = vpop.permute.xlu1 %1273  ;;  %v1612_v21 = vsel %vm1565_vm6, %v1547_v53, %v3849_v2 }
 0x1b0   : > { %5741 = vst [vmem:[#allocation153_spill] sm:$0xff] %v3972_v39  ;;  %v3977_v34 = vpop.permute.xlu0 %999  ;;  %v1775_v6 = vsel %vm1760_vm9, %v1710_v63, %v3972_v39  ;;  %v1677_v4 = vsel %vm1630_vm7, %v1612_v21, %v3872_v62  ;;  %v2565_v21 = vld [vmem:[%s2710_s30 + $0xa8] sm:$0xff]  ;;  %v5754_v39 = vld [vmem:[#allocation25_spill] sm:$0xff] }
 0x1b1   : > { %5743 = vst [vmem:[#allocation130_spill] sm:$0xff] %v3977_v34  ;;  %1313 = vrot.lane.b32.xlu1 %v5744_v7, %s2639_s13  ;;  %2422 = vmatpush3.xpose.msk.msra.mxu0 %vm1839_vm10, %v1775_v6  ;;  %v1742_v18 = vsel %vm1695_vm8, %v1677_v4, %v3918_v55  ;;  %v2564_v7 = vld [vmem:[%s2710_s30 + $0x148] sm:$0xff] }
 0x1b2   : > { %1281 = vrot.lane.b32.xlu0 %v5745_v60, %s2639_s13  ;;  %v5757_v55 = vld [vmem:[#allocation19_spill] sm:$0xff]  ;;  %v1395_v11 = vsel %vm1361_vm2, %v2564_v7, %v5760_v42 }
 0x1b3   : > { %v3992_v46 = vpop.permute.xlu1 %951  ;;  %v1432_v50 = vsel %vm1398_vm3, %v1395_v11, %v5763_v43 }
 0x1b4   : > { %5746 = vst [vmem:[#allocation66_spill] sm:$0xff] %v3992_v46  ;;  %v3996_v45 = vpop.permute.xlu0 %1305  ;;  %v1497_v38 = vsel %vm1435_vm4, %v1432_v50, %v3864_v13  ;;  %v5770_v50 = vld [vmem:[#allocation47_spill] sm:$0xff] }
 0x1b5   : > { %5747 = vst [vmem:[#allocation40_spill] sm:$0xff] %v3996_v45  ;;  %1297 = vrot.lane.b32.xlu1 %v5748_v58, %s2639_s13  ;;  %v1807_v63 = vsel %vm1760_vm9, %v1742_v18, %v3996_v45  ;;  %v2566_v58 = vld [vmem:[%s2710_s30 + $0xf8] sm:$0xff]  ;;  %v1562_v43 = vsel %vm1500_vm5, %v1497_v38, %v3898_v51 }
 0x1b6   : > { %1265 = vrot.lane.b32.xlu0 %v5749_v32, %s2639_s13  ;;  %2458 = vmatpush3.xpose.msk.msra.mxu1 %vm1839_vm10, %v1807_v63  ;;  %v2567_v18 = vld [vmem:[%s2710_s30 + $0x58] sm:$0xff] }
 0x1b7   : > { %v4005_v6 = vpop.permute.xlu1 %1071 }
 0x1b8   : > { %5750 = vst [vmem:[#allocation52_spill] sm:$0xff] %v4005_v6  ;;  %v4007_v53 = vpop.permute.xlu0 %983 }
 0x1b9   : > { %5751 = vst [vmem:[#allocation33_spill] sm:$0xff] %v4007_v53  ;;  %1095 = vrot.lane.b32.xlu1 %v2564_v7, %s2637_s11  ;;  %v5768_v7 = vld [vmem:[#allocation122_spill] sm:$0xff] }
 0x1ba   : > { %1063 = vrot.lane.b32.xlu0 %v2565_v21, %s2637_s11 }
 0x1bb   : > { %v4013_v60 = vpop.permute.xlu1 %805 }
 0x1bc   : > { %v1104_v4 = vpop.permute.xlu0 %1103 }
 0x1bd   : > { %1079 = vrot.lane.b32.xlu1 %v2566_v58, %s2637_s11 }
 0x1be   : > { %1047 = vrot.lane.b32.xlu0 %v2567_v18, %s2637_s11 }
 0x1bf   : > { %v4019_v63 = vpop.permute.xlu1 %1087 }
 0x1c0   : > { %5752 = vst [vmem:[#allocation154_spill] sm:$0xff] %v4019_v63  ;;  %v4021_v32 = vpop.permute.xlu0 %1055 }
 0x1c1   : > { %5753 = vst [vmem:[#allocation155_spill] sm:$0xff] %v4021_v32  ;;  %1203 = vrot.lane.b32.xlu1 %v5754_v39, %s2638_s12  ;;  %v5761_v39 = vld [vmem:[#allocation62_spill] sm:$0xff] }
 0x1c2   : > { %1171 = vrot.lane.b32.xlu0 %v5755_v61, %s2638_s12  ;;  %v5762_v61 = vld [vmem:[#allocation70_spill] sm:$0xff] }
 0x1c3   : > { %v1212_v45 = vpop.permute.xlu1 %1211  ;;  %v1379_v26 = vsel %vm1361_vm2, %v2565_v21, %v5762_v61 }
 0x1c4   : > { %v4027_v52 = vpop.permute.xlu0 %1179 }
 0x1c5   : > { %5756 = vst [vmem:[#allocation25_spill] sm:$0xff] %v4027_v52  ;;  %1187 = vrot.lane.b32.xlu1 %v5757_v55, %s2638_s12  ;;  %v5764_v55 = vld [vmem:[#allocation38_spill] sm:$0xff] }
 0x1c6   : > { %1155 = vrot.lane.b32.xlu0 %v5758_v37, %s2638_s12  ;;  %v5765_v37 = vld [vmem:[#allocation98_spill] sm:$0xff] }
 0x1c7   : > { %v4033_v36 = vpop.permute.xlu1 %901  ;;  %v4049_v33 = vsel %vm1398_vm3, %v1379_v26, %v5765_v37  ;;  %v1627_v26 = vsel %vm1565_vm6, %v1562_v43, %v3977_v34  ;;  %v5771_v37 = vld [vmem:[#allocation31_spill] sm:$0xff] }
 0x1c8   : > { %5759 = vst [vmem:[#allocation13_spill] sm:$0xff] %v4033_v36  ;;  %v4035_v62 = vpop.permute.xlu0 %869  ;;  %5766 = vst [vmem:[#allocation19_spill] sm:$0xff] %v4049_v33  ;;  %v1465_v21 = vsel %vm1435_vm4, %v4049_v33, %v5768_v7 }
 0x1c9   : > { %1311 = vrot.lane.b32.xlu1 %v5761_v39, %s2639_s13  ;;  %v1530_v39 = vsel %vm1500_vm5, %v1465_v21, %v3878_v15 }
 0x1ca   : > { %1279 = vrot.lane.b32.xlu0 %v5764_v55, %s2639_s13  ;;  %v1595_v61 = vsel %vm1565_vm6, %v1530_v39, %v3950_v17  ;;  %v1692_v55 = vsel %vm1630_vm7, %v1627_v26, %v1104_v4  ;;  %v2568_v39 = vld [vmem:[%s2710_s30 + $0x140] sm:$0xff]  ;;  %v5781_v17 = vld [vmem:[#allocation116_spill] sm:$0xff] }
 0x1cb   : > { %v4053_v42 = vpop.permute.xlu1 %1195  ;;  %v1660_v38 = vsel %vm1630_vm7, %v1595_v61, %v4005_v6  ;;  %v1757_v21 = vsel %vm1695_vm8, %v1692_v55, %v1212_v45  ;;  %v2569_v26 = vld [vmem:[%s2710_s30 + $0xa0] sm:$0xff]  ;;  %v5780_v6 = vld [vmem:[#allocation128_spill] sm:$0xff] }
 0x1cc   : > { %5767 = vst [vmem:[#allocation6_spill] sm:$0xff] %v4053_v42  ;;  %v4060_v11 = vpop.permute.xlu0 %1163  ;;  %v1725_v43 = vsel %vm1695_vm8, %v1660_v38, %v4027_v52  ;;  %v5775_v38 = vld [vmem:[#allocation59_spill] sm:$0xff] }
 0x1cd   : > { %5769 = vst [vmem:[#allocation82_spill] sm:$0xff] %v4060_v11  ;;  %1295 = vrot.lane.b32.xlu1 %v5770_v50, %s2639_s13 }
 0x1ce   : > { %1263 = vrot.lane.b32.xlu0 %v5771_v37, %s2639_s13  ;;  %v2570_v37 = vld [vmem:[%s2710_s30 + $0xf0] sm:$0xff] }
 0x1cf   : > { %v1320_v33 = vpop.permute.xlu1 %1319 }
 0x1d0   : > { %v1822_v50 = vsel %vm1760_vm9, %v1757_v21, %v1320_v33  ;;  %v4079_v24 = vpop.permute.xlu0 %1287  ;;  %v5774_v33 = vld [vmem:[#allocation76_spill] sm:$0xff]  ;;  %v1371_v21 = vsel %vm1361_vm2, %v2567_v18, %v5775_v38 }
 0x1d1   : > { %5772 = vst [vmem:[#allocation62_spill] sm:$0xff] %v4079_v24  ;;  %1093 = vrot.lane.b32.xlu1 %v2568_v39, %s2637_s11  ;;  %v1790_v4 = vsel %vm1760_vm9, %v1725_v43, %v4079_v24  ;;  %2459 = vmatprep.subr.msk.mxu1 %vm1839_vm10, %v1822_v50  ;;  %v1387_v55 = vsel %vm1361_vm2, %v2566_v58, %v5774_v33  ;;  %v5776_v43 = vld [vmem:[#allocation104_spill] sm:$0xff] }
 0x1d2   : > { %1061 = vrot.lane.b32.xlu0 %v2569_v26, %s2637_s11  ;;  %2423 = vmatprep.subr.msk.mxu0 %vm1839_vm10, %v1790_v4  ;;  %v4101_v50 = vsel %vm1398_vm3, %v1387_v55, %v5776_v43  ;;  %v2571_v24 = vld [vmem:[%s2710_s30 + $0x50] sm:$0xff] }
 0x1d3   : > { %v4089_v45 = vpop.permute.xlu1 %885  ;;  %5777 = vst [vmem:[#allocation110_spill] sm:$0xff] %v4101_v50  ;;  %v5778_v4 = vld [vmem:[#allocation92_spill] sm:$0xff]  ;;  %v1481_v58 = vsel %vm1435_vm4, %v4101_v50, %v5780_v6  ;;  %v5805_v6 = vld [vmem:[#allocation99_spill] sm:$0xff] }
 0x1d4   : > { %v4091_v61 = vpop.permute.xlu0 %853  ;;  %v4107_v52 = vsel %vm1398_vm3, %v1371_v21, %v5778_v4  ;;  %v1546_v55 = vsel %vm1500_vm5, %v1481_v58, %v3954_v10  ;;  %v5782_v4 = vld [vmem:[#allocation26_spill] sm:$0xff] }
 0x1d5   : > { %5773 = vst [vmem:[#allocation70_spill] sm:$0xff] %v4091_v61  ;;  %1077 = vrot.lane.b32.xlu1 %v2570_v37, %s2637_s11  ;;  %5779 = vst [vmem:[#allocation38_spill] sm:$0xff] %v4107_v52  ;;  %v1449_v18 = vsel %vm1435_vm4, %v4107_v52, %v5781_v17  ;;  %v1611_v21 = vsel %vm1565_vm6, %v1546_v55, %v4007_v53  ;;  %v5783_v17 = vld [vmem:[#allocation14_spill] sm:$0xff]  ;;  %v5803_v53 = vld [vmem:[#allocation111_spill] sm:$0xff] }
 0x1d6   : > { %1045 = vrot.lane.b32.xlu0 %v2571_v24, %s2637_s11  ;;  %v1514_v43 = vsel %vm1500_vm5, %v1449_v18, %v3932_v28  ;;  %v1676_v52 = vsel %vm1630_vm7, %v1611_v21, %v4019_v63  ;;  %v5786_v21 = vld [vmem:[#allocation23_spill] sm:$0xff] }
 0x1d7   : > { %v4112_v33 = vpop.permute.xlu1 %997  ;;  %v1579_v50 = vsel %vm1565_vm6, %v1514_v43, %v3992_v46  ;;  %v1741_v18 = vsel %vm1695_vm8, %v1676_v52, %v4053_v42  ;;  %v5787_v52 = vld [vmem:[#allocation11_spill] sm:$0xff] }
 0x1d8   : > { %v4119_v38 = vpop.permute.xlu0 %965  ;;  %v1644_v58 = vsel %vm1630_vm7, %v1579_v50, %v4021_v32  ;;  %v5800_v42 = vld [vmem:[#allocation83_spill] sm:$0xff] }
 0x1d9   : > { %1201 = vrot.lane.b32.xlu1 %v5782_v4, %s2638_s12  ;;  %v1709_v55 = vsel %vm1695_vm8, %v1644_v58, %v4060_v11  ;;  %v5790_v11 = vld [vmem:[#allocation20_spill] sm:$0xff]  ;;  %v1394_v63 = vsel %vm1361_vm2, %v2568_v39, %v5800_v42  ;;  %v5808_v39 = vld [vmem:[#allocation123_spill] sm:$0xff] }
 0x1da   : > { %1169 = vrot.lane.b32.xlu0 %v5783_v17, %s2638_s12  ;;  %v1431_v10 = vsel %vm1398_vm3, %v1394_v63, %v5803_v53  ;;  %v5810_v63 = vld [vmem:[#allocation77_spill] sm:$0xff] }
 0x1db   : > { %v4137_v28 = vpop.permute.xlu1 %1303  ;;  %v1496_v15 = vsel %vm1435_vm4, %v1431_v10, %v4013_v60 }
 0x1dc   : > { %5784 = vst [vmem:[#allocation98_spill] sm:$0xff] %v4137_v28  ;;  %v4141_v4 = vpop.permute.xlu0 %1271  ;;  %v1806_v43 = vsel %vm1760_vm9, %v1741_v18, %v4137_v28  ;;  %v5791_v18 = vld [vmem:[#allocation7_spill] sm:$0xff] }
 0x1dd   : > { %5785 = vst [vmem:[#allocation122_spill] sm:$0xff] %v4141_v4  ;;  %899 = vrot.lane.b32.xlu1 %v5786_v21, %s2635_s9  ;;  %v1774_v17 = vsel %vm1760_vm9, %v1709_v55, %v4141_v4  ;;  %2460 = vmatpush3.xpose.msk.msra.mxu1 %vm1839_vm10, %v1806_v43  ;;  %v5793_v55 = vld [vmem:[#allocation64_spill] sm:$0xff]  ;;  %v5794_v43 = vld [vmem:[#allocation39_spill] sm:$0xff]  ;;  %v5797_v4 = vld [vmem:[#allocation17_spill] sm:$0xff] }
 0x1de   : > { %867 = vrot.lane.b32.xlu0 %v5787_v52, %s2635_s9  ;;  %2424 = vmatpush3.xpose.msk.msra.mxu0 %vm1839_vm10, %v1774_v17 }
 0x1df   : > { %v4153_v50 = vpop.permute.xlu1 %981 }
 0x1e0   : > { %5788 = vst [vmem:[#allocation47_spill] sm:$0xff] %v4153_v50  ;;  %v4155_v58 = vpop.permute.xlu0 %949 }
 0x1e1   : > { %5789 = vst [vmem:[#allocation31_spill] sm:$0xff] %v4155_v58  ;;  %1185 = vrot.lane.b32.xlu1 %v5790_v11, %s2638_s12  ;;  %v5798_v11 = vld [vmem:[#allocation4_spill] sm:$0xff] }
 0x1e2   : > { %1153 = vrot.lane.b32.xlu0 %v5791_v18, %s2638_s12 }
 0x1e3   : > { %v1102_v21 = vpop.permute.xlu1 %1101 }
 0x1e4   : > { %v4161_v28 = vpop.permute.xlu0 %1069 }
 0x1e5   : > { %5792 = vst [vmem:[#allocation76_spill] sm:$0xff] %v4161_v28  ;;  %1309 = vrot.lane.b32.xlu1 %v5793_v55, %s2639_s13  ;;  %v5801_v55 = vld [vmem:[#allocation58_spill] sm:$0xff] }
 0x1e6   : > { %1277 = vrot.lane.b32.xlu0 %v5794_v43, %s2639_s13  ;;  %v5802_v43 = vld [vmem:[#allocation71_spill] sm:$0xff] }
 0x1e7   : > { %v4167_v17 = vpop.permute.xlu1 %1085  ;;  %v1378_v46 = vsel %vm1361_vm2, %v2569_v26, %v5802_v43  ;;  %v1561_v26 = vsel %vm1500_vm5, %v1496_v15, %v4033_v36  ;;  %v1386_v43 = vsel %vm1361_vm2, %v2570_v37, %v5810_v63  ;;  %v5816_v63 = vld [vmem:[#allocation93_spill] sm:$0xff] }
 0x1e8   : > { %5795 = vst [vmem:[#allocation59_spill] sm:$0xff] %v4167_v17  ;;  %v4169_v52 = vpop.permute.xlu0 %1053  ;;  %v4189_v34 = vsel %vm1398_vm3, %v1378_v46, %v5805_v6  ;;  %v1626_v10 = vsel %vm1565_vm6, %v1561_v26, %v4112_v33  ;;  %v5811_v6 = vld [vmem:[#allocation49_spill] sm:$0xff] }
 0x1e9   : > { %5796 = vst [vmem:[#allocation104_spill] sm:$0xff] %v4169_v52  ;;  %883 = vrot.lane.b32.xlu1 %v5797_v4, %s2635_s9  ;;  %v5804_v4 = vld [vmem:[#allocation36_spill] sm:$0xff]  ;;  %5806 = vst [vmem:[#allocation26_spill] sm:$0xff] %v4189_v34  ;;  %v1691_v37 = vsel %vm1630_vm7, %v1626_v10, %v1102_v21 }
 0x1ea   : > { %851 = vrot.lane.b32.xlu0 %v5798_v11, %s2635_s9 }
 0x1eb   : > { %v1210_v18 = vpop.permute.xlu1 %1209 }
 0x1ec   : > { %v4175_v32 = vpop.permute.xlu0 %1177 }
 0x1ed   : > { %5799 = vst [vmem:[#allocation92_spill] sm:$0xff] %v4175_v32  ;;  %995 = vrot.lane.b32.xlu1 %v5801_v55, %s2636_s10  ;;  %v1464_v55 = vsel %vm1435_vm4, %v4189_v34, %v5808_v39  ;;  %v5813_v39 = vld [vmem:[#allocation105_spill] sm:$0xff] }
 0x1ee   : > { %963 = vrot.lane.b32.xlu0 %v5804_v4, %s2636_s10  ;;  %v1529_v46 = vsel %vm1500_vm5, %v1464_v55, %v4035_v62  ;;  %v5812_v4 = vld [vmem:[#allocation61_spill] sm:$0xff]  ;;  %v4214_v15 = vsel %vm1398_vm3, %v1386_v43, %v5813_v39  ;;  %v5815_v55 = vld [vmem:[#allocation32_spill] sm:$0xff]  ;;  %v1756_v43 = vsel %vm1695_vm8, %v1691_v37, %v1210_v18  ;;  %v5821_v37 = vld [vmem:[#allocation43_spill] sm:$0xff] }
 0x1ef   : > { %v4193_v42 = vpop.permute.xlu1 %1193  ;;  %v1370_v34 = vsel %vm1361_vm2, %v2571_v24, %v5812_v4  ;;  %5814 = vst [vmem:[#allocation11_spill] sm:$0xff] %v4214_v15  ;;  %v1594_v36 = vsel %vm1565_vm6, %v1529_v46, %v4119_v38  ;;  %v5819_v46 = vld [vmem:[#allocation117_spill] sm:$0xff] }
 0x1f0   : > { %5807 = vst [vmem:[#allocation14_spill] sm:$0xff] %v4193_v42  ;;  %v4200_v53 = vpop.permute.xlu0 %1161  ;;  %v4223_v26 = vsel %vm1398_vm3, %v1370_v34, %v5816_v63  ;;  %v1659_v39 = vsel %vm1630_vm7, %v1594_v36, %v4161_v28 }
 0x1f1   : > { %5809 = vst [vmem:[#allocation23_spill] sm:$0xff] %v4200_v53  ;;  %1293 = vrot.lane.b32.xlu1 %v5811_v6, %s2639_s13  ;;  %5817 = vst [vmem:[#allocation20_spill] sm:$0xff] %v4223_v26  ;;  %v5818_v6 = vld [vmem:[#allocation129_spill] sm:$0xff]  ;;  %v1448_v21 = vsel %vm1435_vm4, %v4223_v26, %v5819_v46  ;;  %v1724_v34 = vsel %vm1695_vm8, %v1659_v39, %v4175_v32  ;;  %v5835_v26 = vld [vmem:[#allocation30_spill] sm:$0xff] }
 0x1f2   : > { %1261 = vrot.lane.b32.xlu0 %v5815_v55, %s2639_s13  ;;  %v1480_v24 = vsel %vm1435_vm4, %v4214_v15, %v5818_v6  ;;  %v1513_v36 = vsel %vm1500_vm5, %v1448_v21, %v4091_v61  ;;  %v5832_v32 = vld [vmem:[#allocation45_spill] sm:$0xff] }
 0x1f3   : > { %v1318_v4 = vpop.permute.xlu1 %1317  ;;  %v1545_v10 = vsel %vm1500_vm5, %v1480_v24, %v4089_v45  ;;  %v1578_v24 = vsel %vm1565_vm6, %v1513_v36, %v4155_v58  ;;  %v5838_v58 = vld [vmem:[#allocation21_spill] sm:$0xff] }
 0x1f4   : > { %v1821_v55 = vsel %vm1760_vm9, %v1756_v43, %v1318_v4  ;;  %v4239_v63 = vpop.permute.xlu0 %1285  ;;  %v1610_v18 = vsel %vm1565_vm6, %v1545_v10, %v4153_v50  ;;  %v5822_v43 = vld [vmem:[#allocation29_spill] sm:$0xff]  ;;  %v1643_v4 = vsel %vm1630_vm7, %v1578_v24, %v4169_v52  ;;  %v5833_v52 = vld [vmem:[#allocation68_spill] sm:$0xff]  ;;  %v4337_v50 = vld [vmem:[%s2710_s30 + $0x40] sm:$0xff] }
 0x1f5   : > { %5820 = vst [vmem:[#allocation7_spill] sm:$0xff] %v4239_v63  ;;  %979 = vrot.lane.b32.xlu1 %v5821_v37, %s2636_s10  ;;  %v1789_v28 = vsel %vm1760_vm9, %v1724_v34, %v4239_v63  ;;  %2461 = vmatprep.subr.msk.mxu1 %vm1839_vm10, %v1821_v55  ;;  %v1675_v39 = vsel %vm1630_vm7, %v1610_v18, %v4167_v17  ;;  %v5825_v18 = vld [vmem:[#allocation24_spill] sm:$0xff] }
 0x1f6   : > { %947 = vrot.lane.b32.xlu0 %v5822_v43, %s2636_s10  ;;  %2425 = vmatprep.subr.msk.mxu0 %vm1839_vm10, %v1789_v28  ;;  %v1740_v21 = vsel %vm1695_vm8, %v1675_v39, %v4193_v42  ;;  %v1708_v34 = vsel %vm1695_vm8, %v1643_v4, %v4200_v53  ;;  %v5826_v37 = vld [vmem:[#allocation12_spill] sm:$0xff]  ;;  %v5827_v4 = vld [vmem:[#allocation18_spill] sm:$0xff] }
 0x1f7   : > { %v4261_v10 = vpop.permute.xlu1 %1301  ;;  %v2572_v53 = vld [vmem:[%s2710_s30 + $0x130] sm:$0xff] }
 0x1f8   : > { %5823 = vst [vmem:[#allocation64_spill] sm:$0xff] %v4261_v10  ;;  %v1805_v55 = vsel %vm1760_vm9, %v1740_v21, %v4261_v10  ;;  %v4267_v36 = vpop.permute.xlu0 %1269  ;;  %v5828_v21 = vld [vmem:[#allocation5_spill] sm:$0xff]  ;;  %v2573_v10 = vld [vmem:[%s2710_s30 + $0x90] sm:$0xff] }
 0x1f9   : > { %5824 = vst [vmem:[#allocation39_spill] sm:$0xff] %v4267_v36  ;;  %v1773_v28 = vsel %vm1760_vm9, %v1708_v34, %v4267_v36  ;;  %897 = vrot.lane.b32.xlu1 %v5825_v18, %s2635_s9  ;;  %2462 = vmatpush3.xpose.msk.msra.mxu1 %vm1839_vm10, %v1805_v55  ;;  %v5829_v55 = vld [vmem:[#allocation60_spill] sm:$0xff] }
 0x1fa   : > { %865 = vrot.lane.b32.xlu0 %v5826_v37, %s2635_s9  ;;  %2426 = vmatpush3.xpose.msk.msra.mxu0 %vm1839_vm10, %v1773_v28  ;;  %v5830_v37 = vld [vmem:[#allocation37_spill] sm:$0xff]  ;;  %v5834_v42 = vld [vmem:[#allocation8_spill] sm:$0xff] }
 0x1fb   : > { %v4277_v24 = vpop.permute.xlu1 %1099  ;;  %v5836_v17 = vld [vmem:[#allocation96_spill] sm:$0xff] }
 0x1fc   : > { %v4279_v39 = vpop.permute.xlu0 %1067 }
 0x1fd   : > { %881 = vrot.lane.b32.xlu1 %v5827_v4, %s2635_s9  ;;  %v5831_v4 = vld [vmem:[#allocation80_spill] sm:$0xff] }
 0x1fe   : > { %849 = vrot.lane.b32.xlu0 %v5828_v21, %s2635_s9  ;;  %v1393_v63 = vsel %vm1361_vm2, %v2572_v53, %v5831_v4  ;;  %v5837_v4 = vld [vmem:[#allocation74_spill] sm:$0xff] }
 0x1ff   : > { %v4285_v34 = vpop.permute.xlu1 %1083 }
 0x200   : > { %v4287_v18 = vpop.permute.xlu0 %1051 }
 0x201   : > { %993 = vrot.lane.b32.xlu1 %v5829_v55, %s2636_s10  ;;  %v1377_v55 = vsel %vm1361_vm2, %v2573_v10, %v5833_v52  ;;  %v2574_v10 = vld [vmem:[%s2710_s30 + $0xe0] sm:$0xff] }
 0x202   : > { %961 = vrot.lane.b32.xlu0 %v5830_v37, %s2636_s10  ;;  %v4307_v37 = vsel %vm1398_vm3, %v1393_v63, %v5834_v42  ;;  %v4313_v15 = vsel %vm1398_vm3, %v1377_v55, %v5836_v17  ;;  %v1385_v17 = vsel %vm1361_vm2, %v2574_v10, %v5837_v4 }
 0x203   : > { %v4293_v28 = vpop.permute.xlu1 %1207  ;;  %v1463_v52 = vsel %vm1435_vm4, %v4313_v15, %v3600_v56  ;;  %v5839_v56 = vld [vmem:[#allocation55_spill] sm:$0xff] }
 0x204   : > { %v4295_v36 = vpop.permute.xlu0 %1175  ;;  %v1528_v55 = vsel %vm1500_vm5, %v1463_v52, %v3660_v49 }
 0x205   : > { %977 = vrot.lane.b32.xlu1 %v5832_v32, %s2636_s10  ;;  %v1495_v32 = vsel %vm1435_vm4, %v4307_v37, %v3662_v9  ;;  %v1593_v10 = vsel %vm1565_vm6, %v1528_v55, %v3680_v31 }
 0x206   : > { %945 = vrot.lane.b32.xlu0 %v5835_v26, %s2636_s10  ;;  %v1560_v42 = vsel %vm1500_vm5, %v1495_v32, %v3671_v8  ;;  %v1369_v8 = vsel %vm1361_vm2, %v4337_v50, %v5839_v56  ;;  %v5840_v32 = vld [vmem:[#allocation102_spill] sm:$0xff]  ;;  %v1658_v4 = vsel %vm1630_vm7, %v1593_v10, %v4279_v39 }
 0x207   : > { %v4318_v53 = vpop.permute.xlu1 %1191  ;;  %v1625_v9 = vsel %vm1565_vm6, %v1560_v42, %v3689_v44  ;;  %v4344_v61 = vsel %vm1398_vm3, %v1385_v17, %v5840_v32  ;;  %v5841_v44 = vld [vmem:[#allocation9_spill] sm:$0xff]  ;;  %v1723_v56 = vsel %vm1695_vm8, %v1658_v4, %v4295_v36 }
 0x208   : > { %v4325_v63 = vpop.permute.xlu0 %1159  ;;  %v1690_v49 = vsel %vm1630_vm7, %v1625_v9, %v4277_v24  ;;  %v1479_v42 = vsel %vm1435_vm4, %v4344_v61, %v3632_v57 }
 0x209   : > { %895 = vrot.lane.b32.xlu1 %v5838_v58, %s2635_s9  ;;  %v5842_v58 = vld [vmem:[#allocation90_spill] sm:$0xff]  ;;  %v1755_v31 = vsel %vm1695_vm8, %v1690_v49, %v4293_v28  ;;  %v1544_v9 = vsel %vm1500_vm5, %v1479_v42, %v3682_v29  ;;  %v5843_v49 = vld [vmem:[#allocation15_spill] sm:$0xff] }
 0x20a   : > { %863 = vrot.lane.b32.xlu0 %v5841_v44, %s2635_s9  ;;  %v4354_v52 = vsel %vm1398_vm3, %v1369_v8, %v5842_v58  ;;  %v1609_v10 = vsel %vm1565_vm6, %v1544_v9, %v3697_v40  ;;  %v5844_v58 = vld [vmem:[#allocation2_spill] sm:$0xff] }
 0x20b   : > { %v4363_v17 = vpop.permute.xlu1 %1315  ;;  %v1447_v55 = vsel %vm1435_vm4, %v4354_v52, %v3567_v12  ;;  %v1674_v44 = vsel %vm1630_vm7, %v1609_v10, %v4285_v34  ;;  %v5847_v9 = vld [vmem:[#allocation54_spill] sm:$0xff]  ;;  %v5849_v10 = vld [vmem:[#allocation41_spill] sm:$0xff] }
 0x20c   : > { %v1820_v57 = vsel %vm1760_vm9, %v1755_v31, %v4363_v17  ;;  %v4374_v8 = vpop.permute.xlu0 %1283  ;;  %v1512_v32 = vsel %vm1500_vm5, %v1447_v55, %v3669_v20  ;;  %v1739_v40 = vsel %vm1695_vm8, %v1674_v44, %v4318_v53 }
 0x20d   : > { %v1788_v12 = vsel %vm1760_vm9, %v1723_v56, %v4374_v8  ;;  %879 = vrot.lane.b32.xlu1 %v5843_v49, %s2635_s9  ;;  %2463 = vmatprep.subr.msk.mxu1 %vm1839_vm10, %v1820_v57  ;;  %v1577_v29 = vsel %vm1565_vm6, %v1512_v32, %v3687_v54  ;;  %v5848_v56 = vld [vmem:[#allocation34_spill] sm:$0xff] }
 0x20e   : > { %847 = vrot.lane.b32.xlu0 %v5844_v58, %s2635_s9  ;;  %2427 = vmatprep.subr.msk.mxu0 %vm1839_vm10, %v1788_v12  ;;  %v1642_v20 = vsel %vm1630_vm7, %v1577_v29, %v4287_v18  ;;  %v5850_v12 = vld [vmem:[#allocation27_spill] sm:$0xff] }
 0x20f   : > { %v4396_v42 = vpop.permute.xlu1 %1299  ;;  %v1707_v4 = vsel %vm1695_vm8, %v1642_v20, %v4325_v63 }
 0x210   : > { %5845 = vst [vmem:[#allocation17_spill] sm:$0xff] %v4396_v42  ;;  %v1804_v54 = vsel %vm1760_vm9, %v1739_v40, %v4396_v42  ;;  %v4402_v31 = vpop.permute.xlu0 %1267  ;;  %v2576_v40 = vld [vmem:[%s2710_s30 + $0x128] sm:$0xff] }
 0x211   : > { %5846 = vst [vmem:[#allocation4_spill] sm:$0xff] %v4402_v31  ;;  %v1772_v55 = vsel %vm1760_vm9, %v1707_v4, %v4402_v31  ;;  %991 = vrot.lane.b32.xlu1 %v5847_v9, %s2636_s10  ;;  %2464 = vmatpush3.xpose.msk.msra.mxu1 %vm1839_vm10, %v1804_v54  ;;  %v5851_v4 = vld [vmem:[#allocation81_spill] sm:$0xff] }
 0x212   : > { %959 = vrot.lane.b32.xlu0 %v5848_v56, %s2636_s10  ;;  %2428 = vmatpush3.xpose.msk.msra.mxu0 %vm1839_vm10, %v1772_v55  ;;  %v1392_v54 = vsel %vm1361_vm2, %v2576_v40, %v5851_v4  ;;  %v2577_v55 = vld [vmem:[%s2710_s30 + $0x88] sm:$0xff]  ;;  %v5852_v9 = vld [vmem:[#allocation69_spill] sm:$0xff] }
 0x213   : > { %v4412_v57 = vpop.permute.xlu1 %1097  ;;  %v5853_v56 = vld [vmem:[#allocation109_spill] sm:$0xff] }
 0x214   : > { %v4414_v32 = vpop.permute.xlu0 %1065  ;;  %v5856_v31 = vld [vmem:[#allocation97_spill] sm:$0xff] }
 0x215   : > { %975 = vrot.lane.b32.xlu1 %v5849_v10, %s2636_s10  ;;  %v5855_v10 = vld [vmem:[#allocation3_spill] sm:$0xff] }
 0x216   : > { %943 = vrot.lane.b32.xlu0 %v5850_v12, %s2636_s10 }
 0x217   : > { %v4420_v49 = vpop.permute.xlu1 %1081 }
 0x218   : > { %v4422_v29 = vpop.permute.xlu0 %1049 }
 0x219   : > { %893 = vrot.lane.b32.xlu1 %v5715_v0, %s2635_s9  ;;  %v1376_v0 = vsel %vm1361_vm2, %v2577_v55, %v5852_v9  ;;  %v2578_v9 = vld [vmem:[%s2710_s30 + $0xd8] sm:$0xff] }
 0x21a   : > { %861 = vrot.lane.b32.xlu0 %v5716_v5, %s2635_s9  ;;  %v4442_v5 = vsel %vm1398_vm3, %v1392_v54, %v5853_v56  ;;  %v4448_v42 = vsel %vm1398_vm3, %v1376_v0, %v5856_v31  ;;  %v5858_v56 = vld [vmem:[#allocation75_spill] sm:$0xff] }
 0x21b   : > { %v4428_v44 = vpop.permute.xlu1 %1205  ;;  %5854 = vst [vmem:[#allocation83_spill] sm:$0xff] %v4442_v5  ;;  %5857 = vst [vmem:[#allocation58_spill] sm:$0xff] %v4448_v42  ;;  %v1462_v4 = vsel %vm1435_vm4, %v4448_v42, %v3602_v47  ;;  %v1384_v31 = vsel %vm1361_vm2, %v2578_v9, %v5858_v56  ;;  %v5859_v47 = vld [vmem:[#allocation57_spill] sm:$0xff] }
 0x21c   : > { %v4430_v20 = vpop.permute.xlu0 %1173  ;;  %v1527_v0 = vsel %vm1500_vm5, %v1462_v4, %v3725_v3 }
 0x21d   : > { %877 = vrot.lane.b32.xlu1 %v5713_v19, %s2635_s9  ;;  %v1494_v19 = vsel %vm1435_vm4, %v4442_v5, %v3703_v1  ;;  %v2579_v5 = vld [vmem:[%s2710_s30 + $0x38] sm:$0xff]  ;;  %v1592_v9 = vsel %vm1565_vm6, %v1527_v0, %v3815_v25 }
 0x21e   : > { %845 = vrot.lane.b32.xlu0 %v5855_v10, %s2635_s9  ;;  %v1559_v54 = vsel %vm1500_vm5, %v1494_v19, %v3723_v48  ;;  %v1368_v42 = vsel %vm1361_vm2, %v2579_v5, %v5859_v47  ;;  %v5860_v48 = vld [vmem:[#allocation103_spill] sm:$0xff]  ;;  %s2341_s9 = sshll.u32 %s6013_s19, 3 }
 0x21f   : > { %v4453_v40 = vpop.permute.xlu1 %1189  ;;  %v1624_v1 = vsel %vm1565_vm6, %v1559_v54, %v3808_v35  ;;  %v4476_v19 = vsel %vm1398_vm3, %v1384_v31, %v5860_v48  ;;  %v5861_v35 = vld [vmem:[#allocation91_spill] sm:$0xff]  ;;  %v1657_v54 = vsel %vm1630_vm7, %v1592_v9, %v4414_v32  ;;  %v5862_v9 = vld [vmem:[#allocation28_spill] sm:$0xff] }
 0x220   : > { %v4460_v55 = vpop.permute.xlu0 %1157  ;;  %v1689_v3 = vsel %vm1630_vm7, %v1624_v1, %v4412_v57  ;;  %v1478_v4 = vsel %vm1435_vm4, %v4476_v19, %v5742_v22  ;;  %v1722_v31 = vsel %vm1695_vm8, %v1657_v54, %v4430_v20 }
 0x221   : > { %989 = vrot.lane.b32.xlu1 %v5722_v59, %s2636_s10  ;;  %v4486_v59 = vsel %vm1398_vm3, %v1368_v42, %v5861_v35  ;;  %v1754_v25 = vsel %vm1695_vm8, %v1689_v3, %v4428_v44  ;;  %v1543_v42 = vsel %vm1500_vm5, %v1478_v4, %v3784_v23 }
 0x222   : > { %957 = vrot.lane.b32.xlu0 %v5723_v27, %s2636_s10  ;;  %v1446_v27 = vsel %vm1435_vm4, %v4486_v59, %v3570_v41  ;;  %v1608_v47 = vsel %vm1565_vm6, %v1543_v42, %v3849_v2  ;;  %v2580_v42 = vld [vmem:[%s2710_s30 + $0x120] sm:$0xff] }
 0x223   : > { %v4495_v56 = vpop.permute.xlu1 %1313  ;;  %v1511_v1 = vsel %vm1500_vm5, %v1446_v27, %v3786_v14  ;;  %v1673_v48 = vsel %vm1630_vm7, %v1608_v47, %v4420_v49  ;;  %v5869_v47 = vld [vmem:[#allocation65_spill] sm:$0xff] }
 0x224   : > { %v1819_v22 = vsel %vm1760_vm9, %v1754_v25, %v4495_v56  ;;  %v4506_v0 = vpop.permute.xlu0 %1281  ;;  %v1576_v23 = vsel %vm1565_vm6, %v1511_v1, %v3851_v30  ;;  %v1738_v2 = vsel %vm1695_vm8, %v1673_v48, %v4453_v40  ;;  %v2581_v1 = vld [vmem:[%s2710_s30 + $0x80] sm:$0xff] }
 0x225   : > { %v1787_v41 = vsel %vm1760_vm9, %v1722_v31, %v4506_v0  ;;  %973 = vrot.lane.b32.xlu1 %v5720_v16, %s2636_s10  ;;  %2465 = vmatprep.subr.msk.mxu1 %vm1839_vm10, %v1819_v22  ;;  %v1641_v14 = vsel %vm1630_vm7, %v1576_v23, %v4422_v29  ;;  %v5868_v31 = vld [vmem:[#allocation78_spill] sm:$0xff]  ;;  %v2582_v23 = vld [vmem:[%s2710_s30 + $0x30] sm:$0xff] }
 0x226   : > { %941 = vrot.lane.b32.xlu0 %v5862_v9, %s2636_s10  ;;  %2429 = vmatprep.subr.msk.mxu0 %vm1839_vm10, %v1787_v41  ;;  %v1706_v3 = vsel %vm1695_vm8, %v1641_v14, %v4460_v55  ;;  %v1391_v22 = vsel %vm1361_vm2, %v2580_v42, %v5868_v31  ;;  %v1375_v41 = vsel %vm1361_vm2, %v2581_v1, %v5869_v47  ;;  %v5871_v48 = vld [vmem:[#allocation94_spill] sm:$0xff]  ;;  %v5875_v1 = vld [vmem:[#allocation72_spill] sm:$0xff]  ;;  %s244_s10 = sadd.s32 %s2341_s9, %s6015_s8 }
 0x227   : > { %v4528_v16 = vpop.permute.xlu1 %1297  ;;  %v4588_v14 = vsel %vm1398_vm3, %v1375_v41, %v5871_v48  ;;  %v5876_v41 = vld [vmem:[#allocation88_spill] sm:$0xff]  ;;  %v5879_v48 = vld [vmem:[#allocation130_spill] sm:$0xff] }
 0x228   : > { %v1803_v30 = vsel %vm1760_vm9, %v1738_v2, %v4528_v16  ;;  %v4534_v35 = vpop.permute.xlu0 %1265 }
 0x229   : > { %v1771_v4 = vsel %vm1760_vm9, %v1706_v3, %v4534_v35  ;;  %1151 = vrot.lane.b32.xlu1 %v5798_v11, %s2638_s12  ;;  %2466 = vmatpush3.xpose.msk.msra.mxu1 %vm1839_vm10, %v1803_v30  ;;  %v4554_v11 = vld [vmem:[%s5346_s1] sm:$0xff]  ;;  %v5873_v3 = vld [vmem:[#allocation51_spill] sm:$0xff] }
 0x22a   : > { %1043 = vrot.lane.b32.xlu0 %v4337_v50, %s2637_s11  ;;  %2430 = vmatpush3.xpose.msk.msra.mxu0 %vm1839_vm10, %v1771_v4  ;;  %5863 = vst [vmem:[#allocation71_spill] sm:$0xff] %v4554_v11  ;;  %v1367_v30 = vsel %vm1361_vm2, %v2582_v23, %v5873_v3  ;;  %v1461_v4 = vsel %vm1435_vm4, %v4588_v14, %v5768_v7  ;;  %v4616_v7 = vld [vmem:[%s2710_s30 + $0x28] sm:$0xff] }
 0x22b   : > { %v4544_v54 = vpop.permute.xlu1 %1095  ;;  %2487 = vmatprep.mubr.msk.f32.mxu1 %vm1839_vm10, %v4554_v11  ;;  %2451 = vmatprep.mubr.msk.f32.mxu0 %vm1839_vm10, %v4554_v11 }
 0x22c   : > { %v4546_v25 = vpop.permute.xlu0 %1063 }
 0x22d   : > { %1041 = vrot.lane.b32.xlu1 %v2579_v5, %s2637_s11 }
 0x22e   : > { %1259 = vrot.lane.b32.xlu0 %v5822_v43, %s2639_s13 }
 0x22f   : > { %v4556_v27 = vpop.permute.xlu1 %1079 }
 0x230   : > { %5864 = vst [vmem:[#allocation111_spill] sm:$0xff] %v4556_v27  ;;  %v4562_v50 = vpop.permute.xlu0 %1047 }
 0x231   : > { %5865 = vst [vmem:[#allocation36_spill] sm:$0xff] %v4562_v50  ;;  %1257 = vrot.lane.b32.xlu1 %v5835_v26, %s2639_s13  ;;  %v5870_v26 = vld [vmem:[#allocation107_spill] sm:$0xff] }
 0x232   : > { %1149 = vrot.lane.b32.xlu0 %v5828_v21, %s2638_s12  ;;  %v4582_v21 = vsel %vm1398_vm3, %v1391_v22, %v5870_v26  ;;  %v2583_v22 = vld [vmem:[%s2710_s30 + $0xd0] sm:$0xff] }
 0x233   : > { %v4568_v43 = vpop.permute.xlu1 %1203  ;;  %v1383_v47 = vsel %vm1361_vm2, %v2583_v22, %v5875_v1  ;;  %v5878_v26 = vld [vmem:[#allocation144_spill] sm:$0xff]  ;;  %v5881_v22 = vld [vmem:[#allocation151_spill] sm:$0xff] }
 0x234   : > { %5866 = vst [vmem:[#allocation99_spill] sm:$0xff] %v4568_v43  ;;  %v4570_v5 = vpop.permute.xlu0 %1171 }
 0x235   : > { %5867 = vst [vmem:[#allocation77_spill] sm:$0xff] %v4570_v5  ;;  %1147 = vrot.lane.b32.xlu1 %v5844_v58, %s2638_s12  ;;  %v1493_v58 = vsel %vm1435_vm4, %v4582_v21, %v3864_v13  ;;  %v4609_v13 = vsel %vm1398_vm3, %v1367_v30, %v5876_v41 }
 0x236   : > { %1039 = vrot.lane.b32.xlu0 %v2582_v23, %s2637_s11  ;;  %v1558_v42 = vsel %vm1500_vm5, %v1493_v58, %v3898_v51  ;;  %5877 = vst [vmem:[#allocation105_spill] sm:$0xff] %v4609_v13  ;;  %v1526_v23 = vsel %vm1500_vm5, %v1461_v4, %v5878_v26  ;;  %v5880_v51 = vld [vmem:[#allocation100_spill] sm:$0xff] }
 0x237   : > { %v4593_v2 = vpop.permute.xlu1 %1187  ;;  %v1623_v3 = vsel %vm1565_vm6, %v1558_v42, %v5879_v48  ;;  %v4622_v58 = vsel %vm1398_vm3, %v1383_v47, %v5880_v51  ;;  %v1591_v1 = vsel %vm1565_vm6, %v1526_v23, %v5881_v22  ;;  %v5882_v4 = vld [vmem:[#allocation128_spill] sm:$0xff]  ;;  %v2640_v48 = vmov 0  }
 0x238   : > { %5872 = vst [vmem:[#allocation49_spill] sm:$0xff] %v4593_v2  ;;  %v4602_v31 = vpop.permute.xlu0 %1155  ;;  %v1688_v30 = vsel %vm1630_vm7, %v1623_v3, %v4544_v54  ;;  %v1477_v42 = vsel %vm1435_vm4, %v4622_v58, %v5882_v4  ;;  %v1656_v41 = vsel %vm1630_vm7, %v1591_v1, %v4546_v25  ;;  %2541 = vset.pattern.permute.xlu0 %v2640_v48  ;;  %v5884_v23 = vld [vmem:[#allocation116_spill] sm:$0xff] }
 0x239   : > { %5874 = vst [vmem:[#allocation61_spill] sm:$0xff] %v4602_v31  ;;  %1037 = vrot.lane.b32.xlu1 %v4616_v7, %s2637_s11  ;;  %v1753_v47 = vsel %vm1695_vm8, %v1688_v30, %v4568_v43  ;;  %v1445_v3 = vsel %vm1435_vm4, %v4609_v13, %v5884_v23  ;;  %v1721_v22 = vsel %vm1695_vm8, %v1656_v41, %v4570_v5  ;;  %v5887_v30 = vld [vmem:[#allocation149_spill] sm:$0xff]  ;;  %v5900_v5 = vld [vmem:[#allocation108_spill] sm:$0xff]  ;;  %s2342_s11 = sshll.u32 %s244_s10, 3 }
 0x23a   : > { %1255 = vrot.lane.b32.xlu0 %v5850_v12, %s2639_s13  ;;  %2542 = vset.pattern.permute.xlu1 %v2640_v48  ;;  %v5885_v12 = vld [vmem:[#allocation152_spill] sm:$0xff]  ;;  %v1510_v11 = vsel %vm1500_vm5, %v1445_v3, %v5887_v30  ;;  %v5888_v43 = vld [vmem:[#allocation33_spill] sm:$0xff]  ;;  %v2220_v30 = vld [vmem:[%s5348_s3] sm:$0xff] }
 0x23b   : > { %v4637_v26 = vpop.permute.xlu1 %1311  ;;  %v1542_v51 = vsel %vm1500_vm5, %v1477_v42, %v5885_v12  ;;  %v5889_v42 = vld [vmem:[#allocation66_spill] sm:$0xff] }
 0x23c   : > { %5883 = vst [vmem:[#allocation32_spill] sm:$0xff] %v4637_v26  ;;  %v1818_v1 = vsel %vm1760_vm9, %v1753_v47, %v4637_v26  ;;  %v4648_v4 = vpop.permute.xlu0 %1279  ;;  %v1607_v48 = vsel %vm1565_vm6, %v1542_v51, %v5888_v43  ;;  %v1575_v41 = vsel %vm1565_vm6, %v1510_v11, %v5889_v42  ;;  %v1827_v43 = vld [vmem:[%s5347_s2] sm:$0xff]  ;;  %v1828_v11 = vld [vmem:[%s5347_s2 + $0x8] sm:$0xff] }
 0x23d   : > { %5886 = vst [vmem:[#allocation93_spill] sm:$0xff] %v4648_v4  ;;  %v1786_v23 = vsel %vm1760_vm9, %v1721_v22, %v4648_v4  ;;  %2467 = vmatprep.subr.msk.mxu1 %vm1839_vm10, %v1818_v1  ;;  %1253 = vrot.lane.b32.xlu1 %v5862_v9, %s2639_s13  ;;  %v1672_v47 = vsel %vm1630_vm7, %v1607_v48, %v4556_v27  ;;  %v2586_v4 = vld [vmem:[%s2710_s30 + $0x78] sm:$0xff]  ;;  %v5899_v26 = vld [vmem:[#allocation67_spill] sm:$0xff]  ;;  %s246_s13 = scalar_lea.vmem %s5350_s5, %s2342_s11 }
 0x23e   : > { %1145 = vrot.lane.b32.xlu0 %v5855_v10, %s2638_s12  ;;  %2431 = vmatprep.subr.msk.mxu0 %vm1839_vm10, %v1786_v23  ;;  %v1640_v3 = vsel %vm1630_vm7, %v1575_v41, %v4562_v50  ;;  %v1737_v9 = vsel %vm1695_vm8, %v1672_v47, %v4593_v2  ;;  %v2230_v23 = vld [vmem:[%s5349_s4] sm:$0xff]  ;;  %v5897_v2 = vld [vmem:[#allocation79_spill] sm:$0xff] }
 0x23f   : > { %v4673_v12 = vpop.permute.xlu1 %1295  ;;  %v1705_v10 = vsel %vm1695_vm8, %v1640_v3, %v4602_v31  ;;  %v2585_v31 = vld [vmem:[%s2710_s30 + $0x118] sm:$0xff] }
 0x240   : > { %5890 = vst [vmem:[#allocation129_spill] sm:$0xff] %v4673_v12  ;;  %v1802_v51 = vsel %vm1760_vm9, %v1737_v9, %v4673_v12  ;;  %v4682_v22 = vpop.permute.xlu0 %1263  ;;  %v5892_v9 = vld [vmem:[#allocation133_spill] sm:$0xff]  ;;  %v1390_v50 = vsel %vm1361_vm2, %v2585_v31, %v5897_v2  ;;  %v5902_v31 = vld [vmem:[#allocation123_spill] sm:$0xff] }
 0x241   : > { %5891 = vst [vmem:[#allocation117_spill] sm:$0xff] %v4682_v22  ;;  %v1770_v1 = vsel %vm1760_vm9, %v1705_v10, %v4682_v22  ;;  %2468 = vmatpush3.xpose.msk.msra.mxu1 %vm1839_vm10, %v1802_v51  ;;  %1831 = vperm.xlu1 %2542, %v1827_v43   ;;  %v5895_v22 = vld [vmem:[#allocation10_spill] sm:$0xff]  ;;  %v4726_v13 = vsel %vm1398_vm3, %v1390_v50, %v5900_v5 }
 0x242   : > { %2432 = vmatpush3.xpose.msk.msra.mxu0 %vm1839_vm10, %v1770_v1  ;;  %1836 = vperm.xlu0 %2541, %v1828_v11   ;;  %v5893_v11 = vld [vmem:[#allocation22_spill] sm:$0xff]  ;;  %v5894_v1 = vld [vmem:[#allocation120_spill] sm:$0xff] }
 0x243   : > { %v4691_v48 = vpop.permute.xlu1 %1093  ;;  %v1487_v10 = vsel %vm1435_vm4, %v5893_v11, %v5892_v9  ;;  %v1455_v12 = vsel %vm1435_vm4, %v5895_v22, %v5894_v1  ;;  %v1374_v11 = vsel %vm1361_vm2, %v2586_v4, %v5899_v26  ;;  %v5901_v22 = vld [vmem:[#allocation95_spill] sm:$0xff] }
 0x244   : > { %v4696_v42 = vpop.permute.xlu0 %1061 }
 0x245   : > { %2223 = vperm.xlu1 %2542, %v2220_v30  }
 0x246   : > { %2233 = vperm.xlu0 %2541, %v2230_v23  }
 0x247   : > { %v4698_v41 = vpop.permute.xlu1 %1077 }
 0x248   : > { %v4700_v47 = vpop.permute.xlu0 %1045 }
 0x24b   : > { %v4702_v43 = vpop.permute.xlu1 %1201 }
 0x24c   : > { %v4704_v3 = vpop.permute.xlu0 %1169 }
 0x24f   : > { %v900_v51 = vpop.permute.xlu1 %899 }
 0x250   : > { %v4713_v30 = vsel %vm1500_vm5, %v1487_v10, %v900_v51  ;;  %v868_v23 = vpop.permute.xlu0 %867  ;;  %v4730_v10 = vsel %vm1398_vm3, %v1374_v11, %v5901_v22 }
 0x251   : > { %5896 = vst [vmem:[#allocation43_spill] sm:$0xff] %v4713_v30  ;;  %v4719_v27 = vsel %vm1500_vm5, %v1455_v12, %v868_v23  ;;  %v1492_v30 = vsel %vm1435_vm4, %v4726_v13, %v4013_v60  ;;  %v1460_v12 = vsel %vm1435_vm4, %v4730_v10, %v5902_v31 }
 0x252   : > { %5898 = vst [vmem:[#allocation29_spill] sm:$0xff] %v4719_v27  ;;  %v5903_v27 = vld [vmem:[#allocation13_spill] sm:$0xff]  ;;  %v1525_v50 = vsel %vm1500_vm5, %v1460_v12, %v4035_v62 }
 0x253   : > { %v4735_v2 = vpop.permute.xlu1 %1185  ;;  %v1557_v26 = vsel %vm1500_vm5, %v1492_v30, %v5903_v27  ;;  %v1590_v60 = vsel %vm1565_vm6, %v1525_v50, %v4119_v38  ;;  %v2587_v50 = vld [vmem:[%s2710_s30 + $0xc8] sm:$0xff] }
 0x254   : > { %v4742_v4 = vpop.permute.xlu0 %1153  ;;  %v1622_v5 = vsel %vm1565_vm6, %v1557_v26, %v4112_v33  ;;  %v1655_v22 = vsel %vm1630_vm7, %v1590_v60, %v4696_v42 }
 0x255   : > { %v1687_v11 = vsel %vm1630_vm7, %v1622_v5, %v4691_v48  ;;  %v1720_v62 = vsel %vm1695_vm8, %v1655_v22, %v4704_v3  ;;  %v5905_v5 = vld [vmem:[#allocation73_spill] sm:$0xff] }
 0x256   : > { %v1752_v27 = vsel %vm1695_vm8, %v1687_v11, %v4702_v43  ;;  %v1382_v60 = vsel %vm1361_vm2, %v2587_v50, %v5905_v5  ;;  %v5906_v11 = vld [vmem:[#allocation53_spill] sm:$0xff]  ;;  %v1459_v50 = vsel %vm1435_vm4, %v4313_v15, %v5894_v1 }
 0x257   : > { %v4756_v30 = vpop.permute.xlu1 %1309  ;;  %v1366_v22 = vsel %vm1361_vm2, %v4616_v7, %v5906_v11  ;;  %v1524_v11 = vsel %vm1500_vm5, %v1459_v50, %v868_v23 }
 0x258   : > { %5904 = vst [vmem:[#allocation24_spill] sm:$0xff] %v4756_v30  ;;  %v1817_v33 = vsel %vm1760_vm9, %v1752_v27, %v4756_v30  ;;  %v4762_v31 = vpop.permute.xlu0 %1277  ;;  %v5907_v27 = vld [vmem:[#allocation101_spill] sm:$0xff] }
 0x259   : > { %v1785_v38 = vsel %vm1760_vm9, %v1720_v62, %v4762_v31  ;;  %2469 = vmatprep.subr.msk.mxu1 %vm1839_vm10, %v1817_v33  ;;  %v4780_v30 = vsel %vm1398_vm3, %v1382_v60, %v5907_v27  ;;  %v1491_v62 = vsel %vm1435_vm4, %v4307_v37, %v5892_v9  ;;  %v5908_v33 = vld [vmem:[#allocation89_spill] sm:$0xff] }
 0x25a   : > { %2433 = vmatprep.subr.msk.mxu0 %vm1839_vm10, %v1785_v38  ;;  %v4787_v38 = vsel %vm1398_vm3, %v1366_v22, %v5908_v33  ;;  %v1476_v7 = vsel %vm1435_vm4, %v4780_v30, %v5818_v6  ;;  %v1556_v5 = vsel %vm1500_vm5, %v1491_v62, %v900_v51  ;;  %v5909_v22 = vld [vmem:[#allocation70_spill] sm:$0xff]  ;;  %v5910_v51 = vld [vmem:[#allocation47_spill] sm:$0xff] }
 0x25b   : > { %v4768_v12 = vpop.permute.xlu1 %883  ;;  %v1444_v37 = vsel %vm1435_vm4, %v4787_v38, %v5819_v46  ;;  %v1541_v9 = vsel %vm1500_vm5, %v1476_v7, %v4089_v45  ;;  %v5911_v45 = vld [vmem:[#allocation31_spill] sm:$0xff] }
 0x25c   : > { %v4770_v26 = vpop.permute.xlu0 %851  ;;  %v1509_v6 = vsel %vm1500_vm5, %v1444_v37, %v5909_v22  ;;  %v1606_v27 = vsel %vm1565_vm6, %v1541_v9, %v5910_v51 }
 0x25d   : > { %v1574_v23 = vsel %vm1565_vm6, %v1509_v6, %v5911_v45  ;;  %v1671_v33 = vsel %vm1630_vm7, %v1606_v27, %v4698_v41  ;;  %v5912_v6 = vld [vmem:[#allocation126_spill] sm:$0xff] }
 0x25e   : > { %v5913_v27 = vld [vmem:[#allocation114_spill] sm:$0xff] }
 0x25f   : > { %v4796_v60 = vpop.permute.xlu1 %995 }
 0x260   : > { %v1621_v15 = vsel %vm1565_vm6, %v1556_v5, %v4796_v60  ;;  %v4806_v1 = vpop.permute.xlu0 %963  ;;  %v1639_v5 = vsel %vm1630_vm7, %v1574_v23, %v4700_v47 }
 0x261   : > { %v1686_v62 = vsel %vm1630_vm7, %v1621_v15, %v4277_v24  ;;  %v1589_v46 = vsel %vm1565_vm6, %v1524_v11, %v4806_v1  ;;  %v1736_v24 = vsel %vm1695_vm8, %v1671_v33, %v4735_v2  ;;  %v1704_v11 = vsel %vm1695_vm8, %v1639_v5, %v4742_v4 }
 0x262   : > { %v1654_v50 = vsel %vm1630_vm7, %v1589_v46, %v4279_v39  ;;  %v1751_v7 = vsel %vm1695_vm8, %v1686_v62, %v4293_v28  ;;  %v1443_v62 = vsel %vm1435_vm4, %v4354_v52, %v5913_v27 }
 0x263   : > { %v4828_v37 = vpop.permute.xlu1 %1293  ;;  %v1719_v9 = vsel %vm1695_vm8, %v1654_v50, %v4295_v36  ;;  %v1816_v22 = vsel %vm1760_vm9, %v1751_v7, %v4363_v17  ;;  %v1475_v36 = vsel %vm1435_vm4, %v4344_v61, %v5912_v6  ;;  %v1508_v61 = vsel %vm1500_vm5, %v1443_v62, %v4770_v26 }
 0x264   : > { %v1801_v39 = vsel %vm1760_vm9, %v1736_v24, %v4828_v37  ;;  %v4836_v15 = vpop.permute.xlu0 %1261  ;;  %v1784_v51 = vsel %vm1760_vm9, %v1719_v9, %v4374_v8  ;;  %v1540_v46 = vsel %vm1500_vm5, %v1475_v36, %v4768_v12  ;;  %v5914_v24 = vld [vmem:[#allocation17_spill] sm:$0xff] }
 0x265   : > { %v1769_v28 = vsel %vm1760_vm9, %v1704_v11, %v4836_v15  ;;  %2470 = vmatpush3.xpose.msk.msra.mxu1 %vm1839_vm10, %v1801_v39  ;;  %v5918_v36 = vld [vmem:[#allocation121_spill] sm:$0xff] }
 0x266   : > { %2434 = vmatpush3.xpose.msk.msra.mxu0 %vm1839_vm10, %v1769_v28  ;;  %2471 = vmatprep.subr.msk.mxu1 %vm1839_vm10, %v1816_v22  ;;  %v5916_v28 = vld [vmem:[#allocation134_spill] sm:$0xff]  ;;  %v5917_v22 = vld [vmem:[#allocation83_spill] sm:$0xff] }
 0x267   : > { %2435 = vmatprep.subr.msk.mxu0 %vm1839_vm10, %v1784_v51  ;;  %v4856_v17 = vpop.permute.xlu1 %979  ;;  %v5919_v51 = vld [vmem:[#allocation58_spill] sm:$0xff] }
 0x268   : > { %v1605_v45 = vsel %vm1565_vm6, %v1540_v46, %v4856_v17  ;;  %v4862_v8 = vpop.permute.xlu0 %947  ;;  %v1458_v62 = vsel %vm1435_vm4, %v5919_v51, %v5918_v36 }
 0x269   : > { %v1670_v23 = vsel %vm1630_vm7, %v1605_v45, %v4285_v34  ;;  %v1573_v52 = vsel %vm1565_vm6, %v1508_v61, %v4862_v8  ;;  %v5915_v34 = vld [vmem:[#allocation4_spill] sm:$0xff] }
 0x26a   : > { %v1638_v33 = vsel %vm1630_vm7, %v1573_v52, %v4287_v18  ;;  %v1735_v50 = vsel %vm1695_vm8, %v1670_v23, %v4318_v53 }
 0x26b   : > { %v4872_v7 = vpop.permute.xlu1 %897  ;;  %v1703_v5 = vsel %vm1695_vm8, %v1638_v33, %v4325_v63  ;;  %v1800_v9 = vsel %vm1760_vm9, %v1735_v50, %v5914_v24  ;;  %v1490_v63 = vsel %vm1435_vm4, %v5917_v22, %v5916_v28 }
 0x26c   : > { %v4878_v11 = vpop.permute.xlu0 %865  ;;  %v1768_v39 = vsel %vm1760_vm9, %v1703_v5, %v5915_v34  ;;  %2472 = vmatpush3.xpose.msk.msra.mxu1 %vm1839_vm10, %v1800_v9  ;;  %v1555_v46 = vsel %vm1500_vm5, %v1490_v63, %v4872_v7  ;;  %v5920_v5 = vld [vmem:[#allocation127_spill] sm:$0xff] }
 0x26d   : > { %2436 = vmatpush3.xpose.msk.msra.mxu0 %vm1839_vm10, %v1768_v39  ;;  %v1523_v45 = vsel %vm1500_vm5, %v1458_v62, %v4878_v11  ;;  %v1474_v24 = vsel %vm1435_vm4, %v4476_v19, %v5920_v5  ;;  %v5921_v39 = vld [vmem:[#allocation115_spill] sm:$0xff] }
 0x26e   : > { %v1442_v22 = vsel %vm1435_vm4, %v4486_v59, %v5921_v39 }
 0x26f   : > { %v4884_v18 = vpop.permute.xlu1 %881 }
 0x270   : > { %v4886_v53 = vpop.permute.xlu0 %849 }
 0x273   : > { %v4896_v61 = vpop.permute.xlu1 %993 }
 0x274   : > { %v1620_v23 = vsel %vm1565_vm6, %v1555_v46, %v4896_v61  ;;  %v4902_v52 = vpop.permute.xlu0 %961 }
 0x275   : > { %v1685_v33 = vsel %vm1630_vm7, %v1620_v23, %v4412_v57  ;;  %v1588_v50 = vsel %vm1565_vm6, %v1523_v45, %v4902_v52  ;;  %v1539_v57 = vsel %vm1500_vm5, %v1474_v24, %v4884_v18  ;;  %v5922_v24 = vld [vmem:[#allocation131_spill] sm:$0xff] }
 0x276   : > { %v1653_v9 = vsel %vm1630_vm7, %v1588_v50, %v4414_v32  ;;  %v1750_v34 = vsel %vm1695_vm8, %v1685_v33, %v4428_v44  ;;  %v1507_v32 = vsel %vm1500_vm5, %v1442_v22, %v4886_v53 }
 0x277   : > { %v4920_v63 = vpop.permute.xlu1 %977  ;;  %v1718_v51 = vsel %vm1695_vm8, %v1653_v9, %v4430_v20  ;;  %v1815_v19 = vsel %vm1760_vm9, %v1750_v34, %v4495_v56  ;;  %v5923_v9 = vld [vmem:[#allocation118_spill] sm:$0xff] }
 0x278   : > { %v1604_v44 = vsel %vm1565_vm6, %v1539_v57, %v4920_v63  ;;  %v4930_v62 = vpop.permute.xlu0 %945  ;;  %v1783_v59 = vsel %vm1760_vm9, %v1718_v51, %v4506_v0  ;;  %2473 = vmatprep.subr.msk.mxu1 %vm1839_vm10, %v1815_v19 }
 0x279   : > { %v1669_v46 = vsel %vm1630_vm7, %v1604_v44, %v4420_v49  ;;  %v1572_v20 = vsel %vm1565_vm6, %v1507_v32, %v4930_v62  ;;  %2437 = vmatprep.subr.msk.mxu0 %vm1839_vm10, %v1783_v59  ;;  %v5925_v59 = vld [vmem:[#allocation99_spill] sm:$0xff] }
 0x27a   : > { %v1637_v56 = vsel %vm1630_vm7, %v1572_v20, %v4422_v29  ;;  %v1734_v45 = vsel %vm1695_vm8, %v1669_v46, %v4453_v40  ;;  %v5926_v20 = vld [vmem:[#allocation112_spill] sm:$0xff] }
 0x27b   : > { %v4944_v23 = vpop.permute.xlu1 %895  ;;  %v1702_v0 = vsel %vm1695_vm8, %v1637_v56, %v4460_v55  ;;  %v1799_v33 = vsel %vm1760_vm9, %v1734_v45, %v4528_v16  ;;  %v1489_v55 = vsel %vm1435_vm4, %v4582_v21, %v5922_v24  ;;  %v1457_v16 = vsel %vm1435_vm4, %v4588_v14, %v5923_v9  ;;  %v5924_v14 = vld [vmem:[#allocation124_spill] sm:$0xff]  ;;  %v5927_v56 = vld [vmem:[#allocation105_spill] sm:$0xff] }
 0x27c   : > { %v4950_v49 = vpop.permute.xlu0 %863  ;;  %v1767_v50 = vsel %vm1760_vm9, %v1702_v0, %v4534_v35  ;;  %2474 = vmatpush3.xpose.msk.msra.mxu1 %vm1839_vm10, %v1799_v33  ;;  %v1554_v34 = vsel %vm1500_vm5, %v1489_v55, %v4944_v23  ;;  %v1473_v32 = vsel %vm1435_vm4, %v4622_v58, %v5924_v14  ;;  %v1441_v45 = vsel %vm1435_vm4, %v5927_v56, %v5926_v20  ;;  %v5928_v33 = vld [vmem:[#allocation77_spill] sm:$0xff]  ;;  %v5929_v55 = vld [vmem:[#allocation32_spill] sm:$0xff] }
 0x27d   : > { %2438 = vmatpush3.xpose.msk.msra.mxu0 %vm1839_vm10, %v1767_v50  ;;  %v1522_v22 = vsel %vm1500_vm5, %v1457_v16, %v4950_v49 }
 0x27f   : > { %v4956_v29 = vpop.permute.xlu1 %879 }
 0x280   : > { %v4958_v40 = vpop.permute.xlu0 %847 }
 0x283   : > { %v4968_v35 = vpop.permute.xlu1 %991 }
 0x284   : > { %v1619_v57 = vsel %vm1565_vm6, %v1554_v34, %v4968_v35  ;;  %v4974_v51 = vpop.permute.xlu0 %959 }
 0x285   : > { %v1684_v21 = vsel %vm1630_vm7, %v1619_v57, %v4544_v54  ;;  %v1587_v19 = vsel %vm1565_vm6, %v1522_v22, %v4974_v51  ;;  %v1538_v54 = vsel %vm1500_vm5, %v1473_v32, %v4956_v29  ;;  %v5931_v22 = vld [vmem:[#allocation93_spill] sm:$0xff] }
 0x286   : > { %v1652_v44 = vsel %vm1630_vm7, %v1587_v19, %v4546_v25  ;;  %v1749_v46 = vsel %vm1695_vm8, %v1684_v21, %v5925_v59  ;;  %v1506_v25 = vsel %vm1500_vm5, %v1441_v45, %v4958_v40  ;;  %v5932_v21 = vld [vmem:[#allocation111_spill] sm:$0xff] }
 0x287   : > { %v4992_v0 = vpop.permute.xlu1 %975  ;;  %v1717_v50 = vsel %vm1695_vm8, %v1652_v44, %v5928_v33  ;;  %v1814_v58 = vsel %vm1760_vm9, %v1749_v46, %v5929_v55  ;;  %v5933_v44 = vld [vmem:[#allocation36_spill] sm:$0xff]  ;;  %v5934_v46 = vld [vmem:[#allocation49_spill] sm:$0xff]  ;;  %v5935_v45 = vld [vmem:[#allocation43_spill] sm:$0xff] }
 0x288   : > { %v1603_v16 = vsel %vm1565_vm6, %v1538_v54, %v4992_v0  ;;  %v5002_v34 = vpop.permute.xlu0 %943  ;;  %v1782_v57 = vsel %vm1760_vm9, %v1717_v50, %v5931_v22  ;;  %2475 = vmatprep.subr.msk.mxu1 %vm1839_vm10, %v1814_v58  ;;  %v1617_v54 = vsel %vm1565_vm6, %v5935_v45, %v4796_v60  ;;  %v5936_v50 = vld [vmem:[#allocation61_spill] sm:$0xff]  ;;  %v5938_v22 = vld [vmem:[#allocation48_spill] sm:$0xff] }
 0x289   : > { %5930 = vst [vmem:[#allocation12_spill] sm:$0xff] %v5002_v34  ;;  %v1668_v19 = vsel %vm1630_vm7, %v1603_v16, %v5932_v21  ;;  %v1571_v32 = vsel %vm1565_vm6, %v1506_v25, %v5002_v34  ;;  %2439 = vmatprep.subr.msk.mxu0 %vm1839_vm10, %v1782_v57  ;;  %v5937_v58 = vld [vmem:[#allocation129_spill] sm:$0xff]  ;;  %v2589_v21 = vld [vmem:[%s2710_s30 + $0x8] sm:$0xff]  ;;  %v5944_v34 = vld [vmem:[#allocation86_spill] sm:$0xff] }
 0x28a   : > { %v1636_v59 = vsel %vm1630_vm7, %v1571_v32, %v5933_v44  ;;  %v1733_v56 = vsel %vm1695_vm8, %v1668_v19, %v5934_v46  ;;  %v2588_v16 = vld [vmem:[%s2710_s30 + $0x18] sm:$0xff]  ;;  %v5939_v32 = vld [vmem:[#allocation50_spill] sm:$0xff] }
 0x28b   : > { %v5019_v33 = vpop.permute.xlu1 %893  ;;  %v1701_v55 = vsel %vm1695_vm8, %v1636_v59, %v5936_v50  ;;  %v1798_v25 = vsel %vm1760_vm9, %v1733_v56, %v5937_v58  ;;  %v1365_v57 = vsel %vm1361_vm2, %v2588_v16, %v5938_v22  ;;  %v1363_v19 = vsel %vm1361_vm2, %v2589_v21, %v5939_v32  ;;  %v5940_v44 = vld [vmem:[#allocation29_spill] sm:$0xff]  ;;  %v2590_v56 = vld [vmem:[%s2710_s30 + $0x10] sm:$0xff] }
 0x28c   : > { %v1585_v60 = vsel %vm1565_vm6, %v5940_v44, %v4806_v1  ;;  %v5034_v46 = vpop.permute.xlu0 %861  ;;  %v5941_v45 = vld [vmem:[#allocation117_spill] sm:$0xff]  ;;  %2476 = vmatpush3.xpose.msk.msra.mxu1 %vm1839_vm10, %v1798_v25  ;;  %v5942_v50 = vld [vmem:[#allocation44_spill] sm:$0xff]  ;;  %v1402_v21 = vsel %vm1398_vm3, %v1365_v57, %v5944_v34  ;;  %v5945_v1 = vld [vmem:[#allocation87_spill] sm:$0xff] }
 0x28d   : > { %v1766_v59 = vsel %vm1760_vm9, %v1701_v55, %v5941_v45  ;;  %v1364_v58 = vsel %vm1361_vm2, %v2590_v56, %v5942_v50  ;;  %v5943_v16 = vld [vmem:[#allocation84_spill] sm:$0xff]  ;;  %v5946_v25 = vld [vmem:[#allocation113_spill] sm:$0xff]  ;;  %v1439_v34 = vsel %vm1435_vm4, %v1402_v21, %v5913_v27  ;;  %v5948_v57 = vld [vmem:[#allocation38_spill] sm:$0xff] }
 0x28e   : > { %v1400_v22 = vsel %vm1398_vm3, %v1363_v19, %v5943_v16  ;;  %2440 = vmatpush3.xpose.msk.msra.mxu0 %vm1839_vm10, %v1766_v59  ;;  %v5049_v32 = vsel %vm1398_vm3, %v1364_v58, %v5945_v1  ;;  %v1440_v44 = vsel %vm1435_vm4, %v4787_v38, %v5946_v25  ;;  %v5947_v45 = vld [vmem:[#allocation136_spill] sm:$0xff]  ;;  %v1453_v59 = vsel %vm1435_vm4, %v5948_v57, %v5923_v9  ;;  %v5949_v56 = vld [vmem:[#allocation119_spill] sm:$0xff]  ;;  %v5951_v38 = vld [vmem:[#allocation150_spill] sm:$0xff] }
 0x28f   : > { %v5053_v55 = vsel %vm1435_vm4, %v1400_v22, %v5926_v20  ;;  %v1682_v19 = vsel %vm1630_vm7, %v1617_v54, %v5947_v45  ;;  %v1456_v50 = vsel %vm1435_vm4, %v4730_v10, %v5949_v56  ;;  %v5950_v20 = vld [vmem:[#allocation137_spill] sm:$0xff]  ;;  %v5070_v16 = vpop.permute.xlu1 %877  ;;  %v1454_v54 = vsel %vm1435_vm4, %v5951_v38, %v5918_v36  ;;  %v5952_v22 = vld [vmem:[#allocation19_spill] sm:$0xff]  ;;  %v5956_v36 = vld [vmem:[#allocation110_spill] sm:$0xff] }
 0x290   : > { %v1650_v58 = vsel %vm1630_vm7, %v1585_v60, %v5950_v20  ;;  %v1469_v27 = vsel %vm1435_vm4, %v5952_v22, %v5924_v14  ;;  %v5953_v21 = vld [vmem:[#allocation125_spill] sm:$0xff]  ;;  %v5954_v1 = vld [vmem:[#allocation139_spill] sm:$0xff]  ;;  %v5084_v45 = vpop.permute.xlu0 %845  ;;  %v1485_v20 = vsel %vm1435_vm4, %v5956_v36, %v5922_v24  ;;  %v5957_v38 = vld [vmem:[#allocation140_spill] sm:$0xff] }
 0x291   : > { %v1472_v9 = vsel %vm1435_vm4, %v4780_v30, %v5953_v21  ;;  %v1471_v10 = vsel %vm1435_vm4, %v5954_v1, %v5912_v6  ;;  %v5955_v60 = vld [vmem:[#allocation145_spill] sm:$0xff]  ;;  %v1747_v30 = vsel %vm1695_vm8, %v1682_v19, %v5957_v38  ;;  %v5958_v22 = vld [vmem:[#allocation132_spill] sm:$0xff]  ;;  %v5959_v1 = vld [vmem:[#allocation106_spill] sm:$0xff]  ;;  %v1504_v19 = vsel %vm1500_vm5, %v1439_v34, %v4770_v26 }
 0x292   : > { %v1470_v57 = vsel %vm1435_vm4, %v5955_v60, %v5920_v5  ;;  %v1536_v14 = vsel %vm1500_vm5, %v1471_v10, %v4768_v12  ;;  %v1488_v6 = vsel %vm1435_vm4, %v4726_v13, %v5958_v22  ;;  %v1486_v25 = vsel %vm1435_vm4, %v5959_v1, %v5916_v28  ;;  %v5960_v60 = vld [vmem:[#allocation141_spill] sm:$0xff]  ;;  %v5961_v36 = vld [vmem:[#allocation11_spill] sm:$0xff] }
 0x293   : > { %v1601_v5 = vsel %vm1565_vm6, %v1536_v14, %v4856_v17  ;;  %v1715_v24 = vsel %vm1695_vm8, %v1650_v58, %v5960_v60  ;;  %v1484_v12 = vsel %vm1435_vm4, %v5961_v36, %v5958_v22  ;;  %v1551_v13 = vsel %vm1500_vm5, %v1486_v25, %v4872_v7  ;;  %v990_v28 = vpop.permute.xlu1 %989  ;;  %v5962_v22 = vld [vmem:[#allocation63_spill] sm:$0xff] }
 0x294   : > { %v1553_v10 = vsel %vm1500_vm5, %v1488_v6, %v5019_v33  ;;  %v1616_v17 = vsel %vm1565_vm6, %v1551_v13, %v4896_v61  ;;  %v1521_v58 = vsel %vm1500_vm5, %v1456_v50, %v5034_v46  ;;  %v5120_v38 = vpop.permute.xlu0 %957  ;;  %v1812_v26 = vsel %vm1760_vm9, %v1747_v30, %v5962_v22  ;;  %v5963_v34 = vld [vmem:[#allocation135_spill] sm:$0xff]  ;;  %v5964_v61 = vld [vmem:[#allocation42_spill] sm:$0xff] }
 0x295   : > { %v1618_v14 = vsel %vm1565_vm6, %v1553_v10, %v990_v28  ;;  %v1666_v7 = vsel %vm1630_vm7, %v1601_v5, %v5963_v34  ;;  %v1586_v6 = vsel %vm1565_vm6, %v1521_v58, %v5120_v38  ;;  %v1780_v1 = vsel %vm1760_vm9, %v1715_v24, %v5964_v61  ;;  %v5965_v36 = vld [vmem:[#allocation143_spill] sm:$0xff]  ;;  %v5970_v61 = vld [vmem:[#allocation148_spill] sm:$0xff] }
 0x296   : > { %v1683_v25 = vsel %vm1630_vm7, %v1618_v14, %v4691_v48  ;;  %v1519_v50 = vsel %vm1500_vm5, %v1454_v54, %v4878_v11  ;;  %v1535_v60 = vsel %vm1500_vm5, %v1470_v57, %v4884_v18  ;;  %v1651_v30 = vsel %vm1630_vm7, %v1586_v6, %v4696_v42  ;;  %v5966_v11 = vld [vmem:[#allocation24_spill] sm:$0xff] }
 0x297   : > { %v1748_v5 = vsel %vm1695_vm8, %v1683_v25, %v4702_v43  ;;  %v1681_v48 = vsel %vm1630_vm7, %v1616_v17, %v5965_v36  ;;  %v1537_v13 = vsel %vm1500_vm5, %v1472_v9, %v5070_v16  ;;  %v974_v10 = vpop.permute.xlu1 %973  ;;  %v1716_v24 = vsel %vm1695_vm8, %v1651_v30, %v4704_v3  ;;  %v5973_v36 = vld [vmem:[#allocation16_spill] sm:$0xff] }
 0x298   : > { %v1813_v54 = vsel %vm1760_vm9, %v1748_v5, %v5966_v11  ;;  %v1584_v18 = vsel %vm1565_vm6, %v1519_v50, %v4902_v52  ;;  %v1505_v42 = vsel %vm1500_vm5, %v1440_v44, %v5084_v45  ;;  %v1602_v43 = vsel %vm1565_vm6, %v1537_v13, %v974_v10  ;;  %v5153_v57 = vpop.permute.xlu0 %941  ;;  %v5971_v50 = vld [vmem:[#allocation154_spill] sm:$0xff] }
 0x299   : > { %v1781_v9 = vsel %vm1760_vm9, %v1716_v24, %v4762_v31  ;;  %2477 = vmatprep.subr.msk.mxu1 %vm1839_vm10, %v1813_v54  ;;  %v1600_v3 = vsel %vm1565_vm6, %v1535_v60, %v4920_v63  ;;  %v1550_v17 = vsel %vm1500_vm5, %v1485_v20, %v4944_v23  ;;  %v1667_v52 = vsel %vm1630_vm7, %v1602_v43, %v4698_v41  ;;  %v5967_v20 = vld [vmem:[#allocation35_spill] sm:$0xff]  ;;  %v5977_v13 = vld [vmem:[#allocation6_spill] sm:$0xff]  ;;  %v5979_v54 = vld [vmem:[#allocation52_spill] sm:$0xff] }
 0x29a   : > { %v1570_v44 = vsel %vm1565_vm6, %v1505_v42, %v5153_v57  ;;  %2441 = vmatprep.subr.msk.mxu0 %vm1839_vm10, %v1781_v9  ;;  %v1569_v58 = vsel %vm1565_vm6, %v1504_v19, %v4862_v8  ;;  %v1615_v31 = vsel %vm1565_vm6, %v1550_v17, %v4968_v35  ;;  %v1732_v23 = vsel %vm1695_vm8, %v1667_v52, %v4735_v2  ;;  %v5968_v8 = vld [vmem:[#allocation138_spill] sm:$0xff]  ;;  %v5969_v35 = vld [vmem:[#allocation56_spill] sm:$0xff]  ;;  %v5978_v24 = vld [vmem:[#allocation155_spill] sm:$0xff] }
 0x29b   : > { %v1635_v63 = vsel %vm1630_vm7, %v1570_v44, %v4700_v47  ;;  %v1649_v41 = vsel %vm1630_vm7, %v1584_v18, %v5967_v20  ;;  %v1152_v14 = vpop.permute.xlu1 %1151  ;;  %v1797_v34 = vsel %vm1760_vm9, %v1732_v23, %v4828_v37  ;;  %v1731_v19 = vsel %vm1695_vm8, %v1666_v7, %v5968_v8  ;;  %v5981_v44 = vld [vmem:[#allocation153_spill] sm:$0xff]  ;;  %v5983_v23 = vld [vmem:[#allocation147_spill] sm:$0xff] }
 0x29c   : > { %v1700_v22 = vsel %vm1695_vm8, %v1635_v63, %v4742_v4  ;;  %v1665_v25 = vsel %vm1630_vm7, %v1600_v3, %v5969_v35  ;;  %v1518_v47 = vsel %vm1500_vm5, %v1453_v59, %v4950_v49  ;;  %v1044_v2 = vpop.permute.xlu0 %1043  ;;  %2478 = vmatpush3.xpose.msk.msra.mxu1 %vm1839_vm10, %v1797_v34  ;;  %v1746_v4 = vsel %vm1695_vm8, %v1681_v48, %v5970_v61  ;;  %v5980_v3 = vld [vmem:[#allocation59_spill] sm:$0xff]  ;;  %v5986_v8 = vld [vmem:[#allocation25_spill] sm:$0xff] }
 0x29d   : > { %v1765_v6 = vsel %vm1760_vm9, %v1700_v22, %v4836_v15  ;;  %v1534_v37 = vsel %vm1500_vm5, %v1469_v27, %v4956_v29  ;;  %v1680_v7 = vsel %vm1630_vm7, %v1615_v31, %v5971_v50  ;;  %v1634_v60 = vsel %vm1630_vm7, %v1569_v58, %v1044_v2  ;;  %2479 = vmatprep.subr.msk.mxu1 %vm1839_vm10, %v1812_v26  ;;  %v5972_v27 = vld [vmem:[#allocation26_spill] sm:$0xff]  ;;  %v5982_v31 = vld [vmem:[#allocation20_spill] sm:$0xff] }
 0x29e   : > { %2442 = vmatpush3.xpose.msk.msra.mxu0 %vm1839_vm10, %v1765_v6  ;;  %v1438_v15 = vsel %vm1435_vm4, %v5049_v32, %v5921_v39  ;;  %v1583_v49 = vsel %vm1565_vm6, %v1518_v47, %v4974_v51  ;;  %v1599_v59 = vsel %vm1565_vm6, %v1534_v37, %v4992_v0  ;;  %v1549_v29 = vsel %vm1500_vm5, %v1484_v12, %v5019_v33  ;;  %v5974_v32 = vld [vmem:[#allocation146_spill] sm:$0xff]  ;;  %v5975_v33 = vld [vmem:[#allocation40_spill] sm:$0xff] }
 0x29f   : > { %2443 = vmatprep.subr.msk.mxu0 %vm1839_vm10, %v1780_v1  ;;  %v1468_v30 = vsel %vm1435_vm4, %v5972_v27, %v5953_v21  ;;  %v1614_v26 = vsel %vm1565_vm6, %v1549_v29, %v990_v28  ;;  %v1042_v5 = vpop.permute.xlu1 %1041  ;;  %v1796_v39 = vsel %vm1760_vm9, %v1731_v19, %v5973_v36  ;;  %v1714_v51 = vsel %vm1695_vm8, %v1649_v41, %v5974_v32  ;;  %v5976_v1 = vld [vmem:[#allocation142_spill] sm:$0xff]  ;;  %v5989_v37 = vld [vmem:[#allocation12_spill] sm:$0xff] }
 0x2a0   : > { %v1699_v0 = vsel %vm1695_vm8, %v1634_v60, %v1152_v14  ;;  %v1260_v48 = vpop.permute.xlu0 %1259  ;;  %2480 = vmatpush3.xpose.msk.msra.mxu1 %vm1839_vm10, %v1796_v39  ;;  %v1811_v12 = vsel %vm1760_vm9, %v1746_v4, %v5975_v33  ;;  %v1730_v21 = vsel %vm1695_vm8, %v1665_v25, %v5976_v1  ;;  %v1745_v28 = vsel %vm1695_vm8, %v1680_v7, %v5977_v13  ;;  %v5984_v41 = vld [vmem:[#allocation98_spill] sm:$0xff]  ;;  %v5987_v25 = vld [vmem:[#allocation76_spill] sm:$0xff]  ;;  %v5997_v33 = vld [vmem:[#allocation23_spill] sm:$0xff] }
 0x2a1   : > { %v1648_v11 = vsel %vm1630_vm7, %v1583_v49, %v5978_v24  ;;  %v1664_v18 = vsel %vm1630_vm7, %v1599_v59, %v5979_v54  ;;  %v1533_v42 = vsel %vm1500_vm5, %v1468_v30, %v5070_v16  ;;  %v1764_v43 = vsel %vm1760_vm9, %v1699_v0, %v1260_v48  ;;  %2481 = vmatprep.subr.msk.mxu1 %vm1839_vm10, %v1811_v12  ;;  %v5990_v7 = vld [vmem:[#allocation122_spill] sm:$0xff]  ;;  %v5992_v59 = vld [vmem:[#allocation104_spill] sm:$0xff]  ;;  %v5996_v0 = vld [vmem:[#allocation7_spill] sm:$0xff] }
 0x2a2   : > { %v1503_v9 = vsel %vm1500_vm5, %v1438_v15, %v4886_v53  ;;  %v1679_v17 = vsel %vm1630_vm7, %v1614_v26, %v5980_v3  ;;  %v1598_v52 = vsel %vm1565_vm6, %v1533_v42, %v974_v10  ;;  %2444 = vmatpush3.xpose.msk.msra.mxu0 %vm1839_vm10, %v1764_v43  ;;  %v1779_v58 = vsel %vm1760_vm9, %v1714_v51, %v5981_v44  ;;  %v5991_v15 = vld [vmem:[#allocation62_spill] sm:$0xff]  ;;  %v5994_v30 = vld [vmem:[#allocation92_spill] sm:$0xff]  ;;  %v5998_v1 = vld [vmem:[#allocation85_spill] sm:$0xff] }
 0x2a3   : > { %v1452_v16 = vsel %vm1435_vm4, %v5982_v31, %v5949_v56  ;;  %v1568_v63 = vsel %vm1565_vm6, %v1503_v9, %v4930_v62  ;;  %2445 = vmatprep.subr.msk.mxu0 %vm1839_vm10, %v1779_v58  ;;  %v1258_v53 = vpop.permute.xlu1 %1257  ;;  %v1795_v20 = vsel %vm1760_vm9, %v1730_v21, %v5983_v23  ;;  %v1810_v10 = vsel %vm1760_vm9, %v1745_v28, %v5984_v41  ;;  %v5985_v56 = vld [vmem:[#allocation82_spill] sm:$0xff]  ;;  %v5999_v24 = vld [vmem:[#allocation113_spill] sm:$0xff]  ;;  %v6000_v43 = vld [vmem:[#allocation39_spill] sm:$0xff] }
 0x2a4   : > { %v1517_v14 = vsel %vm1500_vm5, %v1452_v16, %v5034_v46  ;;  %v1633_v22 = vsel %vm1630_vm7, %v1568_v63, %v1042_v5  ;;  %v1150_v34 = vpop.permute.xlu0 %1149  ;;  %2482 = vmatpush3.xpose.msk.msra.mxu1 %vm1839_vm10, %v1795_v20  ;;  %v1713_v62 = vsel %vm1695_vm8, %v1648_v11, %v5985_v56  ;;  %v1729_v19 = vsel %vm1695_vm8, %v1664_v18, %v5986_v8  ;;  %v5988_v46 = vld [vmem:[#allocation14_spill] sm:$0xff]  ;;  %v1826_v18 = vld [vmem:[%s5346_s1 + $0x8] sm:$0xff] }
 0x2a5   : > { %v1582_v35 = vsel %vm1565_vm6, %v1517_v14, %v5120_v38  ;;  %v1663_v47 = vsel %vm1630_vm7, %v1598_v52, %v5987_v25  ;;  %v1698_v2 = vsel %vm1695_vm8, %v1633_v22, %v1150_v34  ;;  %2483 = vmatprep.subr.msk.mxu1 %vm1839_vm10, %v1810_v10  ;;  %v1744_v6 = vsel %vm1695_vm8, %v1679_v17, %v5988_v46  ;;  %v2591_v36 = vld [vmem:[%s2710_s30] sm:$0xff]  ;;  %v6001_v17 = vld [vmem:[#allocation71_spill] sm:$0xff] }
 0x2a6   : > { %v1502_v61 = vsel %vm1500_vm5, %v5053_v55, %v4958_v40  ;;  %v1763_v4 = vsel %vm1760_vm9, %v1698_v2, %v1258_v53  ;;  %v1778_v60 = vsel %vm1760_vm9, %v1713_v62, %v5990_v7  ;;  %v1794_v49 = vsel %vm1760_vm9, %v1729_v19, %v5991_v15  ;;  %v5993_v55 = vld [vmem:[#allocation64_spill] sm:$0xff]  ;;  %v5995_v39 = vld [vmem:[#allocation46_spill] sm:$0xff] }
 0x2a7   : > { %v1567_v38 = vsel %vm1565_vm6, %v1502_v61, %v5989_v37  ;;  %2446 = vmatpush3.xpose.msk.msra.mxu0 %vm1839_vm10, %v1763_v4  ;;  %v1148_v50 = vpop.permute.xlu1 %1147  ;;  %v1647_v29 = vsel %vm1630_vm7, %v1582_v35, %v5992_v59  ;;  %v1809_v27 = vsel %vm1760_vm9, %v1744_v6, %v5993_v55  ;;  %v1728_v26 = vsel %vm1695_vm8, %v1663_v47, %v5994_v30 }
 0x2a8   : > { %2447 = vmatprep.subr.msk.mxu0 %vm1839_vm10, %v1778_v60  ;;  %v1040_v40 = vpop.permute.xlu0 %1039  ;;  %2484 = vmatpush3.xpose.msk.msra.mxu1 %vm1839_vm10, %v1794_v49  ;;  %v1362_v32 = vsel %vm1361_vm2, %v2591_v36, %v5995_v39  ;;  %v1793_v48 = vsel %vm1760_vm9, %v1728_v26, %v5996_v0  ;;  %v1712_v12 = vsel %vm1695_vm8, %v1647_v29, %v5997_v33 }
 0x2a9   : > { %v1632_v5 = vsel %vm1630_vm7, %v1567_v38, %v1040_v40  ;;  %2485 = vmatprep.subr.msk.mxu1 %vm1839_vm10, %v1809_v27  ;;  %v1399_v21 = vsel %vm1398_vm3, %v1362_v32, %v5998_v1  ;;  %v1777_v9 = vsel %vm1760_vm9, %v1712_v12, %v6000_v43 }
 0x2aa   : > { %v1697_v13 = vsel %vm1695_vm8, %v1632_v5, %v1148_v50  ;;  %v1436_v11 = vsel %vm1435_vm4, %v1399_v21, %v5999_v24 }
 0x2ab   : > { %v1038_v51 = vpop.permute.xlu1 %1037  ;;  %v1501_v42 = vsel %vm1500_vm5, %v1436_v11, %v5084_v45 }
 0x2ac   : > { %v1256_v28 = vpop.permute.xlu0 %1255  ;;  %2486 = vmatpush3.xpose.msk.msra.mxu1 %vm1839_vm10, %v1793_v48  ;;  %v1566_v3 = vsel %vm1565_vm6, %v1501_v42, %v5153_v57 }
 0x2ad   : > { %v1762_v54 = vsel %vm1760_vm9, %v1697_v13, %v1256_v28  ;;  %v1631_v44 = vsel %vm1630_vm7, %v1566_v3, %v1038_v51 }
 0x2ae   : > { %2448 = vmatpush3.xpose.msk.msra.mxu0 %vm1839_vm10, %v1762_v54 }
 0x2af   : > { %2449 = vmatprep.subr.msk.mxu0 %vm1839_vm10, %v1777_v9  ;;  %2488 = vmatmul.mubr.msk.f32.vlgmr.msra.gmra.mxu1 %vm1839_vm10, %v6001_v17  ;;  %v1254_v52 = vpop.permute.xlu1 %1253 }
 0x2b0   : > { %v1146_v58 = vpop.permute.xlu0 %1145  ;;  %2489 = vmatprep.mubr.msk.f32.mxu1 %vm1839_vm10, %v1826_v18 }
 0x2b1   : > { %v1696_v45 = vsel %vm1695_vm8, %v1631_v44, %v1146_v58 }
 0x2b2   : > { %v1761_v31 = vsel %vm1760_vm9, %v1696_v45, %v1254_v52 }
 0x2b3   : > { %2450 = vmatpush3.xpose.msk.msra.mxu0 %vm1839_vm10, %v1761_v31  ;;  %2490 = vmatmul.mubr.msk.f32.gmra.mxu1 %vm1839_vm10, %v1826_v18 }
 0x2b6   : > { %2452 = vmatmul.mubr.msk.f32.vlgmr.msra.gmra.mxu0 %vm1839_vm10, %v6001_v17 }
 0x2b7   : > { %2453 = vmatprep.mubr.msk.f32.mxu0 %vm1839_vm10, %v1826_v18 }
 0x2ba   : > { %2454 = vmatmul.mubr.msk.f32.gmra.mxu0 %vm1839_vm10, %v1826_v18 }
 0x2bc   : > { %v1832_v50 = vpop.permute.xlu1 %1831 }
 0x2bd   : > { %v1837_v63 = vpop.permute.xlu0 %1836 }
 0x2c0   : > { %v2224_v15 = vpop.permute.xlu1 %2223 }
 0x2c1   : > { %v2234_v27 = vpop.permute.xlu0 %2233 }
 0x36f   : > { %v2181_v57 = vpop.f32.mrf.mxu1 }
 0x370   : > { %v2182_v7 = vadd.f32 %v2181_v57, %v1832_v50 }
 0x371   : > { %v2183_v16 = vpop.f32.mrf.mxu1 }
 0x372   : > { %v2184_v49 = vadd.f32 %v2183_v16, %v1832_v50 }
 0x373   : > { %v2187_v53 = vpop.f32.mrf.mxu1 }
 0x374   : > { %v2188_v23 = vadd.f32 %v2187_v53, %v1837_v63 }
 0x375   : > { %v2189_v20 = vpop.f32.mrf.mxu1 }
 0x376   : > { %v2415_v41 = vmul.f32 -1.442695, %v2188_v23  ;;  %v2104_v10 = vpop.f32.mrf.mxu0  ;;  %v2190_v14 = vadd.f32 %v2189_v20, %v1837_v63 }
 0x377   : > { %v2105_v5 = vadd.f32 %v2104_v10, %v1832_v50 }
 0x378   : > { %2543 = vpow2.f32 %v2415_v41  ;;  %v2416_v22 = vmul.f32 -1.442695, %v2190_v14  ;;  %v2106_v34 = vpop.f32.mrf.mxu0 }
 0x379   : > { %v2107_v51 = vadd.f32 %v2106_v34, %v1832_v50 }
 0x37a   : > { %2545 = vpow2.f32 %v2416_v22  ;;  %v2110_v56 = vpop.f32.mrf.mxu0 }
 0x37b   : > { %v2111_v62 = vadd.f32 %v2110_v56, %v1837_v63 }
 0x37c   : > { %v2112_v8 = vpop.f32.mrf.mxu0 }
 0x37d   : > { %v2413_v19 = vmul.f32 -1.442695, %v2111_v62  ;;  %v2113_v35 = vadd.f32 %v2112_v8, %v1837_v63 }
 0x37f   : > { %2547 = vpow2.f32 %v2413_v19  ;;  %v2414_v25 = vmul.f32 -1.442695, %v2113_v35 }
 0x381   : > { %2549 = vpow2.f32 %v2414_v25 }
 0x385   : > { %v2544_v47 = vpop.eup %2543 }
 0x386   : > { %v2206_v2 = vadd.f32 1.0, %v2544_v47 }
 0x387   : > { %v2546_v46 = vpop.eup %2545 }
 0x388   : > { %2551 = vrcp.f32 %v2206_v2  ;;  %v2207_v6 = vadd.f32 1.0, %v2546_v46 }
 0x38a   : > { %2553 = vrcp.f32 %v2207_v6 }
 0x38c   : > { %v2548_v61 = vpop.eup %2547 }
 0x38d   : > { %v2204_v4 = vadd.f32 1.0, %v2548_v61 }
 0x38e   : > { %v2550_v37 = vpop.eup %2549 }
 0x38f   : > { %2555 = vrcp.f32 %v2204_v4  ;;  %v2205_v38 = vadd.f32 1.0, %v2550_v37 }
 0x391   : > { %2557 = vrcp.f32 %v2205_v38 }
 0x395   : > { %v2552_v60 = vpop.eup %2551 }
 0x396   : > { %v2218_v59 = vmul.f32 %v2552_v60, %v2182_v7 }
 0x397   : > { %v2554_v29 = vpop.eup %2553 }
 0x398   : > { %v2219_v40 = vmul.f32 %v2554_v29, %v2184_v49  ;;  %v2228_v55 = vmul.f32 %v2224_v15, %v2218_v59 }
 0x39a   : > { %v2229_v30 = vmul.f32 %v2224_v15, %v2219_v40  ;;  %v2238_v26 = vadd.f32 %v2234_v27, %v2228_v55 }
 0x39c   : > { %v2556_v36 = vpop.eup %2555  ;;  %v2239_v39 = vadd.f32 %v2234_v27, %v2229_v30  ;;  %v2242_v32 = vmax.f32 %v2238_v26, 0.0 }
 0x39d   : > { %v2216_v0 = vmul.f32 %v2556_v36, %v2105_v5 }
 0x39e   : > { %v2558_v48 = vpop.eup %2557  ;;  %v2243_v33 = vmax.f32 %v2239_v39, 0.0  ;;  %2246 = vst [vmem:[%s246_s13 + $0x10] sm:$0xff] %v2242_v32 }
 0x39f   : > { %v2217_v12 = vmul.f32 %v2558_v48, %v2107_v51  ;;  %v2226_v1 = vmul.f32 %v2224_v15, %v2216_v0 }
 0x3a0   : > { %2247 = vst [vmem:[%s246_s13 + $0x18] sm:$0xff] %v2243_v33 }
 0x3a1   : > { %v2227_v21 = vmul.f32 %v2224_v15, %v2217_v12  ;;  %v2236_v13 = vadd.f32 %v2234_v27, %v2226_v1 }
 0x3a3   : > { %v2237_v28 = vadd.f32 %v2234_v27, %v2227_v21  ;;  %v2240_v24 = vmax.f32 %v2236_v13, 0.0 }
 0x3a5   : > { %v2241_v11 = vmax.f32 %v2237_v28, 0.0  ;;  %2244 = vst [vmem:[%s246_s13] sm:$0xff] %v2240_v24 }
 0x3a7   : > { %2245 = vst [vmem:[%s246_s13 + $0x8] sm:$0xff] %v2241_v11 }
 0x3a8 PF: > { %s15_s22 = sadd.s32 1, %s2630_s22   ;;  %s6002_s18 = smov %s2622_s20 }
 0x3a9   : > { %p12_p7 = scmp.ge.s32.totalorder %s15_s22, 6   ;;  %s6003_s19 = smov %s2626_s21 }
 0x3aa   : > { %s6004_s20 = smov %s6007_s23  ;;  %s6005_s21 = smov %s6011_s24 }
 0x3ab   :  { %14 = sbr.rel (!%p12_p7) target bundleno = 3 (0x3), region = 71 }

// kernel: gated_up_conv2d_block.2
= control target key start
LH: loop header
LB: loop body
LE: loop exit
PB: predicated region body
PF: predicated region fallthrough
CT: control target
= control target key end

     0   :  { %s2587_s12 = smov 0   ;;  %s2589_s13 = smov 0   ;;  %s5264_s0 = inlined_call_operand.vmem [shape: f32[2,18,34,4], index: 0, kind: input, shape index: {}]   ;;  %s5265_s1 = inlined_call_operand.vmem [shape: f32[16,36], index: 1, kind: input, shape index: {}]   ;;  %s5266_s2 = inlined_call_operand.vmem [shape: f32[16,1], index: 2, kind: input, shape index: {}]   ;;  %s5267_s3 = inlined_call_operand.vmem [shape: f32[2,2,8,2], index: 3, kind: output, shape index: {}]  }
   0x1   :  { %s2591_s14 = smov 0   ;;  %s2593_s15 = smov 0  }
   0x2   :  { %s2595_s16 = smov 0  }
   0x3 LB: > { %s22_s17 = sadd.s32 1, %s2548_s14  ;;  %s25_s18 = sadd.s32 1, %s2552_s15  ;;  %s2556_s16 = sphi %s2595_s16, %s13_s16   ;;  %s2552_s15 = sphi %s2593_s15, %s5871_s15   ;;  %s2548_s14 = sphi %s2591_s14, %s5870_s14   ;;  %s2544_s13 = sphi %s2589_s13, %s5869_s13   ;;  %s2540_s12 = sphi %s2587_s12, %s5868_s12  }
   0x4   : > { %p23_p0 = scmp.ge.s32.totalorder %s22_s17, 2  ;;  %p2267_p1 = scmp.ge.s32.totalorder %s2556_s16, 1 }
   0x5   : > { %p151_p2 = scmp.lt.s32.totalorder %s2556_s16, 5 }
   0x6   : > { %s5873_s17 = smov (%p23_p0, %s22_s17), 0  ;;  %s5875_s18 = smov (!%p23_p0, %s25_s18), %s2552_s15 }
   0x7   : > { %p152_p3 = pnand %p2267_p1, %p151_p2  ;;  %p27_p4 = scmp.ge.s32.totalorder %s5875_s18, 2 }
   0x9   : > { %s5877_s18 = smov (%p27_p4, %s5875_s18), 0  ;;  %155 = sbr.rel (%p152_p3) target bundleno = 1077 (0x435), region = 32 }
   0xe   : > { %p178_p5 = scmp.lt.s32.totalorder %s2544_s13, 1  ;;  %s2272_s19 = smul.u32 320, %s2540_s12  ;;  %vm289_vm0 = vcmask 1046528   ;;  %vm371_vm1 = vcmask 1045504   ;;  %vm1304_vm2 = vcmask 31744   ;;  %vm1378_vm3 = vcmask 97280  }
   0xf   : > { %s2558_s25 = smov 4   ;;  %s2559_s26 = smov 8   ;;  %vm1341_vm4 = vcmask 64512   ;;  %vm1443_vm5 = vcmask 130048   ;;  %vm1508_vm6 = vcmask 162816   ;;  %vm1573_vm7 = vcmask 195584  }
  0x10   : > { %s5879_s13 = smov (!%p178_p5, %s2544_s13), 1  ;;  %s2560_s27 = smov 12   ;;  %vm1638_vm8 = vcmask 228352   ;;  %vm1703_vm9 = vcmask 261120   ;;  %vm1782_vm10 = vcmask 293888   ;;  %vm2177_vm11 = vcmask 7168  }
  0x11   : > { %s2419_s20 = smul.u32 720, %s5879_s13  ;;  %s2561_s28 = smov 16   ;;  %vm2179_vm12 = vcmask 15360  }
  0x12   : > { %s2562_s29 = smov 20   ;;  %s2563_s30 = smov 24  }
  0x13   : > { %s182_s23 = scalar_lea.vmem %s5264_s0, %s2419_s20  ;;  %s2564_s4 = smov 28  }
  0x14   : > { %s2626_s24 = scalar_lea.vmem %s182_s23, %s2272_s19  ;;  %s2565_s5 = smov 32  }
  0x15   : > { %v2629_v0 = vld [vmem:[%s2626_s24 + $0x10] sm:$0xff]  ;;  %v2632_v1 = vld [vmem:[%s2626_s24 + $0x18] sm:$0xff]  ;;  %v2635_v2 = vld [vmem:[%s2626_s24] sm:$0xff]  ;;  %p185_p6 = scmp.lt.s32.totalorder %s2540_s12, 1  ;;  %s2269_s21 = sshll.u32 %s5879_s13, 1 }
  0x16   : > { %v293_v3 = vrot.slane %v2629_v0, 1  ;;  %v295_v4 = vrot.slane %v2632_v1, 1  ;;  %v2640_v5 = vld [vmem:[%s2626_s24 + $0x8] sm:$0xff]  ;;  %v290_v6 = vrot.slane %v2635_v2, 1  ;;  %v2644_v7 = vld [vmem:[%s2626_s24 + $0x20] sm:$0x3] }
  0x17   : > { %v291_v8 = vrot.slane %v2640_v5, 1  ;;  %v297_v9 = vrot.slane %v2644_v7, 1  ;;  %v2649_v10 = vld [vmem:[%s2626_s24 + $0x30] sm:$0xff]  ;;  %v2652_v11 = vld [vmem:[%s2626_s24 + $0x38] sm:$0xff]  ;;  %v2656_v13 = vld [vmem:[%s2626_s24 + $0x28] sm:$0xff]  ;;  %s5881_s12 = smov (!%p185_p6, %s2540_s12), 1 }
  0x18   : > { %v296_v12 = vsel %vm289_vm0, %v293_v3, %v295_v4  ;;  %v300_v16 = vrot.slane %v2649_v10, 1  ;;  %v302_v17 = vrot.slane %v2652_v11, 1  ;;  %v299_v19 = vrot.slane %v2656_v13, 1  ;;  %v2667_v20 = vld [vmem:[%s2626_s24 + $0x40] sm:$0xff]  ;;  %v2670_v21 = vld [vmem:[%s2626_s24 + $0x48] sm:$0x3]  ;;  %s188_s22 = sadd.s32 %s2269_s21, %s5881_s12 }
  0x19   : > { %480 = vrot.lane.b32.xlu1 %v296_v12, %s2558_s25  ;;  %v292_v14 = vsel %vm289_vm0, %v290_v6, %v291_v8  ;;  %v298_v15 = vsel %vm289_vm0, %v295_v4, %v297_v9  ;;  %v294_v18 = vsel %vm289_vm0, %v291_v8, %v293_v3  ;;  %v304_v23 = vrot.slane %v2667_v20, 1  ;;  %v2683_v26 = vld [vmem:[%s2626_s24 + $0x58] sm:$0xff]  ;;  %v2686_v27 = vld [vmem:[%s2626_s24 + $0x60] sm:$0xff]  ;;  %v2689_v28 = vld [vmem:[%s2626_s24 + $0x50] sm:$0xff]  ;;  %s2270_s23 = sshll.u32 %s188_s22, 3 }
  0x1a   : > { %476 = vrot.lane.b32.xlu0 %v292_v14, %s2558_s25  ;;  %v2675_v22 = vsel %vm289_vm0, %v300_v16, %v302_v17  ;;  %v306_v24 = vrot.slane %v2670_v21, 1  ;;  %v2680_v25 = vsel %vm289_vm0, %v299_v19, %v300_v16  ;;  %v309_v30 = vrot.slane %v2683_v26, 1  ;;  %v2705_v34 = vld [vmem:[%s2626_s24 + $0x68] sm:$0xff]  ;;  %v2708_v35 = vld [vmem:[%s2626_s24 + $0x70] sm:$0x3]  ;;  %v2723_v40 = vld [vmem:[%s2626_s24 + $0x80] sm:$0xff] }
  0x1b   : > { %5448 = vst [vmem:[#allocation2_spill] sm:$0xff] %v2675_v22  ;;  %5449 = vst [vmem:[#allocation3_spill] sm:$0xff] %v2680_v25  ;;  %v311_v31 = vrot.slane %v2686_v27, 1  ;;  %v2701_v32 = vsel %vm289_vm0, %v302_v17, %v304_v23  ;;  %v308_v33 = vrot.slane %v2689_v28, 1  ;;  %v313_v37 = vrot.slane %v2705_v34, 1  ;;  %v2726_v41 = vld [vmem:[%s2626_s24 + $0x88] sm:$0xff] }
  0x1c   : > { %v2696_v29 = vsel %vm289_vm0, %v304_v23, %v306_v24  ;;  %5451 = vst [vmem:[#allocation5_spill] sm:$0xff] %v2701_v32  ;;  %v315_v38 = vrot.slane %v2708_v35, 1  ;;  %v2729_v42 = vld [vmem:[%s2626_s24 + $0x78] sm:$0xff]  ;;  %v318_v44 = vrot.slane %v2723_v40, 1  ;;  %v320_v45 = vrot.slane %v2726_v41, 1  ;;  %v2745_v48 = vld [vmem:[%s2626_s24 + $0x90] sm:$0xff] }
  0x1d   : > { %482 = vrot.lane.b32.xlu1 %v298_v15, %s2558_s25  ;;  %5450 = vst [vmem:[#allocation4_spill] sm:$0xff] %v2696_v29  ;;  %v2715_v36 = vsel %vm289_vm0, %v309_v30, %v311_v31  ;;  %v2720_v39 = vsel %vm289_vm0, %v308_v33, %v309_v30  ;;  %5454 = vst [vmem:[#allocation8_spill] sm:$0xff] %v2729_v42  ;;  %v2741_v46 = vsel %vm289_vm0, %v311_v31, %v313_v37  ;;  %v2748_v49 = vld [vmem:[%s2626_s24 + $0x98] sm:$0x3]  ;;  %v2763_v54 = vld [vmem:[%s2626_s24 + $0xa8] sm:$0xff] }
  0x1e   : > { %478 = vrot.lane.b32.xlu0 %v294_v18, %s2558_s25  ;;  %5452 = vst [vmem:[#allocation6_spill] sm:$0xff] %v2715_v36  ;;  %5453 = vst [vmem:[#allocation7_spill] sm:$0xff] %v2720_v39  ;;  %v2736_v43 = vsel %vm289_vm0, %v313_v37, %v315_v38  ;;  %v317_v47 = vrot.slane %v2729_v42, 1  ;;  %v2755_v50 = vsel %vm289_vm0, %v318_v44, %v320_v45  ;;  %v322_v51 = vrot.slane %v2745_v48, 1  ;;  %v2766_v55 = vld [vmem:[%s2626_s24 + $0xb0] sm:$0xff]  ;;  %v2769_v56 = vld [vmem:[%s2626_s24 + $0xa0] sm:$0xff] }
  0x1f   : > { %5455 = vst [vmem:[#allocation9_spill] sm:$0xff] %v2755_v50  ;;  %v324_v52 = vrot.slane %v2748_v49, 1  ;;  %v327_v58 = vrot.slane %v2763_v54, 1  ;;  %v329_v59 = vrot.slane %v2766_v55, 1  ;;  %v326_v61 = vrot.slane %v2769_v56, 1  ;;  %v2785_v62 = vld [vmem:[%s2626_s24 + $0xb8] sm:$0xff] }
  0x20   : > { %v2760_v53 = vsel %vm289_vm0, %v317_v47, %v318_v44  ;;  %v2781_v60 = vsel %vm289_vm0, %v320_v45, %v322_v51  ;;  %v2788_v63 = vld [vmem:[%s2626_s24 + $0xc0] sm:$0x3]  ;;  %v331_v4 = vrot.slane %v2785_v62, 1  ;;  %v2803_v9 = vld [vmem:[%s2626_s24 + $0xd0] sm:$0xff]  ;;  %v2806_v12 = vld [vmem:[%s2626_s24 + $0xd8] sm:$0xff] }
  0x21   : > { %486 = vrot.lane.b32.xlu1 %v2675_v22, %s2558_s25  ;;  %5456 = vst [vmem:[#allocation10_spill] sm:$0xff] %v2760_v53  ;;  %v2776_v57 = vsel %vm289_vm0, %v322_v51, %v324_v52  ;;  %5458 = vst [vmem:[#allocation12_spill] sm:$0xff] %v2781_v60  ;;  %v2795_v3 = vsel %vm289_vm0, %v327_v58, %v329_v59  ;;  %v333_v6 = vrot.slane %v2788_v63, 1  ;;  %v2809_v14 = vld [vmem:[%s2626_s24 + $0xc8] sm:$0xff]  ;;  %v336_v16 = vrot.slane %v2803_v9, 1  ;;  %v2825_v23 = vld [vmem:[%s2626_s24 + $0xe0] sm:$0xff] }
  0x22   : > { %484 = vrot.lane.b32.xlu0 %v2680_v25, %s2558_s25  ;;  %5457 = vst [vmem:[#allocation11_spill] sm:$0xff] %v2776_v57  ;;  %v2800_v8 = vsel %vm289_vm0, %v326_v61, %v327_v58  ;;  %5460 = vst [vmem:[#allocation14_spill] sm:$0xff] %v2809_v14  ;;  %v338_v17 = vrot.slane %v2806_v12, 1  ;;  %v2821_v18 = vsel %vm289_vm0, %v329_v59, %v331_v4  ;;  %v335_v19 = vrot.slane %v2809_v14, 1  ;;  %v2828_v24 = vld [vmem:[%s2626_s24 + $0xe8] sm:$0x3] }
  0x23   : > { %5459 = vst [vmem:[#allocation13_spill] sm:$0xff] %v2800_v8  ;;  %v2816_v15 = vsel %vm289_vm0, %v331_v4, %v333_v6  ;;  %v340_v31 = vrot.slane %v2825_v23, 1  ;;  %v342_v33 = vrot.slane %v2828_v24, 1  ;;  %v2843_v38 = vld [vmem:[%s2626_s24 + $0xf8] sm:$0xff]  ;;  %v2846_v44 = vld [vmem:[%s2626_s24 + $0x100] sm:$0xff]  ;;  %v2849_v45 = vld [vmem:[%s2626_s24 + $0xf0] sm:$0xff] }
  0x24   : > { %v2835_v30 = vsel %vm289_vm0, %v336_v16, %v338_v17  ;;  %v2840_v37 = vsel %vm289_vm0, %v335_v19, %v336_v16  ;;  %5463 = vst [vmem:[#allocation17_spill] sm:$0xff] %v2849_v45  ;;  %v345_v51 = vrot.slane %v2843_v38, 1  ;;  %v347_v52 = vrot.slane %v2846_v44, 1  ;;  %v2865_v61 = vld [vmem:[%s2626_s24 + $0x108] sm:$0xff]  ;;  %v2868_v4 = vld [vmem:[%s2626_s24 + $0x110] sm:$0x3] }
  0x25   : > { %490 = vrot.lane.b32.xlu1 %v2696_v29, %s2558_s25  ;;  %5461 = vst [vmem:[#allocation15_spill] sm:$0xff] %v2835_v30  ;;  %5462 = vst [vmem:[#allocation16_spill] sm:$0xff] %v2840_v37  ;;  %v2856_v47 = vsel %vm289_vm0, %v340_v31, %v342_v33  ;;  %v2861_v58 = vsel %vm289_vm0, %v338_v17, %v340_v31  ;;  %v344_v59 = vrot.slane %v2849_v45, 1  ;;  %v349_v16 = vrot.slane %v2865_v61, 1  ;;  %v2883_v31 = vld [vmem:[%s2626_s24 + $0x120] sm:$0xff]  ;;  %v2886_v33 = vld [vmem:[%s2626_s24 + $0x128] sm:$0xff] }
  0x26   : > { %488 = vrot.lane.b32.xlu0 %v2701_v32, %s2558_s25  ;;  %5464 = vst [vmem:[#allocation18_spill] sm:$0xff] %v2856_v47  ;;  %5465 = vst [vmem:[#allocation19_spill] sm:$0xff] %v2861_v58  ;;  %v2875_v6 = vsel %vm289_vm0, %v345_v51, %v347_v52  ;;  %v351_v17 = vrot.slane %v2868_v4, 1  ;;  %v2889_v25 = vld [vmem:[%s2626_s24 + $0x118] sm:$0xff] }
  0x27   : > { %5466 = vst [vmem:[#allocation20_spill] sm:$0xff] %v2875_v6  ;;  %v2880_v19 = vsel %vm289_vm0, %v344_v59, %v345_v51  ;;  %5468 = vst [vmem:[#allocation22_spill] sm:$0xff] %v2889_v25  ;;  %v354_v51 = vrot.slane %v2883_v31, 1  ;;  %v356_v59 = vrot.slane %v2886_v33, 1  ;;  %v2901_v32 = vsel %vm289_vm0, %v347_v52, %v349_v16 }
  0x28   : > { %5467 = vst [vmem:[#allocation21_spill] sm:$0xff] %v2880_v19  ;;  %v2896_v22 = vsel %vm289_vm0, %v349_v16, %v351_v17  ;;  %5469 = vst [vmem:[#allocation23_spill] sm:$0xff] %v2901_v32  ;;  %v353_v29 = vrot.slane %v2889_v25, 1 }
  0x29   : > { %494 = vrot.lane.b32.xlu1 %v2715_v36, %s2558_s25  ;;  %v2915_v17 = vsel %vm289_vm0, %v354_v51, %v356_v59 }
  0x2a   : > { %492 = vrot.lane.b32.xlu0 %v2720_v39, %s2558_s25  ;;  %5470 = vst [vmem:[#allocation24_spill] sm:$0xff] %v2915_v17  ;;  %v2926_v39 = vld [vmem:[%s2626_s24 + $0x150] sm:$0xff] }
  0x2d   : > { %498 = vrot.lane.b32.xlu1 %v2736_v43, %s2558_s25 }
  0x2e   : > { %496 = vrot.lane.b32.xlu0 %v2741_v46, %s2558_s25 }
  0x31   : > { %502 = vrot.lane.b32.xlu1 %v2755_v50, %s2558_s25  ;;  %v2929_v50 = vld [vmem:[%s2626_s24 + $0x140] sm:$0xff] }
  0x32   : > { %500 = vrot.lane.b32.xlu0 %v2760_v53, %s2558_s25  ;;  %v2905_v53 = vld [vmem:[%s2626_s24 + $0x130] sm:$0xff]  ;;  %5473 = vst [vmem:[#allocation27_spill] sm:$0xff] %v2929_v50  ;;  %v362_v36 = vrot.slane %v2929_v50, 1  ;;  %v373_v50 = vrot.slane %v2640_v5, 2  ;;  %v379_v5 = vrot.slane %v2644_v7, 2  ;;  %v386_v7 = vrot.slane %v2667_v20, 2 }
  0x33   : > { %v358_v52 = vrot.slane %v2905_v53, 1 }
  0x35   : > { %506 = vrot.lane.b32.xlu1 %v2776_v57, %s2558_s25 }
  0x36   : > { %504 = vrot.lane.b32.xlu0 %v2781_v60, %s2558_s25  ;;  %v2948_v60 = vld [vmem:[%s2626_s24 + $0x160] sm:$0x3] }
  0x39   : > { %510 = vrot.lane.b32.xlu1 %v2795_v3, %s2558_s25 }
  0x3a   : > { %508 = vrot.lane.b32.xlu0 %v2800_v8, %s2558_s25 }
  0x3d   : > { %514 = vrot.lane.b32.xlu1 %v2816_v15, %s2558_s25 }
  0x3e   : > { %512 = vrot.lane.b32.xlu0 %v2821_v18, %s2558_s25 }
  0x41   : > { %518 = vrot.lane.b32.xlu1 %v2835_v30, %s2558_s25 }
  0x42   : > { %516 = vrot.lane.b32.xlu0 %v2840_v37, %s2558_s25  ;;  %v2908_v37 = vld [vmem:[%s2626_s24 + $0x138] sm:$0x3] }
  0x43   : > { %v360_v16 = vrot.slane %v2908_v37, 1 }
  0x45   : > { %522 = vrot.lane.b32.xlu1 %v2856_v47, %s2558_s25  ;;  %v2936_v8 = vsel %vm289_vm0, %v358_v52, %v360_v16 }
  0x46   : > { %520 = vrot.lane.b32.xlu0 %v2861_v58, %s2558_s25  ;;  %5474 = vst [vmem:[#allocation28_spill] sm:$0xff] %v2936_v8 }
  0x49   : > { %526 = vrot.lane.b32.xlu1 %v2875_v6, %s2558_s25  ;;  %v2923_v6 = vld [vmem:[%s2626_s24 + $0x148] sm:$0xff] }
  0x4a   : > { %524 = vrot.lane.b32.xlu0 %v2880_v19, %s2558_s25  ;;  %v2920_v19 = vsel %vm289_vm0, %v353_v29, %v354_v51  ;;  %5472 = vst [vmem:[#allocation26_spill] sm:$0xff] %v2923_v6  ;;  %v363_v30 = vrot.slane %v2923_v6, 1  ;;  %v365_v29 = vrot.slane %v2926_v39, 1  ;;  %v2941_v51 = vsel %vm289_vm0, %v356_v59, %v358_v52 }
  0x4b   : > { %5471 = vst [vmem:[#allocation25_spill] sm:$0xff] %v2920_v19  ;;  %5475 = vst [vmem:[#allocation29_spill] sm:$0xff] %v2941_v51  ;;  %v369_v59 = vrot.slane %v2948_v60, 1 }
  0x4c   : > { %v2955_v16 = vsel %vm289_vm0, %v363_v30, %v365_v29  ;;  %v2960_v52 = vsel %vm289_vm0, %v362_v36, %v363_v30  ;;  %v372_v36 = vrot.slane %v2635_v2, 2 }
  0x4d   : > { %530 = vrot.lane.b32.xlu1 %v2896_v22, %s2558_s25  ;;  %5476 = vst [vmem:[#allocation30_spill] sm:$0xff] %v2955_v16  ;;  %5477 = vst [vmem:[#allocation31_spill] sm:$0xff] %v2960_v52 }
  0x4e   : > { %528 = vrot.lane.b32.xlu0 %v2901_v32, %s2558_s25  ;;  %v2945_v32 = vld [vmem:[%s2626_s24 + $0x158] sm:$0xff] }
  0x51   : > { %534 = vrot.lane.b32.xlu1 %v2915_v17, %s2558_s25 }
  0x52   : > { %532 = vrot.lane.b32.xlu0 %v2920_v19, %s2558_s25  ;;  %v367_v19 = vrot.slane %v2945_v32, 1 }
  0x54   : > { %v2967_v17 = vsel %vm289_vm0, %v367_v19, %v369_v59  ;;  %v2972_v6 = vsel %vm289_vm0, %v365_v29, %v367_v19  ;;  %v377_v59 = vrot.slane %v2632_v1, 2  ;;  %v382_v19 = vrot.slane %v2649_v10, 2 }
  0x55   : > { %538 = vrot.lane.b32.xlu1 %v2936_v8, %s2558_s25  ;;  %v384_v29 = vrot.slane %v2652_v11, 2  ;;  %v391_v11 = vrot.slane %v2683_v26, 2 }
  0x56   : > { %536 = vrot.lane.b32.xlu0 %v2941_v51, %s2558_s25  ;;  %v375_v51 = vrot.slane %v2629_v0, 2  ;;  %v374_v0 = vsel %vm371_vm1, %v372_v36, %v373_v50  ;;  %v380_v2 = vsel %vm371_vm1, %v377_v59, %v379_v5  ;;  %v400_v5 = vrot.slane %v2723_v40, 2 }
  0x57   : > { %v2993_v1 = vsel %vm371_vm1, %v382_v19, %v384_v29  ;;  %v3010_v20 = vsel %vm371_vm1, %v384_v29, %v386_v7  ;;  %v404_v29 = vrot.slane %v2745_v48, 2 }
  0x58   : > { %v376_v30 = vsel %vm371_vm1, %v373_v50, %v375_v51  ;;  %5478 = vst [vmem:[#allocation32_spill] sm:$0xff] %v2993_v1  ;;  %v388_v50 = vrot.slane %v2670_v21, 2  ;;  %5481 = vst [vmem:[#allocation35_spill] sm:$0xff] %v3010_v20  ;;  %v390_v21 = vrot.slane %v2689_v28, 2 }
  0x59   : > { %542 = vrot.lane.b32.xlu1 %v2955_v16, %s2558_s25  ;;  %v381_v16 = vrot.slane %v2656_v13, 2  ;;  %v393_v13 = vrot.slane %v2686_v27, 2 }
  0x5a   : > { %540 = vrot.lane.b32.xlu0 %v2960_v52, %s2558_s25  ;;  %v378_v52 = vsel %vm371_vm1, %v375_v51, %v377_v59  ;;  %v3005_v10 = vsel %vm371_vm1, %v386_v7, %v388_v50  ;;  %v406_v7 = vrot.slane %v2748_v49, 2  ;;  %v408_v49 = vrot.slane %v2769_v56, 2 }
  0x5b   : > { %v2998_v36 = vsel %vm371_vm1, %v381_v16, %v382_v19  ;;  %5480 = vst [vmem:[#allocation34_spill] sm:$0xff] %v3005_v10  ;;  %v3018_v51 = vsel %vm371_vm1, %v391_v11, %v393_v13  ;;  %v395_v16 = vrot.slane %v2705_v34, 2 }
  0x5c   : > { %5479 = vst [vmem:[#allocation33_spill] sm:$0xff] %v2998_v36  ;;  %5482 = vst [vmem:[#allocation36_spill] sm:$0xff] %v3018_v51 }
  0x5d   : > { %546 = vrot.lane.b32.xlu1 %v2967_v17, %s2558_s25 }
  0x5e   : > { %544 = vrot.lane.b32.xlu0 %v2972_v6, %s2558_s25 }
  0x61   : > { %586 = vrot.lane.b32.xlu1 %v376_v30, %s2559_s26  ;;  %v3023_v30 = vsel %vm371_vm1, %v390_v21, %v391_v11  ;;  %v3055_v11 = vsel %vm371_vm1, %v404_v29, %v406_v7  ;;  %v411_v21 = vrot.slane %v2766_v55, 2 }
  0x62   : > { %584 = vrot.lane.b32.xlu0 %v374_v0, %s2559_s26  ;;  %5483 = vst [vmem:[#allocation37_spill] sm:$0xff] %v3023_v30  ;;  %v402_v0 = vrot.slane %v2726_v41, 2  ;;  %5486 = vst [vmem:[#allocation40_spill] sm:$0xff] %v3055_v11 }
  0x64   : > { %v3043_v19 = vsel %vm371_vm1, %v400_v5, %v402_v0 }
  0x65   : > { %590 = vrot.lane.b32.xlu1 %v380_v2, %s2559_s26  ;;  %v3035_v2 = vsel %vm371_vm1, %v393_v13, %v395_v16  ;;  %5484 = vst [vmem:[#allocation38_spill] sm:$0xff] %v3043_v19  ;;  %v409_v13 = vrot.slane %v2763_v54, 2 }
  0x66   : > { %588 = vrot.lane.b32.xlu0 %v378_v52, %s2559_s26  ;;  %v397_v52 = vrot.slane %v2708_v35, 2  ;;  %v399_v35 = vrot.slane %v2729_v42, 2 }
  0x67   : > { %v3073_v7 = vsel %vm371_vm1, %v408_v49, %v409_v13  ;;  %v422_v49 = vrot.slane %v2825_v23, 2 }
  0x68   : > { %v3030_v59 = vsel %vm371_vm1, %v395_v16, %v397_v52  ;;  %v3048_v50 = vsel %vm371_vm1, %v399_v35, %v400_v5  ;;  %v3060_v16 = vsel %vm371_vm1, %v402_v0, %v404_v29  ;;  %v3068_v52 = vsel %vm371_vm1, %v409_v13, %v411_v21  ;;  %5489 = vst [vmem:[#allocation43_spill] sm:$0xff] %v3073_v7 }
  0x69   : > { %594 = vrot.lane.b32.xlu1 %v2993_v1, %s2559_s26  ;;  %5485 = vst [vmem:[#allocation39_spill] sm:$0xff] %v3048_v50  ;;  %5487 = vst [vmem:[#allocation41_spill] sm:$0xff] %v3060_v16  ;;  %v413_v5 = vrot.slane %v2785_v62, 2  ;;  %v415_v35 = vrot.slane %v2788_v63, 2  ;;  %v418_v29 = vrot.slane %v2803_v9, 2  ;;  %v417_v63 = vrot.slane %v2809_v14, 2 }
  0x6a   : > { %592 = vrot.lane.b32.xlu0 %v2998_v36, %s2559_s26  ;;  %5488 = vst [vmem:[#allocation42_spill] sm:$0xff] %v3068_v52  ;;  %v420_v36 = vrot.slane %v2806_v12, 2 }
  0x6b   : > { %v3080_v0 = vsel %vm371_vm1, %v413_v5, %v415_v35  ;;  %v3085_v1 = vsel %vm371_vm1, %v411_v21, %v413_v5  ;;  %v424_v35 = vrot.slane %v2828_v24, 2  ;;  %v427_v5 = vrot.slane %v2843_v38, 2 }
  0x6c   : > { %v3093_v13 = vsel %vm371_vm1, %v418_v29, %v420_v36  ;;  %v3112_v24 = vsel %vm371_vm1, %v420_v36, %v422_v49 }
  0x6d   : > { %598 = vrot.lane.b32.xlu1 %v3005_v10, %s2559_s26  ;;  %5490 = vst [vmem:[#allocation44_spill] sm:$0xff] %v3093_v13  ;;  %v3105_v21 = vsel %vm371_vm1, %v422_v49, %v424_v35  ;;  %v429_v10 = vrot.slane %v2846_v44, 2  ;;  %5494 = vst [vmem:[#allocation48_spill] sm:$0xff] %v3112_v24 }
  0x6e   : > { %596 = vrot.lane.b32.xlu0 %v3010_v20, %s2559_s26  ;;  %v3098_v20 = vsel %vm371_vm1, %v417_v63, %v418_v29  ;;  %5492 = vst [vmem:[#allocation46_spill] sm:$0xff] %v3105_v21  ;;  %v426_v29 = vrot.slane %v2849_v45, 2  ;;  %v436_v45 = vrot.slane %v2883_v31, 2 }
  0x6f   : > { %5491 = vst [vmem:[#allocation45_spill] sm:$0xff] %v3098_v20  ;;  %v3122_v35 = vsel %vm371_vm1, %v427_v5, %v429_v10 }
  0x70   : > { %5496 = vst [vmem:[#allocation50_spill] sm:$0xff] %v3122_v35  ;;  %v3129_v36 = vsel %vm371_vm1, %v426_v29, %v427_v5  ;;  %v435_v29 = vrot.slane %v2889_v25, 2 }
  0x71   : > { %602 = vrot.lane.b32.xlu1 %v3018_v51, %s2559_s26  ;;  %5498 = vst [vmem:[#allocation52_spill] sm:$0xff] %v3129_v36 }
  0x72   : > { %600 = vrot.lane.b32.xlu0 %v3023_v30, %s2559_s26 }
  0x75   : > { %606 = vrot.lane.b32.xlu1 %v3030_v59, %s2559_s26 }
  0x76   : > { %604 = vrot.lane.b32.xlu0 %v3035_v2, %s2559_s26 }
  0x79   : > { %610 = vrot.lane.b32.xlu1 %v3043_v19, %s2559_s26 }
  0x7a   : > { %608 = vrot.lane.b32.xlu0 %v3048_v50, %s2559_s26 }
  0x7d   : > { %614 = vrot.lane.b32.xlu1 %v3055_v11, %s2559_s26 }
  0x7e   : > { %612 = vrot.lane.b32.xlu0 %v3060_v16, %s2559_s26 }
  0x81   : > { %618 = vrot.lane.b32.xlu1 %v3068_v52, %s2559_s26 }
  0x82   : > { %616 = vrot.lane.b32.xlu0 %v3073_v7, %s2559_s26 }
  0x85   : > { %622 = vrot.lane.b32.xlu1 %v3080_v0, %s2559_s26 }
  0x86   : > { %620 = vrot.lane.b32.xlu0 %v3085_v1, %s2559_s26 }
  0x89   : > { %626 = vrot.lane.b32.xlu1 %v3093_v13, %s2559_s26 }
  0x8a   : > { %624 = vrot.lane.b32.xlu0 %v3098_v20, %s2559_s26  ;;  %v431_v20 = vrot.slane %v2865_v61, 2 }
  0x8b   : > { %v3109_v50 = vpop.permute.xlu1 %480 }
  0x8c   : > { %5493 = vst [vmem:[#allocation47_spill] sm:$0xff] %v3109_v50  ;;  %v3115_v63 = vpop.permute.xlu0 %476  ;;  %v433_v50 = vrot.slane %v2868_v4, 2  ;;  %v438_v4 = vrot.slane %v2886_v33, 2  ;;  %v3145_v5 = vsel %vm371_vm1, %v429_v10, %v431_v20  ;;  %v3162_v10 = vsel %vm371_vm1, %v435_v29, %v436_v45 }
  0x8d   : > { %5495 = vst [vmem:[#allocation49_spill] sm:$0xff] %v3115_v63  ;;  %630 = vrot.lane.b32.xlu1 %v3105_v21, %s2559_s26  ;;  %5501 = vst [vmem:[#allocation55_spill] sm:$0xff] %v3145_v5 }
  0x8e   : > { %628 = vrot.lane.b32.xlu0 %v3112_v24, %s2559_s26  ;;  %v3138_v63 = vsel %vm371_vm1, %v431_v20, %v433_v50  ;;  %v3155_v50 = vsel %vm371_vm1, %v436_v45, %v438_v4  ;;  %5505 = vst [vmem:[#allocation59_spill] sm:$0xff] %v3162_v10 }
  0x8f   : > { %v3126_v42 = vpop.permute.xlu1 %482  ;;  %5503 = vst [vmem:[#allocation57_spill] sm:$0xff] %v3155_v50 }
  0x90   : > { %5497 = vst [vmem:[#allocation51_spill] sm:$0xff] %v3126_v42  ;;  %v3131_v49 = vpop.permute.xlu0 %478  ;;  %v440_v42 = vrot.slane %v2905_v53, 2 }
  0x91   : > { %5499 = vst [vmem:[#allocation53_spill] sm:$0xff] %v3131_v49  ;;  %634 = vrot.lane.b32.xlu1 %v3122_v35, %s2559_s26 }
  0x92   : > { %632 = vrot.lane.b32.xlu0 %v3129_v36, %s2559_s26 }
  0x93   : > { %v3142_v14 = vpop.permute.xlu1 %486 }
  0x94   : > { %5500 = vst [vmem:[#allocation54_spill] sm:$0xff] %v3142_v14  ;;  %v3148_v49 = vpop.permute.xlu0 %484  ;;  %v442_v14 = vrot.slane %v2908_v37, 2  ;;  %v3176_v37 = vsel %vm371_vm1, %v438_v4, %v440_v42 }
  0x95   : > { %5502 = vst [vmem:[#allocation56_spill] sm:$0xff] %v3148_v49  ;;  %638 = vrot.lane.b32.xlu1 %v3138_v63, %s2559_s26  ;;  %5509 = vst [vmem:[#allocation63_spill] sm:$0xff] %v3176_v37 }
  0x96   : > { %636 = vrot.lane.b32.xlu0 %v3145_v5, %s2559_s26  ;;  %v3171_v49 = vsel %vm371_vm1, %v440_v42, %v442_v14  ;;  %v449_v42 = vrot.slane %v2945_v32, 2  ;;  %v451_v14 = vrot.slane %v2948_v60, 2 }
  0x97   : > { %v3159_v36 = vpop.permute.xlu1 %490  ;;  %5507 = vst [vmem:[#allocation61_spill] sm:$0xff] %v3171_v49 }
  0x98   : > { %5504 = vst [vmem:[#allocation58_spill] sm:$0xff] %v3159_v36  ;;  %v3164_v20 = vpop.permute.xlu0 %488 }
  0x99   : > { %5506 = vst [vmem:[#allocation60_spill] sm:$0xff] %v3164_v20  ;;  %642 = vrot.lane.b32.xlu1 %v3155_v50, %s2559_s26 }
  0x9a   : > { %640 = vrot.lane.b32.xlu0 %v3162_v10, %s2559_s26 }
  0x9b   : > { %v3173_v25 = vpop.permute.xlu1 %494 }
  0x9c   : > { %5508 = vst [vmem:[#allocation62_spill] sm:$0xff] %v3173_v25  ;;  %v3178_v36 = vpop.permute.xlu0 %492 }
  0x9d   : > { %5510 = vst [vmem:[#allocation64_spill] sm:$0xff] %v3178_v36  ;;  %646 = vrot.lane.b32.xlu1 %v3171_v49, %s2559_s26  ;;  %v3203_v36 = vsel %vm371_vm1, %v449_v42, %v451_v14 }
  0x9e   : > { %644 = vrot.lane.b32.xlu0 %v3176_v37, %s2559_s26 }
  0x9f   : > { %v3184_v45 = vpop.permute.xlu1 %498 }
  0xa0   : > { %v3186_v29 = vpop.permute.xlu0 %496 }
  0xa1   : > { %706 = vrot.lane.b32.xlu1 %v2705_v34, %s2560_s27 }
  0xa2   : > { %722 = vrot.lane.b32.xlu0 %v2785_v62, %s2560_s27 }
  0xa3   : > { %v3194_v4 = vpop.permute.xlu1 %502 }
  0xa4   : > { %5511 = vst [vmem:[#allocation65_spill] sm:$0xff] %v3194_v4  ;;  %v3196_v20 = vpop.permute.xlu0 %500 }
  0xa5   : > { %5512 = vst [vmem:[#allocation66_spill] sm:$0xff] %v3196_v20  ;;  %802 = vrot.lane.b32.xlu1 %v2736_v43, %s2561_s28 }
  0xa6   : > { %818 = vrot.lane.b32.xlu0 %v2816_v15, %s2561_s28 }
  0xa7   : > { %v3205_v25 = vpop.permute.xlu1 %506 }
  0xa8   : > { %5513 = vst [vmem:[#allocation67_spill] sm:$0xff] %v3205_v25  ;;  %v3207_v10 = vpop.permute.xlu0 %504 }
  0xa9   : > { %5514 = vst [vmem:[#allocation68_spill] sm:$0xff] %v3207_v10  ;;  %654 = vrot.lane.b32.xlu1 %v3203_v36, %s2559_s26 }
  0xaa   : > { %914 = vrot.lane.b32.xlu0 %v3080_v0, %s2562_s29 }
  0xab   : > { %v3213_v60 = vpop.permute.xlu1 %510 }
  0xac   : > { %v3215_v20 = vpop.permute.xlu0 %508 }
  0xad   : > { %5515 = vst [vmem:[#allocation69_spill] sm:$0xff] %v3215_v20  ;;  %1018 = vrot.lane.b32.xlu1 %v2825_v23, %s2563_s30 }
  0xae   : > { %898 = vrot.lane.b32.xlu0 %v3030_v59, %s2562_s29 }
  0xaf   : > { %v3221_v14 = vpop.permute.xlu1 %514 }
  0xb0   : > { %v3223_v4 = vpop.permute.xlu0 %512 }
  0xb1   : > { %754 = vrot.lane.b32.xlu1 %v2945_v32, %s2560_s27 }
  0xb2   : > { %720 = vrot.lane.b32.xlu0 %v2766_v55, %s2560_s27 }
  0xb3   : > { %v3229_v10 = vpop.permute.xlu1 %518 }
  0xb4   : > { %5516 = vst [vmem:[#allocation70_spill] sm:$0xff] %v3229_v10  ;;  %v3231_v25 = vpop.permute.xlu0 %516 }
  0xb5   : > { %5517 = vst [vmem:[#allocation71_spill] sm:$0xff] %v3231_v25  ;;  %1126 = vrot.lane.b32.xlu1 %v2856_v47, %s2564_s4  ;;  %v5334_v47 = vrot.slane %v2926_v39, 2 }
  0xb6   : > { %1002 = vrot.lane.b32.xlu0 %v2745_v48, %s2563_s30 }
  0xb7   : > { %v3237_v23 = vpop.permute.xlu1 %522 }
  0xb8   : > { %5518 = vst [vmem:[#allocation72_spill] sm:$0xff] %v3237_v23  ;;  %v3239_v20 = vpop.permute.xlu0 %520 }
  0xb9   : > { %5519 = vst [vmem:[#allocation73_spill] sm:$0xff] %v3239_v20  ;;  %738 = vrot.lane.b32.xlu1 %v2865_v61, %s2560_s27 }
  0xba   : > { %704 = vrot.lane.b32.xlu0 %v2686_v27, %s2560_s27 }
  0xbb   : > { %v3245_v10 = vpop.permute.xlu1 %526 }
  0xbc   : > { %5520 = vst [vmem:[#allocation74_spill] sm:$0xff] %v3245_v10  ;;  %v3247_v25 = vpop.permute.xlu0 %524 }
  0xbd   : > { %5521 = vst [vmem:[#allocation75_spill] sm:$0xff] %v3247_v25  ;;  %850 = vrot.lane.b32.xlu1 %v2967_v17, %s2561_s28 }
  0xbe   : > { %816 = vrot.lane.b32.xlu0 %v2821_v18, %s2561_s28 }
  0xbf   : > { %v3253_v48 = vpop.permute.xlu1 %530 }
  0xc0   : > { %v3255_v23 = vpop.permute.xlu0 %528 }
  0xc1   : > { %5522 = vst [vmem:[#allocation76_spill] sm:$0xff] %v3255_v23  ;;  %1234 = vrot.lane.b32.xlu1 %v3105_v21, %s2565_s5 }
  0xc2   : > { %1110 = vrot.lane.b32.xlu0 %v2776_v57, %s2564_s4 }
  0xc3   : > { %v3261_v27 = vpop.permute.xlu1 %534 }
  0xc4   : > { %5523 = vst [vmem:[#allocation77_spill] sm:$0xff] %v3261_v27  ;;  %v3263_v20 = vpop.permute.xlu0 %532 }
  0xc5   : > { %5524 = vst [vmem:[#allocation78_spill] sm:$0xff] %v3263_v20  ;;  %834 = vrot.lane.b32.xlu1 %v2896_v22, %s2561_s28  ;;  %v3281_v20 = vsel %vm371_vm1, %v5334_v47, %v449_v42  ;;  %v3300_v42 = vld [vmem:[%s2626_s24 + $0x180] sm:$0xff] }
  0xc6   : > { %800 = vrot.lane.b32.xlu0 %v2741_v46, %s2561_s28  ;;  %5527 = vst [vmem:[#allocation81_spill] sm:$0xff] %v3281_v20  ;;  %v5337_v23 = vrot.slane %v3300_v42, 1 }
  0xc7   : > { %v3270_v25 = vpop.permute.xlu1 %538 }
  0xc8   : > { %5525 = vst [vmem:[#allocation79_spill] sm:$0xff] %v3270_v25  ;;  %v3272_v10 = vpop.permute.xlu0 %536 }
  0xc9   : > { %5526 = vst [vmem:[#allocation80_spill] sm:$0xff] %v3272_v10  ;;  %946 = vrot.lane.b32.xlu1 %v3203_v36, %s2562_s29 }
  0xca   : > { %912 = vrot.lane.b32.xlu0 %v3085_v1, %s2562_s29 }
  0xcb   : > { %v3283_v27 = vpop.permute.xlu1 %542 }
  0xcc   : > { %5528 = vst [vmem:[#allocation82_spill] sm:$0xff] %v3283_v27  ;;  %v3285_v21 = vpop.permute.xlu0 %540  ;;  %v243_v27 = vld [vmem:[%s2626_s24 + $0x188] sm:$0x3] }
  0xcd   : > { %5529 = vst [vmem:[#allocation83_spill] sm:$0xff] %v3285_v21  ;;  %652 = vrot.lane.b32.xlu1 %v3281_v20, %s2559_s26 }
  0xce   : > { %1218 = vrot.lane.b32.xlu0 %v3055_v11, %s2565_s5 }
  0xcf   : > { %v3291_v10 = vpop.permute.xlu1 %546 }
  0xd0   : > { %v3293_v25 = vpop.permute.xlu0 %544 }
  0xd1   : > { %5530 = vst [vmem:[#allocation84_spill] sm:$0xff] %v3293_v25  ;;  %930 = vrot.lane.b32.xlu1 %v3138_v63, %s2562_s29 }
  0xd2   : > { %896 = vrot.lane.b32.xlu0 %v3035_v2, %s2562_s29 }
  0xd3   : > { %v3302_v47 = vpop.permute.xlu1 %586 }
  0xd4   : > { %5531 = vst [vmem:[#allocation85_spill] sm:$0xff] %v3302_v47  ;;  %v3304_v21 = vpop.permute.xlu0 %584 }
  0xd5   : > { %5532 = vst [vmem:[#allocation86_spill] sm:$0xff] %v3304_v21  ;;  %1050 = vrot.lane.b32.xlu1 %v3300_v42, %s2563_s30  ;;  %v465_v21 = vrot.slane %v243_v27, 1 }
  0xd6   : > { %1016 = vrot.lane.b32.xlu0 %v2806_v12, %s2563_s30 }
  0xd7   : > { %v3310_v11 = vpop.permute.xlu1 %590  ;;  %v466_v12 = vsel %vm289_vm0, %v5337_v23, %v465_v21  ;;  %v5339_v21 = vrot.slane %v3300_v42, 2 }
  0xd8   : > { %5533 = vst [vmem:[#allocation87_spill] sm:$0xff] %v3310_v11  ;;  %v3313_v57 = vpop.permute.xlu0 %588 }
  0xd9   : > { %5534 = vst [vmem:[#allocation88_spill] sm:$0xff] %v3313_v57  ;;  %752 = vrot.lane.b32.xlu1 %v2926_v39, %s2560_s27 }
  0xda   : > { %718 = vrot.lane.b32.xlu0 %v2763_v54, %s2560_s27 }
  0xdb   : > { %v3320_v47 = vpop.permute.xlu1 %594 }
  0xdc   : > { %5535 = vst [vmem:[#allocation89_spill] sm:$0xff] %v3320_v47  ;;  %v3322_v25 = vpop.permute.xlu0 %592 }
  0xdd   : > { %5536 = vst [vmem:[#allocation90_spill] sm:$0xff] %v3322_v25  ;;  %1034 = vrot.lane.b32.xlu1 %v2905_v53, %s2563_s30 }
  0xde   : > { %1000 = vrot.lane.b32.xlu0 %v2726_v41, %s2563_s30 }
  0xdf   : > { %v3331_v57 = vpop.permute.xlu1 %598 }
  0xe0   : > { %5537 = vst [vmem:[#allocation91_spill] sm:$0xff] %v3331_v57  ;;  %v3333_v11 = vpop.permute.xlu0 %596  ;;  %v5548_v57 = vld [vmem:[#allocation6_spill] sm:$0xff] }
  0xe1   : > { %5538 = vst [vmem:[#allocation92_spill] sm:$0xff] %v3333_v11  ;;  %1158 = vrot.lane.b32.xlu1 %v466_v12, %s2564_s4  ;;  %v474_v12 = vrot.slane %v243_v27, 2 }
  0xe2   : > { %1124 = vrot.lane.b32.xlu0 %v2861_v58, %s2564_s4 }
  0xe3   : > { %v3338_v54 = vpop.permute.xlu1 %602 }
  0xe4   : > { %5539 = vst [vmem:[#allocation93_spill] sm:$0xff] %v3338_v54  ;;  %v3340_v25 = vpop.permute.xlu0 %600 }
  0xe5   : > { %5540 = vst [vmem:[#allocation94_spill] sm:$0xff] %v3340_v25  ;;  %736 = vrot.lane.b32.xlu1 %v2846_v44, %s2560_s27  ;;  %v475_v44 = vsel %vm371_vm1, %v5339_v21, %v474_v12 }
  0xe6   : > { %702 = vrot.lane.b32.xlu0 %v2683_v26, %s2560_s27  ;;  %v5543_v26 = vld [vmem:[#allocation12_spill] sm:$0xff] }
  0xe7   : > { %v3346_v41 = vpop.permute.xlu1 %606 }
  0xe8   : > { %v3348_v53 = vpop.permute.xlu0 %604 }
  0xe9   : > { %848 = vrot.lane.b32.xlu1 %v2972_v6, %s2561_s28 }
  0xea   : > { %814 = vrot.lane.b32.xlu0 %v2795_v3, %s2561_s28 }
  0xeb   : > { %v3355_v23 = vpop.permute.xlu1 %610 }
  0xec   : > { %5541 = vst [vmem:[#allocation95_spill] sm:$0xff] %v3355_v23  ;;  %v3357_v47 = vpop.permute.xlu0 %608  ;;  %v5547_v23 = vld [vmem:[#allocation23_spill] sm:$0xff] }
  0xed   : > { %5542 = vst [vmem:[#allocation96_spill] sm:$0xff] %v3357_v47  ;;  %1142 = vrot.lane.b32.xlu1 %v2936_v8, %s2564_s4 }
  0xee   : > { %1108 = vrot.lane.b32.xlu0 %v5543_v26, %s2564_s4  ;;  %v5553_v26 = vrot.slane %v2926_v39, 2 }
  0xef   : > { %v3366_v58 = vpop.permute.xlu1 %614 }
  0xf0   : > { %5544 = vst [vmem:[#allocation97_spill] sm:$0xff] %v3366_v58  ;;  %v3368_v11 = vpop.permute.xlu0 %612 }
  0xf1   : > { %5545 = vst [vmem:[#allocation98_spill] sm:$0xff] %v3368_v11  ;;  %1266 = vrot.lane.b32.xlu1 %v475_v44, %s2565_s5 }
  0xf2   : > { %1232 = vrot.lane.b32.xlu0 %v3112_v24, %s2565_s5  ;;  %v5550_v24 = vld [vmem:[#allocation26_spill] sm:$0xff] }
  0xf3   : > { %v3373_v27 = vpop.permute.xlu1 %618  ;;  %v5343_v11 = vrot.slane %v5550_v24, 2 }
  0xf4   : > { %v3375_v47 = vpop.permute.xlu0 %616 }
  0xf5   : > { %5546 = vst [vmem:[#allocation99_spill] sm:$0xff] %v3375_v47  ;;  %832 = vrot.lane.b32.xlu1 %v5547_v23, %s2561_s28  ;;  %v3405_v25 = vsel %vm371_vm1, %v5343_v11, %v5553_v26  ;;  %v3424_v11 = vld [vmem:[%s2626_s24 + $0x178] sm:$0xff] }
  0xf6   : > { %798 = vrot.lane.b32.xlu0 %v5548_v57, %s2561_s28  ;;  %5554 = vst [vmem:[#allocation101_spill] sm:$0xff] %v3405_v25 }
  0xf7   : > { %v3381_v12 = vpop.permute.xlu1 %622 }
  0xf8   : > { %v3383_v21 = vpop.permute.xlu0 %620 }
  0xf9   : > { %944 = vrot.lane.b32.xlu1 %v3281_v20, %s2562_s29 }
  0xfa   : > { %910 = vrot.lane.b32.xlu0 %v3068_v52, %s2562_s29  ;;  %v5577_v52 = vld [vmem:[#allocation7_spill] sm:$0xff] }
  0xfb   : > { %v3389_v44 = vpop.permute.xlu1 %626 }
  0xfc   : > { %5549 = vst [vmem:[#allocation23_spill] sm:$0xff] %v3389_v44  ;;  %v3392_v58 = vpop.permute.xlu0 %624 }
  0xfd   : > { %5551 = vst [vmem:[#allocation26_spill] sm:$0xff] %v3392_v58  ;;  %1250 = vrot.lane.b32.xlu1 %v3171_v49, %s2565_s5 }
  0xfe   : > { %1216 = vrot.lane.b32.xlu0 %v3060_v16, %s2565_s5 }
  0xff   : > { %v3398_v8 = vpop.permute.xlu1 %630 }
 0x100   : > { %5552 = vst [vmem:[#allocation100_spill] sm:$0xff] %v3398_v8  ;;  %v3407_v44 = vpop.permute.xlu0 %628 }
 0x101   : > { %5555 = vst [vmem:[#allocation102_spill] sm:$0xff] %v3407_v44  ;;  %894 = vrot.lane.b32.xlu1 %v3018_v51, %s2562_s29 }
 0x102   : > { %650 = vrot.lane.b32.xlu0 %v3405_v25, %s2559_s26 }
 0x103   : > { %v3413_v58 = vpop.permute.xlu1 %634 }
 0x104   : > { %5556 = vst [vmem:[#allocation103_spill] sm:$0xff] %v3413_v58  ;;  %v3415_v49 = vpop.permute.xlu0 %632 }
 0x105   : > { %5557 = vst [vmem:[#allocation104_spill] sm:$0xff] %v3415_v49  ;;  %1014 = vrot.lane.b32.xlu1 %v2803_v9, %s2563_s30  ;;  %v5345_v9 = vrot.slane %v3424_v11, 1 }
 0x106   : > { %928 = vrot.lane.b32.xlu0 %v3145_v5, %s2562_s29 }
 0x107   : > { %v3421_v26 = vpop.permute.xlu1 %638 }
 0x108   : > { %v3426_v44 = vpop.permute.xlu0 %636 }
 0x109   : > { %5558 = vst [vmem:[#allocation105_spill] sm:$0xff] %v3426_v44  ;;  %716 = vrot.lane.b32.xlu1 %v2769_v56, %s2560_s27  ;;  %v5563_v56 = vld [vmem:[#allocation15_spill] sm:$0xff]  ;;  %v5576_v44 = vrot.slane %v3300_v42, 2 }
 0x10a   : > { %1048 = vrot.lane.b32.xlu0 %v3424_v11, %s2563_s30 }
 0x10b   : > { %v3432_v8 = vpop.permute.xlu1 %642 }
 0x10c   : > { %5559 = vst [vmem:[#allocation106_spill] sm:$0xff] %v3432_v8  ;;  %v3434_v16 = vpop.permute.xlu0 %640 }
 0x10d   : > { %5560 = vst [vmem:[#allocation107_spill] sm:$0xff] %v3434_v16  ;;  %998 = vrot.lane.b32.xlu1 %v2723_v40, %s2563_s30  ;;  %v5565_v16 = vrot.slane %v3300_v42, 1  ;;  %v5580_v42 = vld [vmem:[#allocation20_spill] sm:$0xff] }
 0x10e   : > { %750 = vrot.lane.b32.xlu0 %v5550_v24, %s2560_s27 }
 0x10f   : > { %v3441_v49 = vpop.permute.xlu1 %646  ;;  %v464_v40 = vsel %vm289_vm0, %v5345_v9, %v5565_v16  ;;  %v5571_v9 = vld [vmem:[#allocation9_spill] sm:$0xff] }
 0x110   : > { %5561 = vst [vmem:[#allocation108_spill] sm:$0xff] %v3441_v49  ;;  %v3443_v58 = vpop.permute.xlu0 %644 }
 0x111   : > { %5562 = vst [vmem:[#allocation109_spill] sm:$0xff] %v3443_v58  ;;  %1122 = vrot.lane.b32.xlu1 %v5563_v56, %s2564_s4 }
 0x112   : > { %1032 = vrot.lane.b32.xlu0 %v2886_v33, %s2563_s30  ;;  %v5569_v33 = vld [vmem:[#allocation13_spill] sm:$0xff] }
 0x113   : > { %v3449_v8 = vpop.permute.xlu1 %706 }
 0x114   : > { %5564 = vst [vmem:[#allocation110_spill] sm:$0xff] %v3449_v8  ;;  %v3456_v47 = vpop.permute.xlu0 %722 }
 0x115   : > { %5566 = vst [vmem:[#allocation111_spill] sm:$0xff] %v3456_v47  ;;  %700 = vrot.lane.b32.xlu1 %v2689_v28, %s2560_s27  ;;  %v5572_v28 = vld [vmem:[#allocation30_spill] sm:$0xff] }
 0x116   : > { %1156 = vrot.lane.b32.xlu0 %v464_v40, %s2564_s4  ;;  %v5351_v40 = vrot.slane %v3424_v11, 2 }
 0x117   : > { %v3461_v58 = vpop.permute.xlu1 %802 }
 0x118   : > { %5567 = vst [vmem:[#allocation112_spill] sm:$0xff] %v3461_v58  ;;  %v3463_v56 = vpop.permute.xlu0 %818 }
 0x119   : > { %5568 = vst [vmem:[#allocation113_spill] sm:$0xff] %v3463_v56  ;;  %812 = vrot.lane.b32.xlu1 %v5569_v33, %s2561_s28 }
 0x11a   : > { %734 = vrot.lane.b32.xlu0 %v2843_v38, %s2560_s27  ;;  %v5575_v38 = vld [vmem:[#allocation29_spill] sm:$0xff] }
 0x11b   : > { %v3469_v49 = vpop.permute.xlu1 %654 }
 0x11c   : > { %v3471_v16 = vpop.permute.xlu0 %914 }
 0x11d   : > { %5570 = vst [vmem:[#allocation114_spill] sm:$0xff] %v3471_v16  ;;  %1106 = vrot.lane.b32.xlu1 %v5571_v9, %s2564_s4  ;;  %v473_v9 = vsel %vm371_vm1, %v5351_v40, %v5576_v44 }
 0x11e   : > { %846 = vrot.lane.b32.xlu0 %v5572_v28, %s2561_s28 }
 0x11f   : > { %v3478_v51 = vpop.permute.xlu1 %1018 }
 0x120   : > { %5573 = vst [vmem:[#allocation115_spill] sm:$0xff] %v3478_v51  ;;  %v3480_v5 = vpop.permute.xlu0 %898 }
 0x121   : > { %5574 = vst [vmem:[#allocation116_spill] sm:$0xff] %v3480_v5  ;;  %1230 = vrot.lane.b32.xlu1 %v3093_v13, %s2565_s5 }
 0x122   : > { %1140 = vrot.lane.b32.xlu0 %v5575_v38, %s2564_s4  ;;  %v5581_v38 = vld [vmem:[#allocation27_spill] sm:$0xff] }
 0x123   : > { %v3486_v33 = vpop.permute.xlu1 %754  ;;  %v444_v57 = vrot.slane %v5581_v38, 2 }
 0x124   : > { %v3493_v28 = vpop.permute.xlu0 %720 }
 0x125   : > { %796 = vrot.lane.b32.xlu1 %v5577_v52, %s2561_s28 }
 0x126   : > { %1264 = vrot.lane.b32.xlu0 %v473_v9, %s2565_s5  ;;  %v1324_v9 = vsel %vm1304_vm2, %v2785_v62, %v3221_v14 }
 0x127   : > { %v3498_v20 = vpop.permute.xlu1 %1126 }
 0x128   : > { %5578 = vst [vmem:[#allocation117_spill] sm:$0xff] %v3498_v20  ;;  %v3500_v13 = vpop.permute.xlu0 %1002 }
 0x129   : > { %5579 = vst [vmem:[#allocation118_spill] sm:$0xff] %v3500_v13  ;;  %908 = vrot.lane.b32.xlu1 %v3073_v7, %s2562_s29  ;;  %v5583_v7 = vrot.slane %v5550_v24, 2 }
 0x12a   : > { %830 = vrot.lane.b32.xlu0 %v5580_v42, %s2561_s28  ;;  %v3518_v42 = vsel %vm1341_vm4, %v1324_v9, %v3381_v12 }
 0x12b   : > { %v3507_v44 = vpop.permute.xlu1 %738  ;;  %5582 = vst [vmem:[#allocation27_spill] sm:$0xff] %v3518_v42  ;;  %v3525_v52 = vsel %vm371_vm1, %v444_v57, %v5583_v7  ;;  %v1410_v14 = vsel %vm1378_vm3, %v3518_v42, %v3456_v47 }
 0x12c   : > { %v3509_v40 = vpop.permute.xlu0 %704  ;;  %5584 = vst [vmem:[#allocation119_spill] sm:$0xff] %v3525_v52  ;;  %v1475_v12 = vsel %vm1443_vm5, %v1410_v14, %v3463_v56 }
 0x12d   : > { %1214 = vrot.lane.b32.xlu1 %v3043_v19, %s2565_s5  ;;  %v1540_v24 = vsel %vm1508_vm6, %v1475_v12, %v3471_v16 }
 0x12e   : > { %942 = vrot.lane.b32.xlu0 %v3405_v25, %s2562_s29  ;;  %v1605_v57 = vsel %vm1573_vm7, %v1540_v24, %v3478_v51  ;;  %v3558_v24 = vld [vmem:[%s2626_s24 + $0x170] sm:$0xff] }
 0x12f   : > { %v3530_v54 = vpop.permute.xlu1 %850  ;;  %v1670_v14 = vsel %vm1638_vm8, %v1605_v57, %v3498_v20  ;;  %v1316_v57 = vsel %vm1304_vm2, %v2705_v34, %v3184_v45  ;;  %v5590_v45 = vld [vmem:[#allocation8_spill] sm:$0xff] }
 0x130   : > { %v3534_v9 = vpop.permute.xlu0 %816 }
 0x131   : > { %648 = vrot.lane.b32.xlu1 %v3525_v52, %s2559_s26  ;;  %s190_s26 = scalar_lea.vmem %s5267_s3, %s2270_s23 }
 0x132   : > { %1248 = vrot.lane.b32.xlu0 %v3176_v37, %s2565_s5 }
 0x133   : > { %v3544_v7 = vpop.permute.xlu1 %1234 }
 0x134   : > { %5585 = vst [vmem:[#allocation120_spill] sm:$0xff] %v3544_v7  ;;  %v3548_v42 = vpop.permute.xlu0 %1110  ;;  %v1735_v12 = vsel %vm1703_vm9, %v1670_v14, %v3544_v7  ;;  %v5587_v14 = vld [vmem:[#allocation14_spill] sm:$0xff] }
 0x135   : > { %5586 = vst [vmem:[#allocation121_spill] sm:$0xff] %v3548_v42  ;;  %926 = vrot.lane.b32.xlu1 %v3122_v35, %s2562_s29  ;;  %2347 = vmatprep.subr.msk.mxu0 %vm1782_vm10, %v1735_v12  ;;  %v3573_v12 = vsel %vm1341_vm4, %v1316_v57, %v3346_v41  ;;  %v459_v57 = vrot.slane %v3558_v24, 1 }
 0x136   : > { %892 = vrot.lane.b32.xlu0 %v3023_v30, %s2562_s29  ;;  %5588 = vst [vmem:[#allocation14_spill] sm:$0xff] %v3573_v12  ;;  %v1394_v20 = vsel %vm1378_vm3, %v3573_v12, %v3449_v8 }
 0x137   : > { %v3560_v51 = vpop.permute.xlu1 %834  ;;  %v1459_v16 = vsel %vm1443_vm5, %v1394_v20, %v3461_v58  ;;  %v5598_v58 = vld [vmem:[#allocation45_spill] sm:$0xff] }
 0x138   : > { %v3562_v19 = vpop.permute.xlu0 %800 }
 0x139   : > { %1046 = vrot.lane.b32.xlu1 %v3558_v24, %s2563_s30 }
 0x13a   : > { %1012 = vrot.lane.b32.xlu0 %v5587_v14, %s2563_s30  ;;  %v1524_v14 = vsel %vm1508_vm6, %v1459_v16, %v3480_v5 }
 0x13b   : > { %v3575_v7 = vpop.permute.xlu1 %946  ;;  %v1589_v41 = vsel %vm1573_vm7, %v1524_v14, %v3500_v13  ;;  %v5593_v14 = vrot.slane %v3424_v11, 1 }
 0x13c   : > { %5589 = vst [vmem:[#allocation122_spill] sm:$0xff] %v3575_v7  ;;  %v3580_v37 = vpop.permute.xlu0 %912  ;;  %v1654_v8 = vsel %vm1638_vm8, %v1589_v41, %v3548_v42  ;;  %v5594_v42 = vld [vmem:[#allocation17_spill] sm:$0xff] }
 0x13d   : > { %996 = vrot.lane.b32.xlu1 %v5590_v45, %s2563_s30  ;;  %v5592_v45 = vld [vmem:[#allocation16_spill] sm:$0xff]  ;;  %v462_v13 = vsel %vm289_vm0, %v459_v57, %v5593_v14 }
 0x13e   : > { %748 = vrot.lane.b32.xlu0 %v5581_v38, %s2560_s27 }
 0x13f   : > { %v3593_v12 = vpop.permute.xlu1 %652 }
 0x140   : > { %v3597_v20 = vpop.permute.xlu0 %1218 }
 0x141   : > { %5591 = vst [vmem:[#allocation8_spill] sm:$0xff] %v3597_v20  ;;  %1120 = vrot.lane.b32.xlu1 %v5592_v45, %s2564_s4  ;;  %v1719_v16 = vsel %vm1703_vm9, %v1654_v8, %v3597_v20  ;;  %v468_v20 = vrot.slane %v3558_v24, 2  ;;  %v5603_v24 = vld [vmem:[#allocation21_spill] sm:$0xff] }
 0x142   : > { %1030 = vrot.lane.b32.xlu0 %v2883_v31, %s2563_s30  ;;  %2348 = vmatpush3.xpose.msk.msra.mxu0 %vm1782_vm10, %v1719_v16  ;;  %v5596_v31 = vld [vmem:[#allocation10_spill] sm:$0xff]  ;;  %v5597_v16 = vld [vmem:[#allocation31_spill] sm:$0xff] }
 0x143   : > { %v3606_v38 = vpop.permute.xlu1 %930 }
 0x144   : > { %v3611_v41 = vpop.permute.xlu0 %896 }
 0x145   : > { %732 = vrot.lane.b32.xlu1 %v5594_v42, %s2560_s27 }
 0x146   : > { %1154 = vrot.lane.b32.xlu0 %v462_v13, %s2564_s4  ;;  %v5599_v13 = vld [vmem:[#allocation24_spill] sm:$0xff] }
 0x147   : > { %v1051_v45 = vpop.permute.xlu1 %1050 }
 0x148   : > { %v3616_v8 = vpop.permute.xlu0 %1016 }
 0x149   : > { %5595 = vst [vmem:[#allocation17_spill] sm:$0xff] %v3616_v8  ;;  %1104 = vrot.lane.b32.xlu1 %v5596_v31, %s2564_s4  ;;  %v5601_v31 = vrot.slane %v3424_v11, 2 }
 0x14a   : > { %844 = vrot.lane.b32.xlu0 %v5597_v16, %s2561_s28 }
 0x14b   : > { %v3623_v5 = vpop.permute.xlu1 %752  ;;  %v471_v56 = vsel %vm371_vm1, %v468_v20, %v5601_v31  ;;  %v5607_v31 = vld [vmem:[#allocation52_spill] sm:$0xff] }
 0x14c   : > { %v3625_v14 = vpop.permute.xlu0 %718 }
 0x14d   : > { %1228 = vrot.lane.b32.xlu1 %v5598_v58, %s2565_s5  ;;  %v5605_v58 = vld [vmem:[#allocation39_spill] sm:$0xff] }
 0x14e   : > { %1138 = vrot.lane.b32.xlu0 %v5599_v13, %s2564_s4 }
 0x14f   : > { %v3631_v42 = vpop.permute.xlu1 %1034 }
 0x150   : > { %5600 = vst [vmem:[#allocation123_spill] sm:$0xff] %v3631_v42  ;;  %v3636_v47 = vpop.permute.xlu0 %1000 }
 0x151   : > { %5602 = vst [vmem:[#allocation124_spill] sm:$0xff] %v3636_v47  ;;  %828 = vrot.lane.b32.xlu1 %v5603_v24, %s2561_s28 }
 0x152   : > { %1262 = vrot.lane.b32.xlu0 %v471_v56, %s2565_s5  ;;  %v239_v56 = vld [vmem:[%s2626_s24 + $0x168] sm:$0xff] }
 0x153   : > { %v1159_v16 = vpop.permute.xlu1 %1158  ;;  %v458_v25 = vrot.slane %v239_v56, 1 }
 0x154   : > { %v3641_v35 = vpop.permute.xlu0 %1124 }
 0x155   : > { %5604 = vst [vmem:[#allocation125_spill] sm:$0xff] %v3641_v35  ;;  %1212 = vrot.lane.b32.xlu1 %v5605_v58, %s2565_s5  ;;  %v1340_v58 = vsel %vm1304_vm2, %v2945_v32, %v3291_v10 }
 0x156   : > { %940 = vrot.lane.b32.xlu0 %v3525_v52, %s2562_s29  ;;  %v1323_v52 = vsel %vm1304_vm2, %v2766_v55, %v3223_v4  ;;  %v5611_v4 = vld [vmem:[#allocation22_spill] sm:$0xff] }
 0x157   : > { %v3647_v13 = vpop.permute.xlu1 %736 }
 0x158   : > { %5606 = vst [vmem:[#allocation126_spill] sm:$0xff] %v3647_v13  ;;  %v3649_v11 = vpop.permute.xlu0 %702 }
 0x159   : > { %924 = vrot.lane.b32.xlu1 %v5607_v31, %s2562_s29  ;;  %v1377_v31 = vsel %vm1341_vm4, %v1340_v58, %v3469_v49 }
 0x15a   : > { %1246 = vrot.lane.b32.xlu0 %v3155_v50, %s2565_s5  ;;  %v3673_v50 = vsel %vm1341_vm4, %v1323_v52, %v3383_v21  ;;  %v1442_v10 = vsel %vm1378_vm3, %v1377_v31, %v3486_v33 }
 0x15b   : > { %v3656_v24 = vpop.permute.xlu1 %848  ;;  %5608 = vst [vmem:[#allocation127_spill] sm:$0xff] %v3673_v50  ;;  %v1409_v55 = vsel %vm1378_vm3, %v3673_v50, %v3493_v28  ;;  %v1507_v58 = vsel %vm1443_vm5, %v1442_v10, %v3530_v54  ;;  %v460_v10 = vsel %vm289_vm0, %v458_v25, %v459_v57 }
 0x15c   : > { %v3658_v30 = vpop.permute.xlu0 %814  ;;  %v1572_v52 = vsel %vm1508_vm6, %v1507_v58, %v3575_v7 }
 0x15d   : > { %1044 = vrot.lane.b32.xlu1 %v239_v56, %s2563_s30  ;;  %v1637_v31 = vsel %vm1573_vm7, %v1572_v52, %v1051_v45  ;;  %v1332_v45 = vsel %vm1304_vm2, %v2865_v61, %v3253_v48  ;;  %v2487_v52 = vld [vmem:[%s2626_s24 + $0x60] sm:$0xff] }
 0x15e   : > { %1010 = vrot.lane.b32.xlu0 %v2785_v62, %s2563_s30  ;;  %v1474_v62 = vsel %vm1443_vm5, %v1409_v55, %v3534_v9  ;;  %v1702_v55 = vsel %vm1638_vm8, %v1637_v31, %v1159_v16  ;;  %v5613_v16 = vld [vmem:[#allocation25_spill] sm:$0xff] }
 0x15f   : > { %v3677_v13 = vpop.permute.xlu1 %1142  ;;  %v1539_v21 = vsel %vm1508_vm6, %v1474_v62, %v3580_v37 }
 0x160   : > { %5609 = vst [vmem:[#allocation128_spill] sm:$0xff] %v3677_v13  ;;  %v3684_v49 = vpop.permute.xlu0 %1108  ;;  %v1604_v50 = vsel %vm1573_vm7, %v1539_v21, %v3616_v8  ;;  %v3973_v8 = vld [vmem:[%s2626_s24 + $0x40] sm:$0xff] }
 0x161   : > { %5610 = vst [vmem:[#allocation129_spill] sm:$0xff] %v3684_v49  ;;  %1028 = vrot.lane.b32.xlu1 %v5611_v4, %s2563_s30  ;;  %v1669_v4 = vsel %vm1638_vm8, %v1604_v50, %v3641_v35 }
 0x162   : > { %994 = vrot.lane.b32.xlu0 %v2705_v34, %s2563_s30  ;;  %v467_v34 = vrot.slane %v239_v56, 2  ;;  %v1315_v56 = vsel %vm1304_vm2, %v2487_v52, %v3186_v29 }
 0x163   : > { %v1267_v58 = vpop.permute.xlu1 %1266  ;;  %v3734_v31 = vsel %vm1341_vm4, %v1315_v56, %v3348_v53 }
 0x164   : > { %v3703_v7 = vpop.permute.xlu0 %1232  ;;  %v1767_v62 = vsel %vm1703_vm9, %v1702_v55, %v1267_v58  ;;  %v469_v21 = vsel %vm371_vm1, %v467_v34, %v468_v20  ;;  %5615 = vst [vmem:[#allocation130_spill] sm:$0xff] %v3734_v31  ;;  %v1393_v29 = vsel %vm1378_vm3, %v3734_v31, %v3509_v40 }
 0x165   : > { %5612 = vst [vmem:[#allocation22_spill] sm:$0xff] %v3703_v7  ;;  %1152 = vrot.lane.b32.xlu1 %v460_v10, %s2564_s4  ;;  %2383 = vmatprep.subr.msk.mxu1 %vm1782_vm10, %v1767_v62  ;;  %v1734_v25 = vsel %vm1703_vm9, %v1669_v4, %v3703_v7  ;;  %v1458_v20 = vsel %vm1443_vm5, %v1393_v29, %v3562_v19 }
 0x166   : > { %1118 = vrot.lane.b32.xlu0 %v2816_v15, %s2564_s4  ;;  %2349 = vmatprep.subr.msk.mxu0 %vm1782_vm10, %v1734_v25  ;;  %v3727_v15 = vsel %vm1341_vm4, %v1332_v45, %v3421_v26  ;;  %v1523_v55 = vsel %vm1508_vm6, %v1458_v20, %v3611_v41 }
 0x167   : > { %v3713_v57 = vpop.permute.xlu1 %832  ;;  %5614 = vst [vmem:[#allocation25_spill] sm:$0xff] %v3727_v15  ;;  %v1426_v48 = vsel %vm1378_vm3, %v3727_v15, %v3507_v44  ;;  %v1588_v4 = vsel %vm1573_vm7, %v1523_v55, %v3636_v47 }
 0x168   : > { %v3715_v50 = vpop.permute.xlu0 %798  ;;  %v1491_v26 = vsel %vm1443_vm5, %v1426_v48, %v3560_v51  ;;  %v1653_v34 = vsel %vm1638_vm8, %v1588_v4, %v3684_v49  ;;  %v2489_v4 = vld [vmem:[%s2626_s24 + $0xa8] sm:$0xff] }
 0x169   : > { %1136 = vrot.lane.b32.xlu1 %v5613_v16, %s2564_s4  ;;  %v1556_v53 = vsel %vm1508_vm6, %v1491_v26, %v3606_v38  ;;  %v2488_v26 = vld [vmem:[%s2626_s24 + $0xb0] sm:$0xff]  ;;  %v5658_v49 = vld [vmem:[#allocation43_spill] sm:$0xff] }
 0x16a   : > { %1102 = vrot.lane.b32.xlu0 %v2736_v43, %s2564_s4  ;;  %v1621_v58 = vsel %vm1573_vm7, %v1556_v53, %v3631_v42  ;;  %v5661_v42 = vld [vmem:[#allocation20_spill] sm:$0xff] }
 0x16b   : > { %v3739_v10 = vpop.permute.xlu1 %944  ;;  %v1686_v62 = vsel %vm1638_vm8, %v1621_v58, %v3677_v13 }
 0x16c   : > { %v3746_v43 = vpop.permute.xlu0 %910 }
 0x16d   : > { %1260 = vrot.lane.b32.xlu1 %v469_v21, %s2565_s5  ;;  %v5618_v21 = vld [vmem:[#allocation59_spill] sm:$0xff] }
 0x16e   : > { %1226 = vrot.lane.b32.xlu0 %v3080_v0, %s2565_s5 }
 0x16f   : > { %v3763_v25 = vpop.permute.xlu1 %1250 }
 0x170   : > { %5616 = vst [vmem:[#allocation131_spill] sm:$0xff] %v3763_v25  ;;  %v3767_v45 = vpop.permute.xlu0 %1216  ;;  %v1751_v56 = vsel %vm1703_vm9, %v1686_v62, %v3763_v25 }
 0x171   : > { %5617 = vst [vmem:[#allocation132_spill] sm:$0xff] %v3767_v45  ;;  %1244 = vrot.lane.b32.xlu1 %v5618_v21, %s2565_s5  ;;  %2384 = vmatpush3.xpose.msk.msra.mxu1 %vm1782_vm10, %v1751_v56  ;;  %v1718_v0 = vsel %vm1703_vm9, %v1653_v34, %v3767_v45  ;;  %v2490_v56 = vld [vmem:[%s2626_s24 + $0x100] sm:$0xff] }
 0x172   : > { %1210 = vrot.lane.b32.xlu0 %v3030_v59, %s2565_s5  ;;  %2350 = vmatpush3.xpose.msk.msra.mxu0 %vm1782_vm10, %v1718_v0 }
 0x173   : > { %v3779_v48 = vpop.permute.xlu1 %894 }
 0x174   : > { %v3781_v29 = vpop.permute.xlu0 %650 }
 0x175   : > { %1042 = vrot.lane.b32.xlu1 %v2945_v32, %s2563_s30 }
 0x176   : > { %1008 = vrot.lane.b32.xlu0 %v2488_v26, %s2563_s30 }
 0x177   : > { %v3787_v20 = vpop.permute.xlu1 %1014 }
 0x178   : > { %5619 = vst [vmem:[#allocation59_spill] sm:$0xff] %v3787_v20  ;;  %v3789_v53 = vpop.permute.xlu0 %928 }
 0x179   : > { %1026 = vrot.lane.b32.xlu1 %v2865_v61, %s2563_s30 }
 0x17a   : > { %992 = vrot.lane.b32.xlu0 %v2487_v52, %s2563_s30 }
 0x17b   : > { %v3794_v59 = vpop.permute.xlu1 %716 }
 0x17c   : > { %v1049_v55 = vpop.permute.xlu0 %1048 }
 0x17d   : > { %1150 = vrot.lane.b32.xlu1 %v2967_v17, %s2564_s4 }
 0x17e   : > { %1116 = vrot.lane.b32.xlu0 %v2821_v18, %s2564_s4 }
 0x17f   : > { %v3800_v32 = vpop.permute.xlu1 %998 }
 0x180   : > { %5620 = vst [vmem:[#allocation133_spill] sm:$0xff] %v3800_v32  ;;  %v3802_v58 = vpop.permute.xlu0 %750 }
 0x181   : > { %1134 = vrot.lane.b32.xlu1 %v2896_v22, %s2564_s4 }
 0x182   : > { %1100 = vrot.lane.b32.xlu0 %v2741_v46, %s2564_s4 }
 0x183   : > { %v3808_v61 = vpop.permute.xlu1 %1122 }
 0x184   : > { %5621 = vst [vmem:[#allocation134_spill] sm:$0xff] %v3808_v61  ;;  %v3810_v52 = vpop.permute.xlu0 %1032 }
 0x185   : > { %5622 = vst [vmem:[#allocation135_spill] sm:$0xff] %v3810_v52  ;;  %1258 = vrot.lane.b32.xlu1 %v3203_v36, %s2565_s5  ;;  %v1322_v36 = vsel %vm1304_vm2, %v2489_v4, %v3213_v60 }
 0x186   : > { %1224 = vrot.lane.b32.xlu0 %v3085_v1, %s2565_s5  ;;  %v3833_v1 = vsel %vm1341_vm4, %v1322_v36, %v3373_v27  ;;  %v5626_v27 = vld [vmem:[#allocation84_spill] sm:$0xff] }
 0x187   : > { %v3816_v18 = vpop.permute.xlu1 %700  ;;  %5624 = vst [vmem:[#allocation137_spill] sm:$0xff] %v3833_v1  ;;  %v1339_v0 = vsel %vm1304_vm2, %v2926_v39, %v5626_v27 }
 0x188   : > { %v1157_v17 = vpop.permute.xlu0 %1156  ;;  %v1376_v36 = vsel %vm1341_vm4, %v1339_v0, %v3593_v12 }
 0x189   : > { %1242 = vrot.lane.b32.xlu1 %v3138_v63, %s2565_s5  ;;  %v1441_v7 = vsel %vm1378_vm3, %v1376_v36, %v3623_v5 }
 0x18a   : > { %1208 = vrot.lane.b32.xlu0 %v3035_v2, %s2565_s5  ;;  %v1408_v2 = vsel %vm1378_vm3, %v3833_v1, %v3625_v14 }
 0x18b   : > { %v3822_v22 = vpop.permute.xlu1 %812  ;;  %v1473_v62 = vsel %vm1443_vm5, %v1408_v2, %v3658_v30 }
 0x18c   : > { %v3824_v46 = vpop.permute.xlu0 %734  ;;  %v1538_v60 = vsel %vm1508_vm6, %v1473_v62, %v3746_v43 }
 0x18d   : > { %5623 = vst [vmem:[#allocation136_spill] sm:$0xff] %v3824_v46  ;;  %1040 = vrot.lane.b32.xlu1 %v2926_v39, %s2563_s30  ;;  %v1603_v26 = vsel %vm1573_vm7, %v1538_v60, %v3787_v20  ;;  %v1506_v60 = vsel %vm1443_vm5, %v1441_v7, %v3656_v24  ;;  %v5648_v20 = vld [vmem:[#allocation13_spill] sm:$0xff] }
 0x18e   : > { %1006 = vrot.lane.b32.xlu0 %v2489_v4, %s2563_s30  ;;  %v2491_v4 = vld [vmem:[%s2626_s24 + $0x58] sm:$0xff]  ;;  %v1668_v2 = vsel %vm1638_vm8, %v1603_v26, %v3808_v61  ;;  %v1571_v12 = vsel %vm1508_vm6, %v1506_v60, %v3739_v10 }
 0x18f   : > { %v3839_v63 = vpop.permute.xlu1 %1106  ;;  %v1636_v27 = vsel %vm1573_vm7, %v1571_v12, %v1049_v55 }
 0x190   : > { %5625 = vst [vmem:[#allocation138_spill] sm:$0xff] %v3839_v63  ;;  %v3843_v34 = vpop.permute.xlu0 %846  ;;  %v1701_v26 = vsel %vm1638_vm8, %v1636_v27, %v1157_v17  ;;  %v5635_v27 = vld [vmem:[#allocation81_spill] sm:$0xff] }
 0x191   : > { %1024 = vrot.lane.b32.xlu1 %v2490_v56, %s2563_s30 }
 0x192   : > { %990 = vrot.lane.b32.xlu0 %v2491_v4, %s2563_s30 }
 0x193   : > { %v3860_v62 = vpop.permute.xlu1 %1230 }
 0x194   : > { %5627 = vst [vmem:[#allocation84_spill] sm:$0xff] %v3860_v62  ;;  %v3864_v35 = vpop.permute.xlu0 %1140  ;;  %v1733_v39 = vsel %vm1703_vm9, %v1668_v2, %v3860_v62  ;;  %v5630_v2 = vld [vmem:[#allocation62_spill] sm:$0xff] }
 0x195   : > { %5628 = vst [vmem:[#allocation139_spill] sm:$0xff] %v3864_v35  ;;  %1148 = vrot.lane.b32.xlu1 %v2972_v6, %s2564_s4  ;;  %2351 = vmatprep.subr.msk.mxu0 %vm1782_vm10, %v1733_v39  ;;  %v1314_v7 = vsel %vm1304_vm2, %v2491_v4, %v5630_v2  ;;  %v5631_v39 = vld [vmem:[#allocation93_spill] sm:$0xff] }
 0x196   : > { %1114 = vrot.lane.b32.xlu0 %v2795_v3, %s2564_s4  ;;  %v3888_v60 = vsel %vm1341_vm4, %v1314_v7, %v5631_v39  ;;  %v5633_v3 = vld [vmem:[#allocation6_spill] sm:$0xff] }
 0x197   : > { %v3878_v0 = vpop.permute.xlu1 %796  ;;  %5632 = vst [vmem:[#allocation62_spill] sm:$0xff] %v3888_v60  ;;  %v1392_v55 = vsel %vm1378_vm3, %v3888_v60, %v3649_v11  ;;  %v5637_v7 = vld [vmem:[#allocation42_spill] sm:$0xff]  ;;  %v5657_v60 = vld [vmem:[#allocation69_spill] sm:$0xff] }
 0x198   : > { %5629 = vst [vmem:[#allocation140_spill] sm:$0xff] %v3878_v0  ;;  %v1265_v36 = vpop.permute.xlu0 %1264  ;;  %v1457_v4 = vsel %vm1443_vm5, %v1392_v55, %v3715_v50 }
 0x199   : > { %v1766_v6 = vsel %vm1703_vm9, %v1701_v26, %v1265_v36  ;;  %1132 = vrot.lane.b32.xlu1 %v5547_v23, %s2564_s4  ;;  %v1522_v23 = vsel %vm1508_vm6, %v1457_v4, %v3779_v48  ;;  %v5636_v26 = vld [vmem:[#allocation76_spill] sm:$0xff]  ;;  %v5641_v4 = vld [vmem:[#allocation126_spill] sm:$0xff] }
 0x19a   : > { %1098 = vrot.lane.b32.xlu0 %v5633_v3, %s2564_s4  ;;  %2385 = vmatprep.subr.msk.mxu1 %vm1782_vm10, %v1766_v6  ;;  %v1331_v36 = vsel %vm1304_vm2, %v2490_v56, %v5636_v26  ;;  %v1587_v2 = vsel %vm1573_vm7, %v1522_v23, %v3800_v32  ;;  %v5638_v6 = vld [vmem:[#allocation105_spill] sm:$0xff]  ;;  %v5655_v32 = vld [vmem:[#allocation11_spill] sm:$0xff] }
 0x19b   : > { %v3896_v17 = vpop.permute.xlu1 %908  ;;  %v3914_v39 = vsel %vm1341_vm4, %v1331_v36, %v5638_v6  ;;  %v1652_v3 = vsel %vm1638_vm8, %v1587_v2, %v3839_v63  ;;  %v5642_v36 = vld [vmem:[#allocation55_spill] sm:$0xff]  ;;  %v2496_v63 = vld [vmem:[%s2626_s24 + $0xf8] sm:$0xff] }
 0x19c   : > { %v3900_v12 = vpop.permute.xlu0 %830  ;;  %5639 = vst [vmem:[#allocation6_spill] sm:$0xff] %v3914_v39  ;;  %v1425_v56 = vsel %vm1378_vm3, %v3914_v39, %v5641_v4 }
 0x19d   : > { %5634 = vst [vmem:[#allocation93_spill] sm:$0xff] %v3900_v12  ;;  %1256 = vrot.lane.b32.xlu1 %v5635_v27, %s2565_s5  ;;  %v1490_v26 = vsel %vm1443_vm5, %v1425_v56, %v3713_v57 }
 0x19e   : > { %1222 = vrot.lane.b32.xlu0 %v5637_v7, %s2565_s5  ;;  %v1555_v2 = vsel %vm1508_vm6, %v1490_v26, %v3789_v53  ;;  %v5643_v7 = vld [vmem:[#allocation36_spill] sm:$0xff]  ;;  %v2493_v26 = vld [vmem:[%s2626_s24 + $0xa0] sm:$0xff] }
 0x19f   : > { %v3918_v55 = vpop.permute.xlu1 %1214  ;;  %v1620_v6 = vsel %vm1573_vm7, %v1555_v2, %v3810_v52  ;;  %v1321_v13 = vsel %vm1304_vm2, %v2493_v26, %v5657_v60 }
 0x1a0   : > { %5640 = vst [vmem:[#allocation81_spill] sm:$0xff] %v3918_v55  ;;  %v3923_v27 = vpop.permute.xlu0 %942  ;;  %v1717_v23 = vsel %vm1703_vm9, %v1652_v3, %v3918_v55  ;;  %v1685_v56 = vsel %vm1638_vm8, %v1620_v6, %v3864_v35  ;;  %v2494_v6 = vld [vmem:[%s2626_s24 + $0x50] sm:$0xff]  ;;  %v5651_v35 = vld [vmem:[#allocation30_spill] sm:$0xff] }
 0x1a1   : > { %1240 = vrot.lane.b32.xlu1 %v5642_v36, %s2565_s5  ;;  %2352 = vmatpush3.xpose.msk.msra.mxu0 %vm1782_vm10, %v1717_v23  ;;  %v2492_v36 = vld [vmem:[%s2626_s24 + $0x148] sm:$0xff]  ;;  %v3958_v55 = vld [vmem:[%s2626_s24 + $0x90] sm:$0xff] }
 0x1a2   : > { %1206 = vrot.lane.b32.xlu0 %v5643_v7, %s2565_s5 }
 0x1a3   : > { %v3938_v3 = vpop.permute.xlu1 %648 }
 0x1a4   : > { %v3942_v62 = vpop.permute.xlu0 %1248 }
 0x1a5   : > { %5644 = vst [vmem:[#allocation76_spill] sm:$0xff] %v3942_v62  ;;  %1038 = vrot.lane.b32.xlu1 %v2492_v36, %s2563_s30  ;;  %v1750_v23 = vsel %vm1703_vm9, %v1685_v56, %v3942_v62 }
 0x1a6   : > { %1004 = vrot.lane.b32.xlu0 %v2493_v26, %s2563_s30  ;;  %2386 = vmatpush3.xpose.msk.msra.mxu1 %vm1782_vm10, %v1750_v23  ;;  %v5665_v26 = vld [vmem:[#allocation82_spill] sm:$0xff] }
 0x1a7   : > { %v3951_v2 = vpop.permute.xlu1 %926 }
 0x1a8   : > { %5645 = vst [vmem:[#allocation42_spill] sm:$0xff] %v3951_v2  ;;  %v3953_v7 = vpop.permute.xlu0 %892 }
 0x1a9   : > { %5646 = vst [vmem:[#allocation105_spill] sm:$0xff] %v3953_v7  ;;  %988 = vrot.lane.b32.xlu1 %v2494_v6, %s2563_s30 }
 0x1aa   : > { %714 = vrot.lane.b32.xlu0 %v3958_v55, %s2560_s27 }
 0x1ab   : > { %v1047_v61 = vpop.permute.xlu1 %1046 }
 0x1ac   : > { %v3962_v56 = vpop.permute.xlu0 %1012 }
 0x1ad   : > { %5647 = vst [vmem:[#allocation126_spill] sm:$0xff] %v3962_v56  ;;  %1112 = vrot.lane.b32.xlu1 %v5648_v20, %s2564_s4  ;;  %v5654_v20 = vld [vmem:[#allocation7_spill] sm:$0xff] }
 0x1ae   : > { %1022 = vrot.lane.b32.xlu0 %v2496_v63, %s2563_s30 }
 0x1af   : > { %v3968_v23 = vpop.permute.xlu1 %996 }
 0x1b0   : > { %5649 = vst [vmem:[#allocation55_spill] sm:$0xff] %v3968_v23  ;;  %v3970_v62 = vpop.permute.xlu0 %748 }
 0x1b1   : > { %5650 = vst [vmem:[#allocation36_spill] sm:$0xff] %v3970_v62  ;;  %698 = vrot.lane.b32.xlu1 %v3973_v8, %s2560_s27 }
 0x1b2   : > { %1146 = vrot.lane.b32.xlu0 %v5651_v35, %s2564_s4  ;;  %v5659_v35 = vld [vmem:[#allocation99_spill] sm:$0xff] }
 0x1b3   : > { %v3979_v25 = vpop.permute.xlu1 %1120  ;;  %v3995_v39 = vsel %vm1341_vm4, %v1321_v13, %v5659_v35  ;;  %v5664_v13 = vld [vmem:[#allocation4_spill] sm:$0xff] }
 0x1b4   : > { %5652 = vst [vmem:[#allocation13_spill] sm:$0xff] %v3979_v25  ;;  %v3981_v1 = vpop.permute.xlu0 %1030  ;;  %5660 = vst [vmem:[#allocation11_spill] sm:$0xff] %v3995_v39 }
 0x1b5   : > { %5653 = vst [vmem:[#allocation30_spill] sm:$0xff] %v3981_v1  ;;  %1096 = vrot.lane.b32.xlu1 %v5654_v20, %s2564_s4 }
 0x1b6   : > { %810 = vrot.lane.b32.xlu0 %v5655_v32, %s2561_s28  ;;  %v1407_v32 = vsel %vm1378_vm3, %v3995_v39, %v3794_v59  ;;  %v5666_v39 = vld [vmem:[#allocation101_spill] sm:$0xff] }
 0x1b7   : > { %v3987_v45 = vpop.permute.xlu1 %732  ;;  %v1472_v47 = vsel %vm1443_vm5, %v1407_v32, %v3822_v22 }
 0x1b8   : > { %5656 = vst [vmem:[#allocation7_spill] sm:$0xff] %v3987_v45  ;;  %v1155_v52 = vpop.permute.xlu0 %1154 }
 0x1b9   : > { %1220 = vrot.lane.b32.xlu1 %v5658_v49, %s2565_s5  ;;  %v1537_v49 = vsel %vm1508_vm6, %v1472_v47, %v3896_v17 }
 0x1ba   : > { %1130 = vrot.lane.b32.xlu0 %v5661_v42, %s2564_s4  ;;  %v1338_v42 = vsel %vm1304_vm2, %v2492_v36, %v5665_v26  ;;  %v1602_v35 = vsel %vm1573_vm7, %v1537_v49, %v3962_v56  ;;  %v5669_v49 = vld [vmem:[#allocation64_spill] sm:$0xff] }
 0x1bb   : > { %v4002_v20 = vpop.permute.xlu1 %1104  ;;  %v1375_v32 = vsel %vm1341_vm4, %v1338_v42, %v3781_v29  ;;  %v1667_v15 = vsel %vm1638_vm8, %v1602_v35, %v3979_v25  ;;  %v1313_v26 = vsel %vm1304_vm2, %v2494_v6, %v5669_v49  ;;  %v5670_v29 = vld [vmem:[#allocation37_spill] sm:$0xff]  ;;  %v5671_v42 = vld [vmem:[#allocation94_spill] sm:$0xff]  ;;  %v5684_v25 = vld [vmem:[#allocation31_spill] sm:$0xff] }
 0x1bc   : > { %5662 = vst [vmem:[#allocation69_spill] sm:$0xff] %v4002_v20  ;;  %v4006_v60 = vpop.permute.xlu0 %844  ;;  %v1440_v47 = vsel %vm1378_vm3, %v1375_v32, %v3802_v58  ;;  %v4039_v35 = vsel %vm1341_vm4, %v1313_v26, %v5671_v42  ;;  %v5687_v56 = vld [vmem:[#allocation12_spill] sm:$0xff] }
 0x1bd   : > { %5663 = vst [vmem:[#allocation43_spill] sm:$0xff] %v4006_v60  ;;  %794 = vrot.lane.b32.xlu1 %v5664_v13, %s2561_s28  ;;  %5672 = vst [vmem:[#allocation82_spill] sm:$0xff] %v4039_v35  ;;  %v1391_v6 = vsel %vm1378_vm3, %v4039_v35, %v3816_v18  ;;  %v5688_v35 = vld [vmem:[#allocation83_spill] sm:$0xff] }
 0x1be   : > { %1254 = vrot.lane.b32.xlu0 %v5666_v39, %s2565_s5  ;;  %v1505_v39 = vsel %vm1443_vm5, %v1440_v47, %v3843_v34 }
 0x1bf   : > { %v4022_v31 = vpop.permute.xlu1 %1228  ;;  %v1570_v32 = vsel %vm1508_vm6, %v1505_v39, %v3923_v27 }
 0x1c0   : > { %5667 = vst [vmem:[#allocation99_spill] sm:$0xff] %v4022_v31  ;;  %v4026_v13 = vpop.permute.xlu0 %1138  ;;  %v1732_v36 = vsel %vm1703_vm9, %v1667_v15, %v4022_v31  ;;  %v5673_v15 = vld [vmem:[#allocation40_spill] sm:$0xff]  ;;  %v1635_v47 = vsel %vm1573_vm7, %v1570_v32, %v1047_v61  ;;  %v5676_v31 = vld [vmem:[#allocation74_spill] sm:$0xff] }
 0x1c1   : > { %5668 = vst [vmem:[#allocation20_spill] sm:$0xff] %v4026_v13  ;;  %1204 = vrot.lane.b32.xlu1 %v5670_v29, %s2565_s5  ;;  %2353 = vmatprep.subr.msk.mxu0 %vm1782_vm10, %v1732_v36  ;;  %v1456_v36 = vsel %vm1443_vm5, %v1391_v6, %v3878_v0  ;;  %v1700_v26 = vsel %vm1638_vm8, %v1635_v47, %v1155_v52  ;;  %v5677_v6 = vld [vmem:[#allocation50_spill] sm:$0xff]  ;;  %v5678_v52 = vld [vmem:[#allocation103_spill] sm:$0xff] }
 0x1c2   : > { %906 = vrot.lane.b32.xlu0 %v5673_v15, %s2562_s29  ;;  %v1521_v39 = vsel %vm1508_vm6, %v1456_v36, %v3953_v7  ;;  %v5675_v15 = vld [vmem:[#allocation34_spill] sm:$0xff]  ;;  %v1330_v61 = vsel %vm1304_vm2, %v2496_v63, %v5676_v31 }
 0x1c3   : > { %v4049_v49 = vpop.permute.xlu1 %828  ;;  %v1586_v32 = vsel %vm1573_vm7, %v1521_v39, %v3968_v23  ;;  %v4068_v47 = vsel %vm1341_vm4, %v1330_v61, %v5678_v52 }
 0x1c4   : > { %5674 = vst [vmem:[#allocation101_spill] sm:$0xff] %v4049_v49  ;;  %v1263_v29 = vpop.permute.xlu0 %1262  ;;  %5679 = vst [vmem:[#allocation64_spill] sm:$0xff] %v4068_v47  ;;  %v1651_v36 = vsel %vm1638_vm8, %v1586_v32, %v4002_v20  ;;  %v1424_v31 = vsel %vm1378_vm3, %v4068_v47, %v3824_v46  ;;  %v2499_v32 = vld [vmem:[%s2626_s24 + $0x140] sm:$0xff]  ;;  %v5690_v47 = vld [vmem:[#allocation67_spill] sm:$0xff] }
 0x1c5   : > { %v1765_v42 = vsel %vm1703_vm9, %v1700_v26, %v1263_v29  ;;  %890 = vrot.lane.b32.xlu1 %v5675_v15, %s2562_s29  ;;  %v1489_v39 = vsel %vm1443_vm5, %v1424_v31, %v3900_v12  ;;  %v5691_v12 = vld [vmem:[#allocation28_spill] sm:$0xff]  ;;  %v5692_v46 = vld [vmem:[#allocation97_spill] sm:$0xff] }
 0x1c6   : > { %1238 = vrot.lane.b32.xlu0 %v5677_v6, %s2565_s5  ;;  %2387 = vmatprep.subr.msk.mxu1 %vm1782_vm10, %v1765_v42  ;;  %v4084_v42 = vld [vmem:[%s2626_s24 + $0x88] sm:$0xff]  ;;  %v1554_v61 = vsel %vm1508_vm6, %v1489_v39, %v3951_v2  ;;  %v4106_v39 = vld [vmem:[%s2626_s24 + $0x130] sm:$0xff]  ;;  %v1320_v2 = vsel %vm1304_vm2, %v3958_v55, %v5690_v47  ;;  %v5698_v47 = vld [vmem:[#allocation113_spill] sm:$0xff] }
 0x1c7   : > { %v4072_v26 = vpop.permute.xlu1 %1212  ;;  %v1619_v6 = vsel %vm1573_vm7, %v1554_v61, %v3981_v1  ;;  %v1337_v1 = vsel %vm1304_vm2, %v2499_v32, %v5688_v35  ;;  %v4146_v7 = vsel %vm1341_vm4, %v1320_v2, %v5692_v46 }
 0x1c8   : > { %5680 = vst [vmem:[#allocation37_spill] sm:$0xff] %v4072_v26  ;;  %v4077_v63 = vpop.permute.xlu0 %940  ;;  %v1716_v29 = vsel %vm1703_vm9, %v1651_v36, %v4072_v26  ;;  %v1684_v36 = vsel %vm1638_vm8, %v1619_v6, %v4026_v13  ;;  %v2500_v26 = vld [vmem:[%s2626_s24 + $0xf0] sm:$0xff]  ;;  %v4114_v6 = vld [vmem:[%s2626_s24 + $0x38] sm:$0xff]  ;;  %5693 = vst [vmem:[#allocation103_spill] sm:$0xff] %v4146_v7 }
 0x1c9   : > { %5681 = vst [vmem:[#allocation94_spill] sm:$0xff] %v4077_v63  ;;  %712 = vrot.lane.b32.xlu1 %v4084_v42, %s2560_s27  ;;  %2354 = vmatpush3.xpose.msk.msra.mxu0 %vm1782_vm10, %v1716_v29 }
 0x1ca   : > { %1036 = vrot.lane.b32.xlu0 %v2499_v32, %s2563_s30 }
 0x1cb   : > { %v4095_v52 = vpop.permute.xlu1 %924 }
 0x1cc   : > { %5682 = vst [vmem:[#allocation40_spill] sm:$0xff] %v4095_v52  ;;  %v4099_v31 = vpop.permute.xlu0 %1246 }
 0x1cd   : > { %5683 = vst [vmem:[#allocation34_spill] sm:$0xff] %v4099_v31  ;;  %1020 = vrot.lane.b32.xlu1 %v2500_v26, %s2563_s30  ;;  %v1749_v29 = vsel %vm1703_vm9, %v1684_v36, %v4099_v31  ;;  %v4127_v31 = vld [vmem:[%s2626_s24 + $0xe0] sm:$0xff] }
 0x1ce   : > { %746 = vrot.lane.b32.xlu0 %v4106_v39, %s2560_s27  ;;  %2388 = vmatpush3.xpose.msk.msra.mxu1 %vm1782_vm10, %v1749_v29 }
 0x1cf   : > { %v1045_v61 = vpop.permute.xlu1 %1044 }
 0x1d0   : > { %v4111_v20 = vpop.permute.xlu0 %1010 }
 0x1d1   : > { %696 = vrot.lane.b32.xlu1 %v4114_v6, %s2560_s27 }
 0x1d2   : > { %1144 = vrot.lane.b32.xlu0 %v5684_v25, %s2564_s4  ;;  %v5689_v25 = vld [vmem:[#allocation21_spill] sm:$0xff] }
 0x1d3   : > { %v4120_v23 = vpop.permute.xlu1 %1028 }
 0x1d4   : > { %5685 = vst [vmem:[#allocation74_spill] sm:$0xff] %v4120_v23  ;;  %v4122_v36 = vpop.permute.xlu0 %994 }
 0x1d5   : > { %5686 = vst [vmem:[#allocation50_spill] sm:$0xff] %v4122_v36  ;;  %808 = vrot.lane.b32.xlu1 %v5687_v56, %s2561_s28  ;;  %v1374_v56 = vsel %vm1341_vm4, %v1337_v1, %v3938_v3  ;;  %v5697_v3 = vld [vmem:[#allocation75_spill] sm:$0xff] }
 0x1d6   : > { %730 = vrot.lane.b32.xlu0 %v4127_v31, %s2560_s27  ;;  %v1439_v35 = vsel %vm1378_vm3, %v1374_v56, %v3970_v62  ;;  %v5699_v56 = vld [vmem:[#allocation5_spill] sm:$0xff]  ;;  %v5700_v62 = vld [vmem:[#allocation58_spill] sm:$0xff] }
 0x1d7   : > { %v1153_v29 = vpop.permute.xlu1 %1152  ;;  %v1504_v55 = vsel %vm1443_vm5, %v1439_v35, %v4006_v60  ;;  %v5703_v60 = vld [vmem:[#allocation114_spill] sm:$0xff] }
 0x1d8   : > { %v4131_v13 = vpop.permute.xlu0 %1118  ;;  %v1569_v2 = vsel %vm1508_vm6, %v1504_v55, %v4077_v63  ;;  %v5705_v55 = vld [vmem:[#allocation91_spill] sm:$0xff] }
 0x1d9   : > { %1128 = vrot.lane.b32.xlu1 %v5689_v25, %s2564_s4  ;;  %v5695_v25 = vld [vmem:[#allocation111_spill] sm:$0xff] }
 0x1da   : > { %842 = vrot.lane.b32.xlu0 %v5691_v12, %s2561_s28  ;;  %v1406_v0 = vsel %vm1378_vm3, %v4146_v7, %v5695_v25  ;;  %v1329_v12 = vsel %vm1304_vm2, %v2500_v26, %v5697_v3  ;;  %v1312_v25 = vsel %vm1304_vm2, %v3973_v8, %v5700_v62  ;;  %v5701_v7 = vld [vmem:[#allocation104_spill] sm:$0xff]  ;;  %v1634_v3 = vsel %vm1573_vm7, %v1569_v2, %v1045_v61 }
 0x1db   : > { %v4150_v32 = vpop.permute.xlu1 %1136  ;;  %v1471_v46 = vsel %vm1443_vm5, %v1406_v0, %v5698_v47  ;;  %v4172_v35 = vsel %vm1341_vm4, %v1329_v12, %v5701_v7  ;;  %v5704_v0 = vld [vmem:[#allocation119_spill] sm:$0xff]  ;;  %v4181_v47 = vsel %vm1341_vm4, %v1312_v25, %v5705_v55  ;;  %v1699_v12 = vsel %vm1638_vm8, %v1634_v3, %v1153_v29  ;;  %v5707_v55 = vld [vmem:[#allocation112_spill] sm:$0xff]  ;;  %v5708_v3 = vld [vmem:[#allocation41_spill] sm:$0xff] }
 0x1dc   : > { %5694 = vst [vmem:[#allocation31_spill] sm:$0xff] %v4150_v32  ;;  %v4157_v1 = vpop.permute.xlu0 %1102  ;;  %5702 = vst [vmem:[#allocation83_spill] sm:$0xff] %v4172_v35  ;;  %v1536_v26 = vsel %vm1508_vm6, %v1471_v46, %v5703_v60  ;;  %v1423_v62 = vsel %vm1378_vm3, %v4172_v35, %v3987_v45  ;;  %v5706_v60 = vld [vmem:[#allocation110_spill] sm:$0xff]  ;;  %v5721_v35 = vld [vmem:[#allocation108_spill] sm:$0xff] }
 0x1dd   : > { %5696 = vst [vmem:[#allocation12_spill] sm:$0xff] %v4157_v1  ;;  %792 = vrot.lane.b32.xlu1 %v5699_v56, %s2561_s28  ;;  %v1601_v7 = vsel %vm1573_vm7, %v1536_v26, %v4111_v20  ;;  %v1390_v61 = vsel %vm1378_vm3, %v4181_v47, %v5706_v60  ;;  %v1488_v46 = vsel %vm1443_vm5, %v1423_v62, %v4049_v49  ;;  %v5709_v62 = vld [vmem:[#allocation116_spill] sm:$0xff]  ;;  %v5723_v45 = vld [vmem:[#allocation98_spill] sm:$0xff] }
 0x1de   : > { %1252 = vrot.lane.b32.xlu0 %v5704_v0, %s2565_s5  ;;  %v1666_v2 = vsel %vm1638_vm8, %v1601_v7, %v4131_v13  ;;  %v1455_v26 = vsel %vm1443_vm5, %v1390_v61, %v5707_v55  ;;  %v1553_v29 = vsel %vm1508_vm6, %v1488_v46, %v4095_v52  ;;  %v4277_v49 = vld [vmem:[%s2626_s24 + $0x30] sm:$0xff] }
 0x1df   : > { %v1261_v63 = vpop.permute.xlu1 %1260  ;;  %v1520_v7 = vsel %vm1508_vm6, %v1455_v26, %v5709_v62 }
 0x1e0   : > { %v1764_v25 = vsel %vm1703_vm9, %v1699_v12, %v1261_v63  ;;  %v4197_v0 = vpop.permute.xlu0 %1226  ;;  %v1618_v63 = vsel %vm1573_vm7, %v1553_v29, %v4120_v23  ;;  %v5710_v12 = vld [vmem:[#allocation18_spill] sm:$0xff]  ;;  %v1585_v61 = vsel %vm1573_vm7, %v1520_v7, %v4122_v36  ;;  %v5713_v29 = vld [vmem:[#allocation52_spill] sm:$0xff] }
 0x1e1   : > { %904 = vrot.lane.b32.xlu1 %v5708_v3, %s2562_s29  ;;  %v1731_v60 = vsel %vm1703_vm9, %v1666_v2, %v4197_v0  ;;  %2389 = vmatprep.subr.msk.mxu1 %vm1782_vm10, %v1764_v25  ;;  %v1683_v46 = vsel %vm1638_vm8, %v1618_v63, %v4150_v32  ;;  %v1650_v25 = vsel %vm1638_vm8, %v1585_v61, %v4157_v1  ;;  %v5715_v63 = vld [vmem:[#allocation46_spill] sm:$0xff]  ;;  %v5720_v32 = vld [vmem:[#allocation68_spill] sm:$0xff] }
 0x1e2   : > { %826 = vrot.lane.b32.xlu0 %v5710_v12, %s2561_s28  ;;  %2355 = vmatprep.subr.msk.mxu0 %vm1782_vm10, %v1731_v60  ;;  %v5714_v60 = vld [vmem:[#allocation61_spill] sm:$0xff]  ;;  %v5716_v12 = vld [vmem:[#allocation35_spill] sm:$0xff]  ;;  %v1319_v23 = vsel %vm1304_vm2, %v4084_v42, %v5720_v32  ;;  %v5727_v1 = vld [vmem:[#allocation122_spill] sm:$0xff] }
 0x1e3   : > { %v4219_v2 = vpop.permute.xlu1 %1244  ;;  %v5729_v36 = vld [vmem:[#allocation60_spill] sm:$0xff] }
 0x1e4   : > { %5711 = vst [vmem:[#allocation21_spill] sm:$0xff] %v4219_v2  ;;  %v4223_v55 = vpop.permute.xlu0 %1210  ;;  %v1748_v26 = vsel %vm1703_vm9, %v1683_v46, %v4219_v2  ;;  %v4265_v2 = vld [vmem:[%s2626_s24 + $0xd8] sm:$0xff] }
 0x1e5   : > { %5712 = vst [vmem:[#allocation67_spill] sm:$0xff] %v4223_v55  ;;  %1236 = vrot.lane.b32.xlu1 %v5713_v29, %s2565_s5  ;;  %v1715_v3 = vsel %vm1703_vm9, %v1650_v25, %v4223_v55  ;;  %2390 = vmatpush3.xpose.msk.msra.mxu1 %vm1782_vm10, %v1748_v26  ;;  %v4248_v25 = vld [vmem:[%s2626_s24 + $0x128] sm:$0xff]  ;;  %v4253_v26 = vld [vmem:[%s2626_s24 + $0x80] sm:$0xff] }
 0x1e6   : > { %938 = vrot.lane.b32.xlu0 %v5714_v60, %s2562_s29  ;;  %2356 = vmatpush3.xpose.msk.msra.mxu0 %vm1782_vm10, %v1715_v3  ;;  %v5719_v60 = vld [vmem:[#allocation79_spill] sm:$0xff] }
 0x1e7   : > { %v4235_v62 = vpop.permute.xlu1 %1042 }
 0x1e8   : > { %v4237_v7 = vpop.permute.xlu0 %1008 }
 0x1e9   : > { %922 = vrot.lane.b32.xlu1 %v5715_v63, %s2562_s29  ;;  %v1336_v63 = vsel %vm1304_vm2, %v4106_v39, %v5719_v60  ;;  %v4283_v39 = vsel %vm1341_vm4, %v1319_v23, %v5723_v45 }
 0x1ea   : > { %888 = vrot.lane.b32.xlu0 %v5716_v12, %s2562_s29  ;;  %v4274_v52 = vsel %vm1341_vm4, %v1336_v63, %v5721_v35  ;;  %v1405_v42 = vsel %vm1378_vm3, %v4283_v39, %v3493_v28  ;;  %v5726_v63 = vld [vmem:[#allocation72_spill] sm:$0xff]  ;;  %v1311_v28 = vsel %vm1304_vm2, %v4114_v6, %v5729_v36 }
 0x1eb   : > { %v4243_v61 = vpop.permute.xlu1 %1026  ;;  %5722 = vst [vmem:[#allocation111_spill] sm:$0xff] %v4274_v52  ;;  %v1438_v60 = vsel %vm1378_vm3, %v4274_v52, %v3486_v33  ;;  %v1328_v45 = vsel %vm1304_vm2, %v4127_v31, %v5726_v63  ;;  %v1470_v23 = vsel %vm1443_vm5, %v1405_v42, %v3534_v9  ;;  %v5728_v52 = vld [vmem:[#allocation29_spill] sm:$0xff] }
 0x1ec   : > { %5717 = vst [vmem:[#allocation28_spill] sm:$0xff] %v4243_v61  ;;  %v4245_v46 = vpop.permute.xlu0 %992  ;;  %v1503_v32 = vsel %vm1443_vm5, %v1438_v60, %v3530_v54  ;;  %v5730_v54 = vld [vmem:[#allocation100_spill] sm:$0xff]  ;;  %v1535_v31 = vsel %vm1508_vm6, %v1470_v23, %v3580_v37  ;;  %v5731_v42 = vld [vmem:[#allocation9_spill] sm:$0xff] }
 0x1ed   : > { %5718 = vst [vmem:[#allocation97_spill] sm:$0xff] %v4245_v46  ;;  %744 = vrot.lane.b32.xlu1 %v4248_v25, %s2560_s27  ;;  %v1568_v33 = vsel %vm1508_vm6, %v1503_v32, %v5727_v1  ;;  %v4311_v60 = vsel %vm1341_vm4, %v1328_v45, %v5730_v54  ;;  %v5732_v1 = vld [vmem:[#allocation92_spill] sm:$0xff]  ;;  %v1600_v32 = vsel %vm1573_vm7, %v1535_v31, %v4237_v7 }
 0x1ee   : > { %710 = vrot.lane.b32.xlu0 %v4253_v26, %s2560_s27  ;;  %v1633_v9 = vsel %vm1573_vm7, %v1568_v33, %v4235_v62  ;;  %v1422_v36 = vsel %vm1378_vm3, %v4311_v60, %v3507_v44 }
 0x1ef   : > { %v4257_v29 = vpop.permute.xlu1 %1150  ;;  %v1487_v23 = vsel %vm1443_vm5, %v1422_v36, %v3560_v51 }
 0x1f0   : > { %v4259_v3 = vpop.permute.xlu0 %1116  ;;  %v1698_v37 = vsel %vm1638_vm8, %v1633_v9, %v4257_v29  ;;  %v1552_v31 = vsel %vm1508_vm6, %v1487_v23, %v3606_v38  ;;  %v5733_v9 = vld [vmem:[#allocation19_spill] sm:$0xff] }
 0x1f1   : > { %728 = vrot.lane.b32.xlu1 %v4265_v2, %s2560_s27  ;;  %v1665_v33 = vsel %vm1638_vm8, %v1600_v32, %v4259_v3  ;;  %v5737_v23 = vld [vmem:[#allocation63_spill] sm:$0xff] }
 0x1f2   : > { %694 = vrot.lane.b32.xlu0 %v4277_v49, %s2560_s27 }
 0x1f3   : > { %v4288_v55 = vpop.permute.xlu1 %1134 }
 0x1f4   : > { %5724 = vst [vmem:[#allocation75_spill] sm:$0xff] %v4288_v55  ;;  %v4295_v35 = vpop.permute.xlu0 %1100 }
 0x1f5   : > { %5725 = vst [vmem:[#allocation113_spill] sm:$0xff] %v4295_v35  ;;  %840 = vrot.lane.b32.xlu1 %v5728_v52, %s2561_s28  ;;  %v4321_v52 = vsel %vm1341_vm4, %v1311_v28, %v5732_v1  ;;  %v5734_v1 = vld [vmem:[#allocation2_spill] sm:$0xff] }
 0x1f6   : > { %806 = vrot.lane.b32.xlu0 %v5731_v42, %s2561_s28  ;;  %v1389_v45 = vsel %vm1378_vm3, %v4321_v52, %v3509_v40  ;;  %v1617_v42 = vsel %vm1573_vm7, %v1552_v31, %v4243_v61  ;;  %v5739_v31 = vld [vmem:[#allocation48_spill] sm:$0xff]  ;;  %v5751_v61 = vld [vmem:[#allocation54_spill] sm:$0xff] }
 0x1f7   : > { %v4330_v63 = vpop.permute.xlu1 %1258  ;;  %v1454_v54 = vsel %vm1443_vm5, %v1389_v45, %v3562_v19  ;;  %v1682_v38 = vsel %vm1638_vm8, %v1617_v42, %v4288_v55  ;;  %v4392_v42 = vld [vmem:[%s2626_s24 + $0x120] sm:$0xff]  ;;  %v5746_v55 = vld [vmem:[#allocation95_spill] sm:$0xff] }
 0x1f8   : > { %v1763_v44 = vsel %vm1703_vm9, %v1698_v37, %v4330_v63  ;;  %v4341_v28 = vpop.permute.xlu0 %1224  ;;  %v1519_v51 = vsel %vm1508_vm6, %v1454_v54, %v3611_v41 }
 0x1f9   : > { %v1730_v40 = vsel %vm1703_vm9, %v1665_v33, %v4341_v28  ;;  %824 = vrot.lane.b32.xlu1 %v5733_v9, %s2561_s28  ;;  %2391 = vmatprep.subr.msk.mxu1 %vm1782_vm10, %v1763_v44  ;;  %v1584_v19 = vsel %vm1573_vm7, %v1519_v51, %v4245_v46  ;;  %v5738_v33 = vld [vmem:[#allocation38_spill] sm:$0xff] }
 0x1fa   : > { %790 = vrot.lane.b32.xlu0 %v5734_v1, %s2561_s28  ;;  %2357 = vmatprep.subr.msk.mxu0 %vm1782_vm10, %v1730_v40  ;;  %v1649_v41 = vsel %vm1638_vm8, %v1584_v19, %v4295_v35  ;;  %v5740_v40 = vld [vmem:[#allocation32_spill] sm:$0xff]  ;;  %v4397_v19 = vld [vmem:[%s2626_s24 + $0x78] sm:$0xff]  ;;  %v4421_v35 = vld [vmem:[%s2626_s24 + $0x28] sm:$0xff] }
 0x1fb   : > { %v4363_v36 = vpop.permute.xlu1 %1242 }
 0x1fc   : > { %5735 = vst [vmem:[#allocation5_spill] sm:$0xff] %v4363_v36  ;;  %v1747_v32 = vsel %vm1703_vm9, %v1682_v38, %v4363_v36  ;;  %v4369_v37 = vpop.permute.xlu0 %1208 }
 0x1fd   : > { %5736 = vst [vmem:[#allocation58_spill] sm:$0xff] %v4369_v37  ;;  %v1714_v45 = vsel %vm1703_vm9, %v1649_v41, %v4369_v37  ;;  %936 = vrot.lane.b32.xlu1 %v5737_v23, %s2562_s29  ;;  %2392 = vmatpush3.xpose.msk.msra.mxu1 %vm1782_vm10, %v1747_v32  ;;  %v5742_v32 = vld [vmem:[#allocation80_spill] sm:$0xff]  ;;  %v5744_v37 = vld [vmem:[#allocation109_spill] sm:$0xff] }
 0x1fe   : > { %902 = vrot.lane.b32.xlu0 %v5738_v33, %s2562_s29  ;;  %2358 = vmatpush3.xpose.msk.msra.mxu0 %vm1782_vm10, %v1714_v45  ;;  %v1335_v45 = vsel %vm1304_vm2, %v4248_v25, %v5742_v32  ;;  %v4409_v23 = vld [vmem:[%s2626_s24 + $0xd0] sm:$0xff]  ;;  %v5743_v33 = vld [vmem:[#allocation65_spill] sm:$0xff] }
 0x1ff   : > { %v4379_v44 = vpop.permute.xlu1 %1040  ;;  %v4418_v36 = vsel %vm1341_vm4, %v1335_v45, %v5744_v37 }
 0x200   : > { %v4381_v54 = vpop.permute.xlu0 %1006  ;;  %5745 = vst [vmem:[#allocation114_spill] sm:$0xff] %v4418_v36  ;;  %v1437_v32 = vsel %vm1378_vm3, %v4418_v36, %v3623_v5  ;;  %v5750_v36 = vld [vmem:[#allocation24_spill] sm:$0xff] }
 0x201   : > { %920 = vrot.lane.b32.xlu1 %v5739_v31, %s2562_s29  ;;  %v1318_v31 = vsel %vm1304_vm2, %v4253_v26, %v5743_v33  ;;  %v1502_v37 = vsel %vm1443_vm5, %v1437_v32, %v3656_v24  ;;  %v5749_v33 = vld [vmem:[#allocation73_spill] sm:$0xff]  ;;  %v5752_v24 = vld [vmem:[#allocation102_spill] sm:$0xff] }
 0x202   : > { %886 = vrot.lane.b32.xlu0 %v5740_v40, %s2562_s29  ;;  %v4427_v25 = vsel %vm1341_vm4, %v1318_v31, %v5746_v55  ;;  %v1327_v55 = vsel %vm1304_vm2, %v4265_v2, %v5749_v33  ;;  %v1567_v5 = vsel %vm1508_vm6, %v1502_v37, %v3739_v10  ;;  %v5754_v10 = vld [vmem:[#allocation89_spill] sm:$0xff] }
 0x203   : > { %v4387_v9 = vpop.permute.xlu1 %1024  ;;  %v1404_v26 = vsel %vm1378_vm3, %v4427_v25, %v3625_v14  ;;  %v1310_v14 = vsel %vm1304_vm2, %v4277_v49, %v5751_v61  ;;  %v4455_v32 = vsel %vm1341_vm4, %v1327_v55, %v5752_v24 }
 0x204   : > { %v4389_v51 = vpop.permute.xlu0 %990  ;;  %v1469_v31 = vsel %vm1443_vm5, %v1404_v26, %v3658_v30  ;;  %v1632_v30 = vsel %vm1573_vm7, %v1567_v5, %v4379_v44  ;;  %v5753_v26 = vld [vmem:[#allocation10_spill] sm:$0xff]  ;;  %v1421_v61 = vsel %vm1378_vm3, %v4455_v32, %v5641_v4 }
 0x205   : > { %5741 = vst [vmem:[#allocation104_spill] sm:$0xff] %v4389_v51  ;;  %742 = vrot.lane.b32.xlu1 %v4392_v42, %s2560_s27  ;;  %v1534_v2 = vsel %vm1508_vm6, %v1469_v31, %v3746_v43  ;;  %v1486_v31 = vsel %vm1443_vm5, %v1421_v61, %v3713_v57 }
 0x206   : > { %708 = vrot.lane.b32.xlu0 %v4397_v19, %s2560_s27  ;;  %v1599_v37 = vsel %vm1573_vm7, %v1534_v2, %v4381_v54  ;;  %v1551_v2 = vsel %vm1508_vm6, %v1486_v31, %v3789_v53  ;;  %v5759_v31 = vld [vmem:[#allocation57_spill] sm:$0xff] }
 0x207   : > { %v4401_v38 = vpop.permute.xlu1 %1148 }
 0x208   : > { %v4403_v41 = vpop.permute.xlu0 %1114  ;;  %v1697_v43 = vsel %vm1638_vm8, %v1632_v30, %v4401_v38  ;;  %v5755_v30 = vld [vmem:[#allocation15_spill] sm:$0xff] }
 0x209   : > { %726 = vrot.lane.b32.xlu1 %v4409_v23, %s2560_s27  ;;  %v1664_v5 = vsel %vm1638_vm8, %v1599_v37, %v4403_v41 }
 0x20a   : > { %692 = vrot.lane.b32.xlu0 %v4421_v35, %s2560_s27 }
 0x20b   : > { %v4432_v46 = vpop.permute.xlu1 %1132 }
 0x20c   : > { %5747 = vst [vmem:[#allocation119_spill] sm:$0xff] %v4432_v46  ;;  %v4439_v45 = vpop.permute.xlu0 %1098 }
 0x20d   : > { %5748 = vst [vmem:[#allocation91_spill] sm:$0xff] %v4439_v45  ;;  %838 = vrot.lane.b32.xlu1 %v5750_v36, %s2561_s28  ;;  %v4465_v36 = vsel %vm1341_vm4, %v1310_v14, %v5754_v10  ;;  %v5756_v10 = vld [vmem:[#allocation3_spill] sm:$0xff] }
 0x20e   : > { %804 = vrot.lane.b32.xlu0 %v5753_v26, %s2561_s28  ;;  %v1388_v55 = vsel %vm1378_vm3, %v4465_v36, %v3649_v11  ;;  %v1616_v26 = vsel %vm1573_vm7, %v1551_v2, %v4387_v9  ;;  %v5761_v2 = vld [vmem:[#allocation44_spill] sm:$0xff] }
 0x20f   : > { %v4474_v33 = vpop.permute.xlu1 %1256  ;;  %v1453_v24 = vsel %vm1443_vm5, %v1388_v55, %v3715_v50  ;;  %v1681_v53 = vsel %vm1638_vm8, %v1616_v26, %v4432_v46  ;;  %v4534_v26 = vld [vmem:[%s2626_s24 + $0xc8] sm:$0xff] }
 0x210   : > { %v1762_v4 = vsel %vm1703_vm9, %v1697_v43, %v4474_v33  ;;  %v4485_v14 = vpop.permute.xlu0 %1222  ;;  %v1518_v57 = vsel %vm1508_vm6, %v1453_v24, %v3779_v48 }
 0x211   : > { %v1729_v11 = vsel %vm1703_vm9, %v1664_v5, %v4485_v14  ;;  %822 = vrot.lane.b32.xlu1 %v5755_v30, %s2561_s28  ;;  %2393 = vmatprep.subr.msk.mxu1 %vm1782_vm10, %v1762_v4  ;;  %v1583_v50 = vsel %vm1573_vm7, %v1518_v57, %v4389_v51  ;;  %v5760_v5 = vld [vmem:[#allocation39_spill] sm:$0xff]  ;;  %v5770_v51 = vld [vmem:[#allocation77_spill] sm:$0xff] }
 0x212   : > { %788 = vrot.lane.b32.xlu0 %v5756_v10, %s2561_s28  ;;  %2359 = vmatprep.subr.msk.mxu0 %vm1782_vm10, %v1729_v11  ;;  %v1648_v48 = vsel %vm1638_vm8, %v1583_v50, %v4439_v45  ;;  %v5762_v11 = vld [vmem:[#allocation33_spill] sm:$0xff] }
 0x213   : > { %v4507_v61 = vpop.permute.xlu1 %1240  ;;  %v4539_v50 = vld [vmem:[%s2626_s24 + $0x118] sm:$0xff] }
 0x214   : > { %5757 = vst [vmem:[#allocation110_spill] sm:$0xff] %v4507_v61  ;;  %v1746_v37 = vsel %vm1703_vm9, %v1681_v53, %v4507_v61  ;;  %v4513_v43 = vpop.permute.xlu0 %1206  ;;  %v5766_v61 = vld [vmem:[#allocation96_spill] sm:$0xff] }
 0x215   : > { %5758 = vst [vmem:[#allocation112_spill] sm:$0xff] %v4513_v43  ;;  %v1713_v55 = vsel %vm1703_vm9, %v1648_v48, %v4513_v43  ;;  %934 = vrot.lane.b32.xlu1 %v5759_v31, %s2562_s29  ;;  %2394 = vmatpush3.xpose.msk.msra.mxu1 %vm1782_vm10, %v1746_v37  ;;  %v5763_v37 = vld [vmem:[#allocation16_spill] sm:$0xff]  ;;  %v5765_v43 = vld [vmem:[#allocation45_spill] sm:$0xff] }
 0x216   : > { %900 = vrot.lane.b32.xlu0 %v5760_v5, %s2562_s29  ;;  %2360 = vmatpush3.xpose.msk.msra.mxu0 %vm1782_vm10, %v1713_v55  ;;  %v5764_v5 = vld [vmem:[#allocation66_spill] sm:$0xff] }
 0x217   : > { %v4523_v4 = vpop.permute.xlu1 %1038 }
 0x218   : > { %v4525_v24 = vpop.permute.xlu0 %1004 }
 0x219   : > { %918 = vrot.lane.b32.xlu1 %v5761_v2, %s2562_s29  ;;  %v1317_v2 = vsel %vm1304_vm2, %v4397_v19, %v5764_v5  ;;  %v5768_v5 = vld [vmem:[#allocation14_spill] sm:$0xff] }
 0x21a   : > { %884 = vrot.lane.b32.xlu0 %v5762_v11, %s2562_s29  ;;  %v4562_v45 = vsel %vm1341_vm4, %v1317_v2, %v5766_v61 }
 0x21b   : > { %v4531_v30 = vpop.permute.xlu1 %988  ;;  %5767 = vst [vmem:[#allocation41_spill] sm:$0xff] %v4562_v45 }
 0x21c   : > { %v715_v57 = vpop.permute.xlu0 %714 }
 0x21d   : > { %724 = vrot.lane.b32.xlu1 %v4534_v26, %s2560_s27 }
 0x21e   : > { %740 = vrot.lane.b32.xlu0 %v4539_v50, %s2560_s27 }
 0x21f   : > { %v4543_v53 = vpop.permute.xlu1 %1112 }
 0x220   : > { %v4545_v48 = vpop.permute.xlu0 %1022 }
 0x221   : > { %820 = vrot.lane.b32.xlu1 %v5763_v37, %s2561_s28 }
 0x222   : > { %836 = vrot.lane.b32.xlu0 %v5613_v16, %s2561_s28  ;;  %v1403_v16 = vsel %vm1378_vm3, %v4562_v45, %v3794_v59  ;;  %v1334_v59 = vsel %vm1304_vm2, %v4392_v42, %v5770_v51 }
 0x223   : > { %v4551_v55 = vpop.permute.xlu1 %698  ;;  %v1468_v19 = vsel %vm1443_vm5, %v1403_v16, %v3822_v22  ;;  %v5771_v22 = vld [vmem:[#allocation106_spill] sm:$0xff] }
 0x224   : > { %v4553_v31 = vpop.permute.xlu0 %1146  ;;  %v1533_v61 = vsel %vm1508_vm6, %v1468_v19, %v3896_v17  ;;  %v4589_v16 = vsel %vm1341_vm4, %v1334_v59, %v5771_v22 }
 0x225   : > { %916 = vrot.lane.b32.xlu1 %v5765_v43, %s2562_s29  ;;  %v1398_v43 = vsel %vm1378_vm3, %v5768_v5, %v715_v57  ;;  %v1598_v45 = vsel %vm1573_vm7, %v1533_v61, %v4525_v24  ;;  %v1436_v5 = vsel %vm1378_vm3, %v4589_v16, %v3802_v58  ;;  %v5775_v58 = vld [vmem:[#allocation87_spill] sm:$0xff] }
 0x226   : > { %932 = vrot.lane.b32.xlu0 %v5618_v21, %s2562_s29  ;;  %v5769_v21 = vld [vmem:[#allocation4_spill] sm:$0xff]  ;;  %v1663_v17 = vsel %vm1638_vm8, %v1598_v45, %v4543_v53  ;;  %v1501_v45 = vsel %vm1443_vm5, %v1436_v5, %v3843_v34 }
 0x227   : > { %v4569_v37 = vpop.permute.xlu1 %1096 }
 0x228   : > { %v811_v46 = vpop.permute.xlu0 %810 }
 0x229   : > { %v1463_v2 = vsel %vm1443_vm5, %v1398_v43, %v811_v46  ;;  %1094 = vrot.lane.b32.xlu1 %v5769_v21, %s2564_s4  ;;  %v2514_v43 = vld [vmem:[%s2626_s24 + $0x18] sm:$0xff]  ;;  %v5774_v21 = vld [vmem:[#allocation56_spill] sm:$0xff] }
 0x22a   : > { %986 = vrot.lane.b32.xlu0 %v3973_v8, %s2563_s30  ;;  %v5773_v8 = vld [vmem:[#allocation51_spill] sm:$0xff]  ;;  %v1309_v59 = vsel %vm1304_vm2, %v4421_v35, %v5774_v21 }
 0x22b   : > { %v4593_v19 = vpop.permute.xlu1 %1220  ;;  %v1308_v61 = vsel %vm1304_vm2, %v2514_v43, %v5773_v8  ;;  %v1566_v43 = vsel %vm1508_vm6, %v1501_v45, %v3923_v27  ;;  %v4633_v8 = vld [vmem:[%s5265_s1] sm:$0xff]  ;;  %v5778_v27 = vld [vmem:[#allocation140_spill] sm:$0xff] }
 0x22c   : > { %5772 = vst [vmem:[#allocation116_spill] sm:$0xff] %v4593_v19  ;;  %v1728_v51 = vsel %vm1703_vm9, %v1663_v17, %v4593_v19  ;;  %v4600_v42 = vpop.permute.xlu0 %1130  ;;  %v1345_v22 = vsel %vm1341_vm4, %v1308_v61, %v5775_v58  ;;  %v5776_v17 = vld [vmem:[#allocation90_spill] sm:$0xff]  ;;  %5777 = vst [vmem:[#allocation18_spill] sm:$0xff] %v4633_v8  ;;  %2415 = vmatprep.mubr.msk.f32.mxu1 %vm1782_vm10, %v4633_v8  ;;  %2379 = vmatprep.mubr.msk.f32.mxu0 %vm1782_vm10, %v4633_v8 }
 0x22d   : > { %984 = vrot.lane.b32.xlu1 %v4114_v6, %s2563_s30  ;;  %2361 = vmatprep.subr.msk.mxu0 %vm1782_vm10, %v1728_v51  ;;  %v4617_v19 = vsel %vm1341_vm4, %v1309_v59, %v5776_v17  ;;  %v1631_v6 = vsel %vm1573_vm7, %v1566_v43, %v4523_v4  ;;  %v1382_v5 = vsel %vm1378_vm3, %v1345_v22, %v4551_v55  ;;  %v5779_v59 = vld [vmem:[#allocation105_spill] sm:$0xff]  ;;  %v5780_v22 = vld [vmem:[#allocation70_spill] sm:$0xff] }
 0x22e   : > { %1202 = vrot.lane.b32.xlu0 %v5675_v15, %s2565_s5  ;;  %v1387_v34 = vsel %vm1378_vm3, %v4617_v19, %v3816_v18  ;;  %v1696_v15 = vsel %vm1638_vm8, %v1631_v6, %v4553_v31  ;;  %v1326_v17 = vsel %vm1304_vm2, %v4409_v23, %v5780_v22  ;;  %v5783_v23 = vld [vmem:[#allocation136_spill] sm:$0xff] }
 0x22f   : > { %v795_v51 = vpop.permute.xlu1 %794  ;;  %v1452_v61 = vsel %vm1443_vm5, %v1387_v34, %v5778_v27  ;;  %v5781_v34 = vld [vmem:[#allocation23_spill] sm:$0xff] }
 0x230   : > { %v1447_v18 = vsel %vm1443_vm5, %v1382_v5, %v795_v51  ;;  %v4640_v21 = vpop.permute.xlu0 %1254  ;;  %v1517_v45 = vsel %vm1508_vm6, %v1452_v61, %v5779_v59  ;;  %v4662_v6 = vsel %vm1341_vm4, %v1326_v17, %v5781_v34  ;;  %v5782_v5 = vld [vmem:[#allocation103_spill] sm:$0xff]  ;;  %v1386_v34 = vsel %vm1378_vm3, %v4181_v47, %v4551_v55 }
 0x231   : > { %v1761_v58 = vsel %vm1703_vm9, %v1696_v15, %v4640_v21  ;;  %1200 = vrot.lane.b32.xlu1 %v5716_v12, %s2565_s5  ;;  %v1582_v43 = vsel %vm1573_vm7, %v1517_v45, %v4531_v30  ;;  %v1402_v27 = vsel %vm1378_vm3, %v5782_v5, %v715_v57  ;;  %v1420_v15 = vsel %vm1378_vm3, %v4662_v6, %v5783_v23 }
 0x232   : > { %1092 = vrot.lane.b32.xlu0 %v5699_v56, %s2564_s4  ;;  %2395 = vmatprep.subr.msk.mxu1 %vm1782_vm10, %v1761_v58  ;;  %v1647_v12 = vsel %vm1638_vm8, %v1582_v43, %v4569_v37  ;;  %v1467_v56 = vsel %vm1443_vm5, %v1402_v27, %v811_v46  ;;  %v5784_v58 = vld [vmem:[#allocation93_spill] sm:$0xff]  ;;  %v5785_v43 = vld [vmem:[#allocation42_spill] sm:$0xff] }
 0x233   : > { %v4668_v61 = vpop.permute.xlu1 %1204  ;;  %v1485_v22 = vsel %vm1443_vm5, %v1420_v15, %v5784_v58  ;;  %v5786_v15 = vld [vmem:[#allocation50_spill] sm:$0xff]  ;;  %v2566_v58 = vmov 0  }
 0x234   : > { %v1712_v59 = vsel %vm1703_vm9, %v1647_v12, %v4668_v61  ;;  %v907_v45 = vpop.permute.xlu0 %906  ;;  %v1550_v46 = vsel %vm1508_vm6, %v1485_v22, %v5785_v43  ;;  %2469 = vset.pattern.permute.xlu0 %v2566_v58  ;;  %2470 = vset.pattern.permute.xlu1 %v2566_v58 }
 0x235   : > { %v4679_v57 = vsel %vm1508_vm6, %v1463_v2, %v907_v45  ;;  %v1532_v17 = vsel %vm1508_vm6, %v1467_v56, %v907_v45  ;;  %1090 = vrot.lane.b32.xlu1 %v5734_v1, %s2564_s4  ;;  %2362 = vmatpush3.xpose.msk.msra.mxu0 %vm1782_vm10, %v1712_v59  ;;  %v1615_v2 = vsel %vm1573_vm7, %v1550_v46, %v4545_v48  ;;  %v5788_v59 = vld [vmem:[#allocation67_spill] sm:$0xff] }
 0x236   : > { %v1597_v5 = vsel %vm1573_vm7, %v1532_v17, %v4111_v20  ;;  %982 = vrot.lane.b32.xlu0 %v4277_v49, %s2563_s30  ;;  %v1451_v1 = vsel %vm1443_vm5, %v1386_v34, %v795_v51  ;;  %v1680_v23 = vsel %vm1638_vm8, %v1615_v2, %v4600_v42  ;;  %v1771_v17 = vld [vmem:[%s5266_s2 + $0x8] sm:$0xff] }
 0x237   : > { %v891_v27 = vpop.permute.xlu1 %890  ;;  %v1662_v12 = vsel %vm1638_vm8, %v1597_v5, %v4131_v13  ;;  %v5787_v13 = vld [vmem:[#allocation12_spill] sm:$0xff] }
 0x238   : > { %v4702_v47 = vsel %vm1508_vm6, %v1447_v18, %v891_v27  ;;  %v1516_v20 = vsel %vm1508_vm6, %v1451_v1, %v891_v27  ;;  %v4705_v55 = vpop.permute.xlu0 %1238  ;;  %v1727_v49 = vsel %vm1703_vm9, %v1662_v12, %v4197_v0  ;;  %v5790_v27 = vld [vmem:[#allocation78_spill] sm:$0xff] }
 0x239   : > { %v1581_v51 = vsel %vm1573_vm7, %v1516_v20, %v5786_v15  ;;  %v1745_v56 = vsel %vm1703_vm9, %v1680_v23, %v4705_v55  ;;  %2363 = vmatprep.subr.msk.mxu0 %vm1782_vm10, %v1727_v49  ;;  %980 = vrot.lane.b32.xlu1 %v4421_v35, %s2563_s30  ;;  %v1770_v35 = vld [vmem:[%s5266_s2] sm:$0xff]  ;;  %v1333_v12 = vsel %vm1304_vm2, %v4539_v50, %v5790_v27  ;;  %v5791_v23 = vld [vmem:[#allocation107_spill] sm:$0xff]  ;;  %v5792_v15 = vld [vmem:[#allocation36_spill] sm:$0xff] }
 0x23a   : > { %1198 = vrot.lane.b32.xlu0 %v5740_v40, %s2565_s5  ;;  %2396 = vmatpush3.xpose.msk.msra.mxu1 %vm1782_vm10, %v1745_v56  ;;  %v1646_v18 = vsel %vm1638_vm8, %v1581_v51, %v5787_v13  ;;  %v4748_v20 = vsel %vm1341_vm4, %v1333_v12, %v5791_v23  ;;  %v5793_v56 = vld [vmem:[#allocation25_spill] sm:$0xff]  ;;  %v5797_v27 = vld [vmem:[#allocation94_spill] sm:$0xff] }
 0x23b   : > { %v713_v0 = vpop.permute.xlu1 %712  ;;  %v1711_v45 = vsel %vm1703_vm9, %v1646_v18, %v5788_v59  ;;  %v1435_v51 = vsel %vm1378_vm3, %v4748_v20, %v5792_v15  ;;  %v2515_v59 = vld [vmem:[%s2626_s24 + $0x10] sm:$0xff] }
 0x23c   : > { %v4723_v22 = vpop.permute.xlu0 %1036  ;;  %2364 = vmatpush3.xpose.msk.msra.mxu0 %vm1782_vm10, %v1711_v45  ;;  %v5794_v45 = vld [vmem:[#allocation47_spill] sm:$0xff] }
 0x23d   : > { %1196 = vrot.lane.b32.xlu1 %v5762_v11, %s2565_s5  ;;  %v5789_v11 = vld [vmem:[#allocation130_spill] sm:$0xff]  ;;  %v1307_v58 = vsel %vm1304_vm2, %v2515_v59, %v5794_v45 }
 0x23e   : > { %1088 = vrot.lane.b32.xlu0 %v5756_v10, %s2564_s4  ;;  %v1397_v10 = vsel %vm1378_vm3, %v5789_v11, %v713_v0  ;;  %v5796_v11 = vld [vmem:[#allocation88_spill] sm:$0xff] }
 0x23f   : > { %v4733_v40 = vpop.permute.xlu1 %1020 }
 0x240   : > { %v747_v43 = vpop.permute.xlu0 %746 }
 0x241   : > { %1774 = vperm.xlu1 %2470, %v1770_v35   ;;  %v1430_v13 = vsel %vm1378_vm3, %v5793_v56, %v747_v43  ;;  %v5795_v35 = vld [vmem:[#allocation43_spill] sm:$0xff] }
 0x242   : > { %1779 = vperm.xlu0 %2469, %v1771_v17   ;;  %v1500_v50 = vsel %vm1443_vm5, %v1435_v51, %v5795_v35 }
 0x243   : > { %v697_v46 = vpop.permute.xlu1 %696  ;;  %v1565_v12 = vsel %vm1508_vm6, %v1500_v50, %v5797_v27  ;;  %v5799_v50 = vld [vmem:[#allocation26_spill] sm:$0xff]  ;;  %v5800_v27 = vld [vmem:[#allocation7_spill] sm:$0xff] }
 0x244   : > { %v4738_v34 = vpop.permute.xlu0 %1144  ;;  %v1630_v23 = vsel %vm1573_vm7, %v1565_v12, %v4723_v22 }
 0x245   : > { %v1695_v59 = vsel %vm1638_vm8, %v1630_v23, %v4738_v34 }
 0x247   : > { %v809_v5 = vpop.permute.xlu1 %808 }
 0x248   : > { %v1462_v2 = vsel %vm1443_vm5, %v1397_v10, %v809_v5  ;;  %v731_v1 = vpop.permute.xlu0 %730  ;;  %v1344_v10 = vsel %vm1341_vm4, %v1307_v58, %v5796_v11 }
 0x249   : > { %v1381_v15 = vsel %vm1378_vm3, %v1344_v10, %v697_v46  ;;  %v1401_v10 = vsel %vm1378_vm3, %v4283_v39, %v713_v0 }
 0x24a   : > { %v1466_v23 = vsel %vm1443_vm5, %v1401_v10, %v809_v5 }
 0x24b   : > { %v4750_v49 = vpop.permute.xlu1 %1128 }
 0x24c   : > { %v843_v18 = vpop.permute.xlu0 %842 }
 0x24d   : > { %v1495_v17 = vsel %vm1443_vm5, %v1430_v13, %v843_v18  ;;  %v5798_v13 = vld [vmem:[#allocation71_spill] sm:$0xff] }
 0x24e   : > { %v1325_v58 = vsel %vm1304_vm2, %v4534_v26, %v5798_v13  ;;  %v5801_v26 = vld [vmem:[#allocation101_spill] sm:$0xff] }
 0x24f   : > { %v793_v56 = vpop.permute.xlu1 %792  ;;  %v4782_v11 = vsel %vm1341_vm4, %v1325_v58, %v5799_v50 }
 0x250   : > { %v1446_v45 = vsel %vm1443_vm5, %v1381_v15, %v793_v56  ;;  %v4773_v51 = vpop.permute.xlu0 %1252  ;;  %v1419_v12 = vsel %vm1378_vm3, %v4782_v11, %v5800_v27 }
 0x251   : > { %v1760_v35 = vsel %vm1703_vm9, %v1695_v59, %v4773_v51  ;;  %v1484_v13 = vsel %vm1443_vm5, %v1419_v12, %v5801_v26  ;;  %v5802_v59 = vld [vmem:[#allocation27_spill] sm:$0xff] }
 0x252   : > { %2397 = vmatprep.subr.msk.mxu1 %vm1782_vm10, %v1760_v35  ;;  %v1414_v8 = vsel %vm1378_vm3, %v5802_v59, %v731_v1  ;;  %v5803_v35 = vld [vmem:[#allocation40_spill] sm:$0xff]  ;;  %v5804_v26 = vld [vmem:[#allocation111_spill] sm:$0xff] }
 0x253   : > { %v905_v15 = vpop.permute.xlu1 %904  ;;  %v1549_v50 = vsel %vm1508_vm6, %v1484_v13, %v5803_v35 }
 0x254   : > { %v4796_v58 = vsel %vm1508_vm6, %v1462_v2, %v905_v15  ;;  %v1531_v39 = vsel %vm1508_vm6, %v1466_v23, %v905_v15  ;;  %v827_v0 = vpop.permute.xlu0 %826  ;;  %v1614_v10 = vsel %vm1573_vm7, %v1549_v50, %v4733_v40  ;;  %v1434_v2 = vsel %vm1378_vm3, %v5804_v26, %v747_v43 }
 0x255   : > { %v1596_v27 = vsel %vm1573_vm7, %v1531_v39, %v4237_v7  ;;  %v1479_v5 = vsel %vm1443_vm5, %v1414_v8, %v827_v0  ;;  %v1679_v23 = vsel %vm1638_vm8, %v1614_v10, %v4750_v49  ;;  %v1499_v7 = vsel %vm1443_vm5, %v1434_v2, %v843_v18 }
 0x256   : > { %v1661_v12 = vsel %vm1638_vm8, %v1596_v27, %v4259_v3  ;;  %v1418_v39 = vsel %vm1378_vm3, %v4311_v60, %v731_v1  ;;  %v1385_v18 = vsel %vm1378_vm3, %v4321_v52, %v697_v46  ;;  %v5805_v1 = vld [vmem:[#allocation28_spill] sm:$0xff] }
 0x257   : > { %v4812_v15 = vpop.permute.xlu1 %1236  ;;  %v1726_v13 = vsel %vm1703_vm9, %v1661_v12, %v4341_v28  ;;  %v1483_v35 = vsel %vm1443_vm5, %v1418_v39, %v827_v0  ;;  %v1450_v27 = vsel %vm1443_vm5, %v1385_v18, %v793_v56 }
 0x258   : > { %v1744_v8 = vsel %vm1703_vm9, %v1679_v23, %v4812_v15  ;;  %v939_v59 = vpop.permute.xlu0 %938  ;;  %2365 = vmatprep.subr.msk.mxu0 %vm1782_vm10, %v1726_v13  ;;  %v5808_v23 = vld [vmem:[#allocation113_spill] sm:$0xff] }
 0x259   : > { %v4821_v3 = vsel %vm1508_vm6, %v1495_v17, %v939_v59  ;;  %v1564_v43 = vsel %vm1508_vm6, %v1499_v7, %v939_v59  ;;  %2398 = vmatpush3.xpose.msk.msra.mxu1 %vm1782_vm10, %v1744_v8  ;;  %v5809_v13 = vld [vmem:[#allocation5_spill] sm:$0xff]  ;;  %v5810_v8 = vld [vmem:[#allocation58_spill] sm:$0xff] }
 0x25a   : > { %v1629_v28 = vsel %vm1573_vm7, %v1564_v43, %v4235_v62 }
 0x25b   : > { %v923_v50 = vpop.permute.xlu1 %922  ;;  %v1694_v17 = vsel %vm1638_vm8, %v1629_v28, %v4257_v29  ;;  %v5806_v29 = vld [vmem:[#allocation97_spill] sm:$0xff] }
 0x25c   : > { %v4836_v10 = vsel %vm1508_vm6, %v1479_v5, %v923_v50  ;;  %v1548_v12 = vsel %vm1508_vm6, %v1483_v35, %v923_v50  ;;  %v889_v60 = vpop.permute.xlu0 %888  ;;  %v1759_v62 = vsel %vm1703_vm9, %v1694_v17, %v4330_v63  ;;  %v5807_v5 = vld [vmem:[#allocation75_spill] sm:$0xff]  ;;  %v5811_v17 = vld [vmem:[#allocation114_spill] sm:$0xff] }
 0x25d   : > { %v1613_v52 = vsel %vm1573_vm7, %v1548_v12, %v5805_v1  ;;  %v4844_v46 = vsel %vm1508_vm6, %v1446_v45, %v889_v60  ;;  %v1515_v0 = vsel %vm1508_vm6, %v1450_v27, %v889_v60  ;;  %2399 = vmatprep.subr.msk.mxu1 %vm1782_vm10, %v1759_v62 }
 0x25e   : > { %v1580_v56 = vsel %vm1573_vm7, %v1515_v0, %v5806_v29  ;;  %v1678_v26 = vsel %vm1638_vm8, %v1613_v52, %v5807_v5 }
 0x25f   : > { %v4852_v2 = vpop.permute.xlu1 %744  ;;  %v1645_v63 = vsel %vm1638_vm8, %v1580_v56, %v5808_v23  ;;  %v1743_v7 = vsel %vm1703_vm9, %v1678_v26, %v5809_v13 }
 0x260   : > { %v4858_v45 = vpop.permute.xlu0 %710  ;;  %v1710_v59 = vsel %vm1703_vm9, %v1645_v63, %v5810_v8  ;;  %2400 = vmatpush3.xpose.msk.msra.mxu1 %vm1782_vm10, %v1743_v7  ;;  %v1433_v27 = vsel %vm1378_vm3, %v5811_v17, %v4852_v2  ;;  %v5813_v17 = vld [vmem:[#allocation119_spill] sm:$0xff] }
 0x261   : > { %2366 = vmatpush3.xpose.msk.msra.mxu0 %vm1782_vm10, %v1710_v59  ;;  %v1400_v12 = vsel %vm1378_vm3, %v4427_v25, %v4858_v45 }
 0x263   : > { %v4864_v43 = vpop.permute.xlu1 %728 }
 0x264   : > { %v4866_v39 = vpop.permute.xlu0 %694  ;;  %v1417_v25 = vsel %vm1378_vm3, %v4455_v32, %v4864_v43 }
 0x265   : > { %v1384_v23 = vsel %vm1378_vm3, %v4465_v36, %v4866_v39 }
 0x267   : > { %v4868_v28 = vpop.permute.xlu1 %840 }
 0x268   : > { %v4870_v18 = vpop.permute.xlu0 %806  ;;  %v1498_v60 = vsel %vm1443_vm5, %v1433_v27, %v4868_v28 }
 0x269   : > { %v1465_v1 = vsel %vm1443_vm5, %v1400_v12, %v4870_v18 }
 0x26b   : > { %v4872_v35 = vpop.permute.xlu1 %824 }
 0x26c   : > { %v4874_v50 = vpop.permute.xlu0 %790 }
 0x26f   : > { %v4884_v62 = vpop.permute.xlu1 %936 }
 0x270   : > { %v1563_v52 = vsel %vm1508_vm6, %v1498_v60, %v4884_v62  ;;  %v4890_v0 = vpop.permute.xlu0 %902  ;;  %v5814_v60 = vld [vmem:[#allocation91_spill] sm:$0xff] }
 0x271   : > { %v1628_v29 = vsel %vm1573_vm7, %v1563_v52, %v4379_v44  ;;  %v1530_v56 = vsel %vm1508_vm6, %v1465_v1, %v4890_v0  ;;  %v1482_v44 = vsel %vm1443_vm5, %v1417_v25, %v4872_v35  ;;  %v5815_v1 = vld [vmem:[#allocation110_spill] sm:$0xff] }
 0x272   : > { %v1595_v5 = vsel %vm1573_vm7, %v1530_v56, %v4381_v54  ;;  %v1693_v26 = vsel %vm1638_vm8, %v1628_v29, %v4401_v38  ;;  %v1449_v54 = vsel %vm1443_vm5, %v1384_v23, %v4874_v50  ;;  %v5816_v29 = vld [vmem:[#allocation112_spill] sm:$0xff] }
 0x273   : > { %v4908_v63 = vpop.permute.xlu1 %920  ;;  %v1660_v13 = vsel %vm1638_vm8, %v1595_v5, %v4403_v41  ;;  %v1758_v32 = vsel %vm1703_vm9, %v1693_v26, %v4474_v33  ;;  %v5812_v33 = vld [vmem:[#allocation104_spill] sm:$0xff] }
 0x274   : > { %v1547_v38 = vsel %vm1508_vm6, %v1482_v44, %v4908_v63  ;;  %v4918_v7 = vpop.permute.xlu0 %886  ;;  %v1725_v36 = vsel %vm1703_vm9, %v1660_v13, %v4485_v14  ;;  %2401 = vmatprep.subr.msk.mxu1 %vm1782_vm10, %v1758_v32 }
 0x275   : > { %v1612_v8 = vsel %vm1573_vm7, %v1547_v38, %v4387_v9  ;;  %v1514_v41 = vsel %vm1508_vm6, %v1449_v54, %v4918_v7  ;;  %2367 = vmatprep.subr.msk.mxu0 %vm1782_vm10, %v1725_v36  ;;  %v5817_v54 = vld [vmem:[#allocation41_spill] sm:$0xff] }
 0x276   : > { %v1579_v59 = vsel %vm1573_vm7, %v1514_v41, %v5812_v33  ;;  %v1677_v27 = vsel %vm1638_vm8, %v1612_v8, %v5813_v17 }
 0x277   : > { %v4932_v12 = vpop.permute.xlu1 %742  ;;  %v1644_v14 = vsel %vm1638_vm8, %v1579_v59, %v5814_v60  ;;  %v1742_v52 = vsel %vm1703_vm9, %v1677_v27, %v5815_v1  ;;  %v5818_v27 = vld [vmem:[#allocation118_spill] sm:$0xff] }
 0x278   : > { %v4938_v9 = vpop.permute.xlu0 %708  ;;  %v1709_v56 = vsel %vm1703_vm9, %v1644_v14, %v5816_v29  ;;  %2402 = vmatpush3.xpose.msk.msra.mxu1 %vm1782_vm10, %v1742_v52  ;;  %v1432_v32 = vsel %vm1378_vm3, %v4589_v16, %v4932_v12  ;;  %v1593_v60 = vsel %vm1573_vm7, %v4679_v57, %v5818_v27 }
 0x279   : > { %2368 = vmatpush3.xpose.msk.msra.mxu0 %vm1782_vm10, %v1709_v56  ;;  %v1399_v38 = vsel %vm1378_vm3, %v5817_v54, %v4938_v9 }
 0x27b   : > { %v4944_v25 = vpop.permute.xlu1 %726 }
 0x27c   : > { %v4946_v5 = vpop.permute.xlu0 %692  ;;  %v1416_v14 = vsel %vm1378_vm3, %v4662_v6, %v4944_v25 }
 0x27f   : > { %v4948_v26 = vpop.permute.xlu1 %838 }
 0x280   : > { %v4950_v23 = vpop.permute.xlu0 %804  ;;  %v1497_v36 = vsel %vm1443_vm5, %v1432_v32, %v4948_v26 }
 0x281   : > { %v1464_v41 = vsel %vm1443_vm5, %v1399_v38, %v4950_v23 }
 0x283   : > { %v4952_v44 = vpop.permute.xlu1 %822 }
 0x284   : > { %v4954_v13 = vpop.permute.xlu0 %788  ;;  %v1481_v29 = vsel %vm1443_vm5, %v1416_v14, %v4952_v44 }
 0x287   : > { %v4964_v8 = vpop.permute.xlu1 %934 }
 0x288   : > { %v1562_v33 = vsel %vm1508_vm6, %v1497_v36, %v4964_v8  ;;  %v4970_v59 = vpop.permute.xlu0 %900 }
 0x289   : > { %v1627_v16 = vsel %vm1573_vm7, %v1562_v33, %v4523_v4  ;;  %v1529_v17 = vsel %vm1508_vm6, %v1464_v41, %v4970_v59  ;;  %v1383_v4 = vsel %vm1378_vm3, %v4617_v19, %v4946_v5  ;;  %v5819_v19 = vld [vmem:[#allocation116_spill] sm:$0xff]  ;;  %v5820_v41 = vld [vmem:[#allocation121_spill] sm:$0xff] }
 0x28a   : > { %v1594_v1 = vsel %vm1573_vm7, %v1529_v17, %v4525_v24  ;;  %v1692_v52 = vsel %vm1638_vm8, %v1627_v16, %v4553_v31  ;;  %v1448_v24 = vsel %vm1443_vm5, %v1383_v4, %v4954_v13  ;;  %v1658_v33 = vsel %vm1638_vm8, %v1593_v60, %v5820_v41  ;;  %v5822_v60 = vld [vmem:[#allocation124_spill] sm:$0xff]  ;;  %v5824_v4 = vld [vmem:[#allocation6_spill] sm:$0xff] }
 0x28b   : > { %v4991_v56 = vpop.permute.xlu1 %918  ;;  %v1659_v57 = vsel %vm1638_vm8, %v1594_v1, %v4543_v53  ;;  %v1757_v6 = vsel %vm1703_vm9, %v1692_v52, %v4640_v21  ;;  %v5829_v41 = vld [vmem:[#allocation62_spill] sm:$0xff] }
 0x28c   : > { %v1546_v31 = vsel %vm1508_vm6, %v1481_v29, %v4991_v56  ;;  %v5001_v32 = vpop.permute.xlu0 %884  ;;  %v1724_v54 = vsel %vm1703_vm9, %v1659_v57, %v5819_v19  ;;  %2403 = vmatprep.subr.msk.mxu1 %vm1782_vm10, %v1757_v6  ;;  %v1429_v29 = vsel %vm1378_vm3, %v5824_v4, %v4852_v2  ;;  %v2516_v57 = vld [vmem:[%s2626_s24 + $0x8] sm:$0xff]  ;;  %v5825_v6 = vld [vmem:[#allocation53_spill] sm:$0xff] }
 0x28d   : > { %v1611_v38 = vsel %vm1573_vm7, %v1546_v31, %v4545_v48  ;;  %v1513_v53 = vsel %vm1508_vm6, %v1448_v24, %v5001_v32  ;;  %2369 = vmatprep.subr.msk.mxu0 %vm1782_vm10, %v1724_v54  ;;  %v1306_v24 = vsel %vm1304_vm2, %v2516_v57, %v5825_v6  ;;  %v1494_v31 = vsel %vm1443_vm5, %v1429_v29, %v4868_v28  ;;  %v5826_v19 = vld [vmem:[#allocation129_spill] sm:$0xff] }
 0x28e   : > { %v1578_v21 = vsel %vm1573_vm7, %v1513_v53, %v4531_v30  ;;  %v1676_v36 = vsel %vm1638_vm8, %v1611_v38, %v4600_v42  ;;  %v5821_v30 = vld [vmem:[#allocation8_spill] sm:$0xff]  ;;  %v5833_v6 = vld [vmem:[#allocation117_spill] sm:$0xff] }
 0x28f   : > { %v5017_v16 = vpop.permute.xlu1 %724  ;;  %v1643_v48 = vsel %vm1638_vm8, %v1578_v21, %v4569_v37  ;;  %v1741_v17 = vsel %vm1703_vm9, %v1676_v36, %v4705_v55  ;;  %v1723_v42 = vsel %vm1703_vm9, %v1658_v33, %v5821_v30  ;;  %v1592_v37 = vsel %vm1573_vm7, %v4796_v58, %v5822_v60  ;;  %v5823_v55 = vld [vmem:[#allocation123_spill] sm:$0xff]  ;;  %v5827_v21 = vld [vmem:[#allocation128_spill] sm:$0xff] }
 0x290   : > { %v741_v27 = vpop.permute.xlu0 %740  ;;  %v1708_v14 = vsel %vm1703_vm9, %v1643_v48, %v4668_v61  ;;  %2404 = vmatpush3.xpose.msk.msra.mxu1 %vm1782_vm10, %v1741_v17  ;;  %v1625_v52 = vsel %vm1573_vm7, %v4821_v3, %v5823_v55  ;;  %v1415_v58 = vsel %vm1378_vm3, %v4782_v11, %v5017_v16  ;;  %v1657_v54 = vsel %vm1638_vm8, %v1592_v37, %v5826_v19  ;;  %v5828_v36 = vld [vmem:[#allocation115_spill] sm:$0xff]  ;;  %v5836_v19 = vld [vmem:[#allocation133_spill] sm:$0xff] }
 0x291   : > { %2370 = vmatpush3.xpose.msk.msra.mxu0 %vm1782_vm10, %v1708_v14  ;;  %v1559_v3 = vsel %vm1508_vm6, %v1494_v31, %v4884_v62  ;;  %v1431_v2 = vsel %vm1378_vm3, %v4748_v20, %v741_v27  ;;  %v1690_v28 = vsel %vm1638_vm8, %v1625_v52, %v5827_v21  ;;  %v1609_v11 = vsel %vm1573_vm7, %v4836_v10, %v5828_v36  ;;  %v5830_v17 = vld [vmem:[#allocation127_spill] sm:$0xff]  ;;  %v5832_v52 = vld [vmem:[#allocation64_spill] sm:$0xff]  ;;  %v5834_v31 = vld [vmem:[#allocation85_spill] sm:$0xff] }
 0x292   : > { %2371 = vmatprep.subr.msk.mxu0 %vm1782_vm10, %v1723_v42  ;;  %v1396_v33 = vsel %vm1378_vm3, %v5829_v41, %v4858_v45  ;;  %v1413_v14 = vsel %vm1378_vm3, %v5830_v17, %v4864_v43  ;;  %v5831_v60 = vld [vmem:[#allocation135_spill] sm:$0xff]  ;;  %v5840_v21 = vld [vmem:[#allocation17_spill] sm:$0xff] }
 0x293   : > { %v5033_v1 = vpop.permute.xlu1 %820  ;;  %v1461_v30 = vsel %vm1443_vm5, %v1396_v33, %v4870_v18  ;;  %v1478_v45 = vsel %vm1443_vm5, %v1413_v14, %v4872_v35  ;;  %v1624_v37 = vsel %vm1573_vm7, %v1559_v3, %v5831_v60  ;;  %v5837_v3 = vld [vmem:[#allocation137_spill] sm:$0xff]  ;;  %v5842_v33 = vld [vmem:[#allocation120_spill] sm:$0xff]  ;;  %v5845_v60 = vld [vmem:[#allocation138_spill] sm:$0xff] }
 0x294   : > { %v837_v61 = vpop.permute.xlu0 %836  ;;  %v1480_v38 = vsel %vm1443_vm5, %v1415_v58, %v5033_v1  ;;  %v1526_v18 = vsel %vm1508_vm6, %v1461_v30, %v4890_v0  ;;  %v1343_v58 = vsel %vm1341_vm4, %v1306_v24, %v5834_v31  ;;  %v5838_v24 = vld [vmem:[#allocation131_spill] sm:$0xff] }
 0x295   : > { %v1496_v62 = vsel %vm1443_vm5, %v1431_v2, %v837_v61  ;;  %v1412_v2 = vsel %vm1378_vm3, %v5837_v3, %v4944_v25  ;;  %v5857_v3 = vld [vmem:[#allocation31_spill] sm:$0xff] }
 0x297   : > { %v5057_v53 = vpop.permute.xlu1 %916 }
 0x298   : > { %v1545_v20 = vsel %vm1508_vm6, %v1480_v38, %v5057_v53  ;;  %v933_v48 = vpop.permute.xlu0 %932  ;;  %v5839_v38 = vld [vmem:[#allocation139_spill] sm:$0xff] }
 0x299   : > { %v1610_v10 = vsel %vm1573_vm7, %v1545_v20, %v4733_v40  ;;  %v1561_v42 = vsel %vm1508_vm6, %v1496_v62, %v933_v48  ;;  %v1428_v40 = vsel %vm1378_vm3, %v5832_v52, %v4932_v12  ;;  %v1674_v12 = vsel %vm1638_vm8, %v1609_v11, %v5833_v6  ;;  %v5841_v11 = vld [vmem:[#allocation83_spill] sm:$0xff]  ;;  %v5843_v20 = vld [vmem:[#allocation30_spill] sm:$0xff] }
 0x29a   : > { %v1626_v55 = vsel %vm1573_vm7, %v1561_v42, %v4723_v22  ;;  %v1675_v43 = vsel %vm1638_vm8, %v1610_v10, %v4750_v49  ;;  %v1543_v22 = vsel %vm1508_vm6, %v1478_v45, %v4908_v63  ;;  %v1493_v49 = vsel %vm1443_vm5, %v1428_v40, %v4948_v26  ;;  %v5835_v63 = vld [vmem:[#allocation132_spill] sm:$0xff]  ;;  %v5849_v52 = vld [vmem:[#allocation59_spill] sm:$0xff] }
 0x29b   : > { %v1095_v4 = vpop.permute.xlu1 %1094  ;;  %v1691_v35 = vsel %vm1638_vm8, %v1626_v55, %v4738_v34  ;;  %v1740_v29 = vsel %vm1703_vm9, %v1675_v43, %v4812_v15  ;;  %v1558_v34 = vsel %vm1508_vm6, %v1493_v49, %v4964_v8  ;;  %v1722_v26 = vsel %vm1703_vm9, %v1657_v54, %v5835_v63  ;;  %v5844_v42 = vld [vmem:[#allocation76_spill] sm:$0xff]  ;;  %v5846_v55 = vld [vmem:[#allocation82_spill] sm:$0xff] }
 0x29c   : > { %v987_v57 = vpop.permute.xlu0 %986  ;;  %v1756_v0 = vsel %vm1703_vm9, %v1691_v35, %v4773_v51  ;;  %v1591_v51 = vsel %vm1573_vm7, %v1526_v18, %v5836_v19  ;;  %v1755_v8 = vsel %vm1703_vm9, %v1690_v28, %v5838_v24  ;;  %v1608_v36 = vsel %vm1573_vm7, %v1543_v22, %v5840_v21  ;;  %v5850_v35 = vld [vmem:[#allocation20_spill] sm:$0xff]  ;;  %v5851_v49 = vld [vmem:[#allocation74_spill] sm:$0xff] }
 0x29d   : > { %v1577_v15 = vsel %vm1573_vm7, %v4702_v47, %v987_v57  ;;  %2405 = vmatprep.subr.msk.mxu1 %vm1782_vm10, %v1756_v0  ;;  %v1689_v47 = vsel %vm1638_vm8, %v1624_v37, %v5839_v38  ;;  %v1477_v54 = vsel %vm1443_vm5, %v1412_v2, %v4952_v44  ;;  %v1427_v41 = vsel %vm1378_vm3, %v5841_v11, %v741_v27  ;;  %v5860_v11 = vld [vmem:[#allocation21_spill] sm:$0xff] }
 0x29e   : > { %2406 = vmatpush3.xpose.msk.msra.mxu1 %vm1782_vm10, %v1740_v29  ;;  %v1739_v62 = vsel %vm1703_vm9, %v1674_v12, %v5842_v33  ;;  %v1623_v28 = vsel %vm1573_vm7, %v1558_v34, %v5843_v20  ;;  %v1542_v17 = vsel %vm1508_vm6, %v1477_v54, %v4991_v56  ;;  %v1492_v14 = vsel %vm1443_vm5, %v1427_v41, %v837_v61  ;;  %v5847_v56 = vld [vmem:[#allocation11_spill] sm:$0xff]  ;;  %v5852_v34 = vld [vmem:[#allocation22_spill] sm:$0xff] }
 0x29f   : > { %2407 = vmatprep.subr.msk.mxu1 %vm1782_vm10, %v1755_v8  ;;  %v985_v25 = vpop.permute.xlu1 %984  ;;  %v1642_v30 = vsel %vm1638_vm8, %v1577_v15, %v1095_v4  ;;  %v1557_v10 = vsel %vm1508_vm6, %v1492_v14, %v933_v48  ;;  %v1754_v45 = vsel %vm1703_vm9, %v1689_v47, %v5844_v42  ;;  %v1656_v37 = vsel %vm1638_vm8, %v1591_v51, %v5845_v60  ;;  %v5848_v48 = vld [vmem:[#allocation125_spill] sm:$0xff]  ;;  %v5858_v8 = vld [vmem:[#allocation55_spill] sm:$0xff] }
 0x2a0   : > { %v1203_v44 = vpop.permute.xlu0 %1202  ;;  %v1395_v43 = vsel %vm1378_vm3, %v5846_v55, %v4938_v9  ;;  %v1411_v61 = vsel %vm1378_vm3, %v5847_v56, %v5017_v16  ;;  %v1673_v18 = vsel %vm1638_vm8, %v1608_v36, %v5848_v48  ;;  %v1607_v40 = vsel %vm1573_vm7, %v1542_v17, %v5849_v52  ;;  %v5859_v36 = vld [vmem:[#allocation84_spill] sm:$0xff]  ;;  %v5863_v17 = vld [vmem:[#allocation69_spill] sm:$0xff]  ;;  %v5865_v60 = vld [vmem:[#allocation99_spill] sm:$0xff] }
 0x2a1   : > { %v1707_v27 = vsel %vm1703_vm9, %v1642_v30, %v1203_v44  ;;  %v1476_v4 = vsel %vm1443_vm5, %v1411_v61, %v5033_v1  ;;  %v1688_v16 = vsel %vm1638_vm8, %v1623_v28, %v5850_v35  ;;  %v1460_v29 = vsel %vm1443_vm5, %v1395_v43, %v4950_v23  ;;  %v5864_v30 = vld [vmem:[#allocation86_spill] sm:$0xff]  ;;  %v5866_v43 = vld [vmem:[#allocation37_spill] sm:$0xff]  ;;  %v1769_v48 = vld [vmem:[%s5265_s1 + $0x8] sm:$0xff] }
 0x2a2   : > { %2372 = vmatpush3.xpose.msk.msra.mxu0 %vm1782_vm10, %v1707_v27  ;;  %2408 = vmatpush3.xpose.msk.msra.mxu1 %vm1782_vm10, %v1739_v62  ;;  %v1541_v22 = vsel %vm1508_vm6, %v1476_v4, %v5057_v53  ;;  %v1622_v57 = vsel %vm1573_vm7, %v1557_v10, %v5851_v49  ;;  %v1576_v1 = vsel %vm1573_vm7, %v4844_v46, %v985_v25  ;;  %v5853_v46 = vld [vmem:[#allocation34_spill] sm:$0xff]  ;;  %v5861_v25 = vld [vmem:[#allocation13_spill] sm:$0xff] }
 0x2a3   : > { %2373 = vmatprep.subr.msk.mxu0 %vm1782_vm10, %v1722_v26  ;;  %2409 = vmatprep.subr.msk.mxu1 %vm1782_vm10, %v1754_v45  ;;  %v1201_v9 = vpop.permute.xlu1 %1200  ;;  %v1380_v6 = vsel %vm1378_vm3, %v1343_v58, %v4866_v39  ;;  %v1525_v12 = vsel %vm1508_vm6, %v1460_v29, %v4970_v59  ;;  %v1738_v23 = vsel %vm1703_vm9, %v1673_v18, %v5852_v34  ;;  %v5854_v26 = vld [vmem:[#allocation134_spill] sm:$0xff]  ;;  %v5862_v62 = vld [vmem:[#allocation49_spill] sm:$0xff] }
 0x2a4   : > { %v1093_v0 = vpop.permute.xlu0 %1092  ;;  %v1445_v53 = vsel %vm1443_vm5, %v1380_v6, %v4874_v50  ;;  %v1753_v63 = vsel %vm1703_vm9, %v1688_v16, %v5853_v46  ;;  %v1672_v39 = vsel %vm1638_vm8, %v1607_v40, %v5854_v26  ;;  %v5855_v58 = vld [vmem:[#allocation126_spill] sm:$0xff]  ;;  %v5856_v50 = vld [vmem:[#allocation81_spill] sm:$0xff]  ;;  %v1687_v2 = vsel %vm1638_vm8, %v1622_v57, %v5857_v3 }
 0x2a5   : > { %v1641_v31 = vsel %vm1638_vm8, %v1576_v1, %v1093_v0  ;;  %v1606_v59 = vsel %vm1573_vm7, %v1541_v22, %v5855_v58  ;;  %v1721_v51 = vsel %vm1703_vm9, %v1656_v37, %v5856_v50  ;;  %v1510_v24 = vsel %vm1508_vm6, %v1445_v53, %v4918_v7  ;;  %v2517_v7 = vld [vmem:[%s2626_s24] sm:$0xff] }
 0x2a6   : > { %2410 = vmatpush3.xpose.msk.msra.mxu1 %vm1782_vm10, %v1738_v23  ;;  %v1706_v15 = vsel %vm1703_vm9, %v1641_v31, %v1201_v9  ;;  %v1590_v38 = vsel %vm1573_vm7, %v1525_v12, %v5858_v8  ;;  %v1737_v54 = vsel %vm1703_vm9, %v1672_v39, %v5859_v36  ;;  %v1752_v41 = vsel %vm1703_vm9, %v1687_v2, %v5860_v11  ;;  %v5867_v40 = vld [vmem:[#allocation18_spill] sm:$0xff] }
 0x2a7   : > { %2374 = vmatpush3.xpose.msk.msra.mxu0 %vm1782_vm10, %v1706_v15  ;;  %2411 = vmatprep.subr.msk.mxu1 %vm1782_vm10, %v1753_v63  ;;  %v1091_v19 = vpop.permute.xlu1 %1090  ;;  %v1671_v33 = vsel %vm1638_vm8, %v1606_v59, %v5861_v25  ;;  %v1305_v20 = vsel %vm1304_vm2, %v2517_v7, %v5862_v62  ;;  %v1655_v14 = vsel %vm1638_vm8, %v1590_v38, %v5863_v17 }
 0x2a8   : > { %2375 = vmatprep.subr.msk.mxu0 %vm1782_vm10, %v1721_v51  ;;  %v983_v47 = vpop.permute.xlu0 %982  ;;  %v1342_v44 = vsel %vm1341_vm4, %v1305_v20, %v5864_v30  ;;  %v1736_v37 = vsel %vm1703_vm9, %v1671_v33, %v5865_v60  ;;  %v1720_v56 = vsel %vm1703_vm9, %v1655_v14, %v5866_v43 }
 0x2a9   : > { %v1575_v21 = vsel %vm1573_vm7, %v1510_v24, %v983_v47  ;;  %v1379_v42 = vsel %vm1378_vm3, %v1342_v44, %v4946_v5 }
 0x2aa   : > { %2412 = vmatpush3.xpose.msk.msra.mxu1 %vm1782_vm10, %v1737_v54  ;;  %v1640_v10 = vsel %vm1638_vm8, %v1575_v21, %v1091_v19  ;;  %v1444_v55 = vsel %vm1443_vm5, %v1379_v42, %v4954_v13 }
 0x2ab   : > { %2413 = vmatprep.subr.msk.mxu1 %vm1782_vm10, %v1752_v41  ;;  %v981_v28 = vpop.permute.xlu1 %980  ;;  %v1509_v61 = vsel %vm1508_vm6, %v1444_v55, %v5001_v32 }
 0x2ac   : > { %v1199_v27 = vpop.permute.xlu0 %1198  ;;  %v1574_v18 = vsel %vm1573_vm7, %v1509_v61, %v981_v28 }
 0x2ad   : > { %v1705_v45 = vsel %vm1703_vm9, %v1640_v10, %v1199_v27 }
 0x2ae   : > { %2376 = vmatpush3.xpose.msk.msra.mxu0 %vm1782_vm10, %v1705_v45  ;;  %2414 = vmatpush3.xpose.msk.msra.mxu1 %vm1782_vm10, %v1736_v37 }
 0x2af   : > { %2377 = vmatprep.subr.msk.mxu0 %vm1782_vm10, %v1720_v56  ;;  %v1197_v5 = vpop.permute.xlu1 %1196 }
 0x2b0   : > { %v1089_v13 = vpop.permute.xlu0 %1088 }
 0x2b1   : > { %v1639_v52 = vsel %vm1638_vm8, %v1574_v18, %v1089_v13  ;;  %2416 = vmatmul.mubr.msk.f32.vlgmr.msra.gmra.mxu1 %vm1782_vm10, %v5867_v40 }
 0x2b2   : > { %v1704_v4 = vsel %vm1703_vm9, %v1639_v52, %v1197_v5  ;;  %2417 = vmatprep.mubr.msk.f32.mxu1 %vm1782_vm10, %v1769_v48 }
 0x2b3   : > { %2378 = vmatpush3.xpose.msk.msra.mxu0 %vm1782_vm10, %v1704_v4 }
 0x2b5   : > { %2418 = vmatmul.mubr.msk.f32.gmra.mxu1 %vm1782_vm10, %v1769_v48 }
 0x2b6   : > { %2380 = vmatmul.mubr.msk.f32.vlgmr.msra.gmra.mxu0 %vm1782_vm10, %v5867_v40 }
 0x2b7   : > { %2381 = vmatprep.mubr.msk.f32.mxu0 %vm1782_vm10, %v1769_v48 }
 0x2ba   : > { %2382 = vmatmul.mubr.msk.f32.gmra.mxu0 %vm1782_vm10, %v1769_v48 }
 0x2bc   : > { %v1775_v51 = vpop.permute.xlu1 %1774 }
 0x2bd   : > { %v1780_v35 = vpop.permute.xlu0 %1779 }
 0x371   : > { %v2124_v32 = vpop.f32.mrf.mxu1 }
 0x372   : > { %v2125_v38 = vadd.f32 %v2124_v32, %v1775_v51 }
 0x373   : > { %v2126_v9 = vpop.f32.mrf.mxu1 }
 0x374   : > { %v2127_v54 = vadd.f32 %v2126_v9, %v1775_v51 }
 0x375   : > { %v2130_v16 = vpop.f32.mrf.mxu1 }
 0x376   : > { %v2131_v29 = vadd.f32 %v2130_v16, %v1780_v35  ;;  %v2047_v22 = vpop.f32.mrf.mxu0 }
 0x377   : > { %v2132_v49 = vpop.f32.mrf.mxu1  ;;  %v2048_v2 = vadd.f32 %v2047_v22, %v1775_v51 }
 0x378   : > { %v2343_v57 = vmul.f32 -1.442695, %v2131_v29  ;;  %v2133_v1 = vadd.f32 %v2132_v49, %v1780_v35  ;;  %v2049_v0 = vpop.f32.mrf.mxu0 }
 0x379   : > { %v2050_v47 = vadd.f32 %v2049_v0, %v1775_v51 }
 0x37a   : > { %2471 = vpow2.f32 %v2343_v57  ;;  %v2344_v6 = vmul.f32 -1.442695, %v2133_v1  ;;  %v2053_v12 = vpop.f32.mrf.mxu0 }
 0x37b   : > { %v2054_v31 = vadd.f32 %v2053_v12, %v1780_v35 }
 0x37c   : > { %2473 = vpow2.f32 %v2344_v6  ;;  %v2055_v34 = vpop.f32.mrf.mxu0 }
 0x37d   : > { %v2341_v23 = vmul.f32 -1.442695, %v2054_v31  ;;  %v2056_v53 = vadd.f32 %v2055_v34, %v1780_v35 }
 0x37f   : > { %2475 = vpow2.f32 %v2341_v23  ;;  %v2342_v15 = vmul.f32 -1.442695, %v2056_v53 }
 0x381   : > { %2477 = vpow2.f32 %v2342_v15 }
 0x387   : > { %v2472_v46 = vpop.eup %2471 }
 0x388   : > { %v2149_v26 = vadd.f32 1.0, %v2472_v46 }
 0x389   : > { %v2474_v63 = vpop.eup %2473 }
 0x38a   : > { %v2150_v58 = vadd.f32 1.0, %v2474_v63  ;;  %2479 = vrcp.f32 %v2149_v26 }
 0x38c   : > { %v2476_v39 = vpop.eup %2475 }
 0x38d   : > { %v2147_v59 = vadd.f32 1.0, %v2476_v39 }
 0x38e   : > { %v2478_v19 = vpop.eup %2477 }
 0x38f   : > { %2481 = vrcp.f32 %v2147_v59  ;;  %v2148_v50 = vadd.f32 1.0, %v2478_v19 }
 0x390   : > { %2483 = vrcp.f32 %v2150_v58 }
 0x391   : > { %2485 = vrcp.f32 %v2148_v50 }
 0x397   : > { %v2480_v3 = vpop.eup %2479 }
 0x398   : > { %v2161_v11 = vmul.f32 %v2480_v3, %v2125_v38 }
 0x39a   : > { %v2170_v28 = vmul.f32 %v2161_v11, %v2161_v11 }
 0x39c   : > { %v2482_v24 = vpop.eup %2481 }
 0x39d   : > { %v2484_v8 = vpop.eup %2483  ;;  %v2159_v21 = vmul.f32 %v2482_v24, %v2048_v2 }
 0x39e   : > { %v2486_v36 = vpop.eup %2485  ;;  %v2162_v25 = vmul.f32 %v2484_v8, %v2127_v54 }
 0x39f   : > { %v2160_v41 = vmul.f32 %v2486_v36, %v2050_v47  ;;  %v2168_v7 = vmul.f32 %v2159_v21, %v2159_v21 }
 0x3a0   : > { %v2171_v30 = vmul.f32 %v2162_v25, %v2162_v25 }
 0x3a1   : > { %v2163_v33 = vadd.f32 %v2160_v41, %v2159_v21  ;;  %v2169_v62 = vmul.f32 %v2160_v41, %v2160_v41 }
 0x3a3   : > { %v2164_v20 = vadd.f32 %v2163_v33, %v2161_v11  ;;  %v2172_v17 = vadd.f32 %v2169_v62, %v2168_v7 }
 0x3a5   : > { %v2165_v14 = vadd.f32 %v2164_v20, %v2162_v25  ;;  %v2173_v44 = vadd.f32 %v2172_v17, %v2170_v28 }
 0x3a7   : > { %2166 = vadd.xlane.f32.xlu1 %v2165_v14  ;;  %v2174_v10 = vadd.f32 %v2173_v44, %v2171_v30 }
 0x3a9   : > { %2175 = vadd.xlane.f32.xlu0 %v2174_v10 }
 0x430   : > { %v2167_v27 = vpop.xlane.xlu1 %2166 }
 0x432   : > { %v2176_v42 = vpop.xlane.xlu0 %2175 }
 0x433   : > { %v2178_v45 = vsel %vm2177_vm11, %v2167_v27, %v2176_v42 }
 0x434   : > { %2180 = vst.msk [vmem:[%s190_s26] sm:$0xff] %vm2179_vm12, %v2178_v45 }
 0x435 PF: > { %s13_s16 = sadd.s32 1, %s2556_s16   ;;  %s5868_s12 = smov %s2548_s14 }
 0x436   : > { %p10_p7 = scmp.ge.s32.totalorder %s13_s16, 6   ;;  %s5869_s13 = smov %s2552_s15 }
 0x437   : > { %s5870_s14 = smov %s5873_s17  ;;  %s5871_s15 = smov %s5877_s18 }
 0x438   :  { %12 = sbr.rel (!%p10_p7) target bundleno = 3 (0x3), region = 63 }

</bundles_post_ra>
